<compile_context>
chip_gen: v7x
topology: tpu7x:2x2x1
jax: 0.10.0
libtpu: 0.0.40
codegen_flags: <defaults>
</compile_context>

<pallas_src>
import functools

import numpy as np
import jax
import jax.numpy as jnp
from jax import lax
from jax.experimental import pallas as pl
from jax.experimental.pallas import tpu as pltpu


def _round_up(n, m):
    return ((n + m - 1) // m) * m


# ------------------------------ fused kernel -------------------------------

def _network2_kernel(bt, x_ref, b1w_ref, b1_ref, b2w_ref, b2_ref,
                     wf1_ref, bf1_ref, wf2_ref, bf2_ref, wf3_ref, bf3_ref,
                     wo_ref, bo_ref, o_ref):
    f32 = jnp.float32
    x = x_ref[...]                                    # (14, BT, 56): [pair, b, s*28+r]

    # --- conv1 + ReLU + 2x2 max-pool: ONE matmul ----------------------------
    # LHS rows (k, b), k = pooled row 0..11; lanes j*28+r, j = row offset 0..5
    # (input row = 2k + j).  The three windows are outer-dim slices (no sublane
    # shifts); the only prep is one lane concatenation.
    l1 = jnp.concatenate([x[0:12], x[1:13], x[2:14]], axis=2)    # (12, BT, 168)
    l1 = l1.reshape(12 * bt, 168)
    r1 = jnp.dot(l1, b1w_ref[...], preferred_element_type=f32)   # (12*BT, 1024)
    # N layout = (dy, dx) pool parities in 256-lane blocks; lane = c1*12 + q.
    p1 = jnp.maximum(jnp.maximum(r1[:, 0:144], r1[:, 256:400]),
                     jnp.maximum(r1[:, 512:656], r1[:, 768:912]))
    p1 = jnp.maximum(p1 + b1_ref[...], 0.0)                      # (12*BT, 144)

    # --- conv2 + ReLU + 2x2 max-pool -----------------------------------------
    # LHS rows (y2, b), y2 = conv2 row 0..7; lanes i*144 + (c1*12+q).  Row-block
    # slices are sublane-tile aligned because BT % 8 == 0.
    l2 = jnp.concatenate([p1[i * bt:(i + 8) * bt, :] for i in range(5)],
                         axis=1)                                 # (8*BT, 720)
    r2 = jnp.dot(l2, b2w_ref[...], preferred_element_type=f32)   # (8*BT, 256)
    # horizontal pool (dx parities in 128-lane blocks; lane = c2*4 + u).
    m1 = jnp.maximum(r2[:, 0:96], r2[:, 128:224])
    m1 = jnp.maximum(m1 + b2_ref[...], 0.0)                      # (8*BT, 96)
    # vertical pool: pair adjacent y2 row-blocks (aligned outer-dim reshape).
    m1 = m1.reshape(4, 2, bt, 96)
    p2 = jnp.maximum(m1[:, 0], m1[:, 1])                         # (4, BT, 96)

    # --- FC stack (torch flatten permutation folded into wf1 at prep time) ---
    h = jnp.dot(p2[0], wf1_ref[0], preferred_element_type=f32)
    for m in range(1, 4):
        h = h + jnp.dot(p2[m], wf1_ref[m], preferred_element_type=f32)
    h = jnp.maximum(h + bf1_ref[...], 0.0)                       # (BT, 240)
    h = jnp.maximum(jnp.dot(h, wf2_ref[...], preferred_element_type=f32)
                    + bf2_ref[...], 0.0)                         # (BT, 120)
    h = jnp.maximum(jnp.dot(h, wf3_ref[...], preferred_element_type=f32)
                    + bf3_ref[...], 0.0)                         # (BT, 60)
    o_ref[...] = (jnp.dot(h, wo_ref[...], preferred_element_type=f32)
                  + bo_ref[...])                                 # (BT, 10)


# --------------------------- weight preparation -----------------------------

def _conv1_band(w1):
    """(12,1,5,5) -> (168, 1024): VALID conv1 with BOTH halves of the 2x2
    max-pool folded into one banded matrix.

      band[28*j + r, dy*512 + dx*256 + c*12 + q] = w1[c, 0, j - dy, r - (2q+dx)]
    (zero outside kernel support; lanes 144..255 of each 256 block are zero so
    the four (dy, dx) pool-parity slices start on 128-lane boundaries)."""
    j = jnp.arange(6).reshape(6, 1, 1, 1, 1, 1)
    r = jnp.arange(28).reshape(1, 28, 1, 1, 1, 1)
    dy = jnp.arange(2).reshape(1, 1, 2, 1, 1, 1)
    dx = jnp.arange(2).reshape(1, 1, 1, 2, 1, 1)
    c = jnp.arange(12).reshape(1, 1, 1, 1, 12, 1)
    q = jnp.arange(12).reshape(1, 1, 1, 1, 1, 12)
    ki = j - dy
    kx = r - (2 * q + dx)
    valid = (ki >= 0) & (ki <= 4) & (kx >= 0) & (kx <= 4)
    w1c = w1[:, 0]                                               # (12, 5, 5)
    vals = w1c[c, jnp.clip(ki, 0, 4), jnp.clip(kx, 0, 4)]        # (6,28,2,2,12,12)
    vals = jnp.where(valid, vals, 0.0).astype(jnp.float32)
    band = jnp.zeros((6, 28, 2, 2, 256), jnp.float32)
    band = band.at[..., :144].set(vals.reshape(6, 28, 2, 2, 144))
    return band.reshape(168, 1024)


def _conv2_band(w2):
    """(24,12,5,5) -> (720, 256): VALID conv2 with the horizontal half of the
    2x2 max-pool folded in.

      band[i*144 + c*12 + q, dx*128 + d*4 + u] = w2[d, c, i, q - (2u + dx)]"""
    i = jnp.arange(5).reshape(5, 1, 1, 1, 1, 1)
    c = jnp.arange(12).reshape(1, 12, 1, 1, 1, 1)
    q = jnp.arange(12).reshape(1, 1, 12, 1, 1, 1)
    dx = jnp.arange(2).reshape(1, 1, 1, 2, 1, 1)
    d = jnp.arange(24).reshape(1, 1, 1, 1, 24, 1)
    u = jnp.arange(4).reshape(1, 1, 1, 1, 1, 4)
    kx = q - (2 * u + dx)
    valid = (kx >= 0) & (kx <= 4)
    vals = w2[d, c, i, jnp.clip(kx, 0, 4)]                       # (5,12,12,2,24,4)
    vals = jnp.where(valid, vals, 0.0).astype(jnp.float32)
    band = jnp.zeros((5, 12, 12, 2, 128), jnp.float32)
    band = band.at[..., :96].set(vals.reshape(5, 12, 12, 2, 96))
    return band.reshape(720, 256)


def _prep_params(params):
    (w1, b1, w2, b2, wf1, bf1, wf2, bf2, wf3, bf3, wo, bo) = params
    b1w = _conv1_band(w1)                        # (168, 1024)
    b2w = _conv2_band(w2)                        # (720, 256)
    b1row = jnp.repeat(b1, 12)[None, :]          # (1, 144)  lane = c1*12 + q
    b2row = jnp.repeat(b2, 4)[None, :]           # (1, 96)   lane = c2*4 + u
    # fc1 rows re-ordered from torch's (c2, m, u) flatten to (m, c2*4 + u).
    wf1p = jnp.transpose(wf1.T.reshape(24, 4, 4, 240),
                         (1, 0, 2, 3)).reshape(4, 96, 240)
    return (b1w, b1row, b2w, b2row, wf1p, bf1[None, :],
            wf2.T, bf2[None, :], wf3.T, bf3[None, :], wo.T, bo[None, :])


# ------------------------------ forward wrapper -----------------------------

def network2_forward(x_nchw, params, *, b_tile_max=128):
    B = x_nchw.shape[0]
    bt = min(b_tile_max, _round_up(max(B, 1), 8))   # batch tile (multiple of 8)
    bp = _round_up(B, bt)                           # padded batch
    prep = _prep_params(params)

    x = x_nchw[:, 0, :, :]                          # (B, 28, 28), Cin == 1
    if bp != B:
        x = jnp.pad(x, ((0, bp - B), (0, 0), (0, 0)))
    # Pair adjacent input rows into lanes, spatial-major / batch-minor:
    #   xt[p, b, s*28 + r] = x[b, 2p + s, r]   (free, row-major reshape).
    xt = x.reshape(bp, 14, 2, 28).transpose(1, 0, 2, 3).reshape(14, bp, 56)

    def const_spec(shape):
        zeros = (0,) * len(shape)
        return pl.BlockSpec(shape, lambda g, _z=zeros: _z)

    kernel = functools.partial(_network2_kernel, bt)
    out = pl.pallas_call(
        kernel,
        out_shape=jax.ShapeDtypeStruct((bp, 10), jnp.float32),
        grid=(bp // bt,),
        in_specs=[pl.BlockSpec((14, bt, 56), lambda g: (0, g, 0))]
        + [const_spec(w.shape) for w in prep],
        out_specs=pl.BlockSpec((bt, 10), lambda g: (g, 0)),
        compiler_params=pltpu.CompilerParams(
            dimension_semantics=("parallel",),
            vmem_limit_bytes=40 * 1024 * 1024),
    )(xt, *prep)
    return out[:B]


# --------------------------- reference (plain JAX) --------------------------

def reference_forward(x_nchw, params):
    (w1, b1, w2, b2, wf1, bf1, wf2, bf2, wf3, bf3, wo, bo) = params
    dn = ('NCHW', 'OIHW', 'NCHW')

    def pool(y):
        return lax.reduce_window(y, -jnp.inf, lax.max,
                                 (1, 1, 2, 2), (1, 1, 2, 2), 'VALID')

    y = lax.conv_general_dilated(x_nchw, w1, (1, 1), 'VALID',
                                 dimension_numbers=dn)
    y = pool(jnp.maximum(y + b1[None, :, None, None], 0.0))
    y = lax.conv_general_dilated(y, w2, (1, 1), 'VALID',
                                 dimension_numbers=dn)
    y = pool(jnp.maximum(y + b2[None, :, None, None], 0.0))
    y = y.reshape(y.shape[0], -1)
    y = jnp.maximum(y @ wf1.T + bf1, 0.0)
    y = jnp.maximum(y @ wf2.T + bf2, 0.0)
    y = jnp.maximum(y @ wf3.T + bf3, 0.0)
    return y @ wo.T + bo


# ------------------------------- parameters ---------------------------------

def init_params(key):
    """Deterministic PyTorch-shaped params (uniform(+-1/sqrt(fan_in)))."""
    ks = jax.random.split(key, 12)

    def u(k, shape, fan_in):
        bound = 1.0 / np.sqrt(fan_in)
        return jax.random.uniform(k, shape, jnp.float32, -bound, bound)

    w1 = u(ks[0], (12, 1, 5, 5), 25);     b1 = u(ks[1], (12,), 25)
    w2 = u(ks[2], (24, 12, 5, 5), 300);   b2 = u(ks[3], (24,), 300)
    wf1 = u(ks[4], (240, 384), 384);      bf1 = u(ks[5], (240,), 384)
    wf2 = u(ks[6], (120, 240), 240);      bf2 = u(ks[7], (120,), 240)
    wf3 = u(ks[8], (60, 120), 120);       bf3 = u(ks[9], (60,), 120)
    wo = u(ks[10], (10, 60), 60);         bo = u(ks[11], (10,), 60)
    return (w1, b1, w2, b2, wf1, bf1, wf2, bf2, wf3, bf3, wo, bo)


if __name__ == "__main__":
    key = jax.random.PRNGKey(0)
    k_x, k_p, k_xb = jax.random.split(key, 3)
    params = init_params(k_p)
    fwd = jax.jit(network2_forward)

    # Small batch (shape implied by the module: 1 channel, 28x28).
    x = jax.random.normal(k_x, (2, 1, 28, 28), dtype=jnp.float32)
    out = jax.block_until_ready(fwd(x, params))
    assert out.shape == (2, 10), out.shape
    ref = jax.block_until_ready(reference_forward(x, params))
    np.testing.assert_allclose(np.asarray(out), np.asarray(ref),
                               rtol=2e-4, atol=2e-4)

    # Larger, non-multiple batch: exercises the batched grid (2 steps) and the
    # ragged tail handling (padding to the batch tile).
    xb = jax.random.normal(k_xb, (200, 1, 28, 28), dtype=jnp.float32)
    outb = jax.block_until_ready(fwd(xb, params))
    assert outb.shape == (200, 10), outb.shape
    refb = jax.block_until_ready(reference_forward(xb, params))
    np.testing.assert_allclose(np.asarray(outb), np.asarray(refb),
                               rtol=5e-4, atol=5e-4)

    print("KERNEL_OK")
</pallas_src>

<mosaic_0001>
module attributes {stable_mosaic.version = 11 : i64} {
  func.func @_network2_kernel(%arg0: i32, %arg1: memref<14x8x56xf32, #tpu.memory_space<vmem>>, %arg2: memref<168x1024xf32, #tpu.memory_space<vmem>>, %arg3: memref<1x144xf32, #tpu.memory_space<vmem>>, %arg4: memref<720x256xf32, #tpu.memory_space<vmem>>, %arg5: memref<1x96xf32, #tpu.memory_space<vmem>>, %arg6: memref<4x96x240xf32, #tpu.memory_space<vmem>>, %arg7: memref<1x240xf32, #tpu.memory_space<vmem>>, %arg8: memref<240x120xf32, #tpu.memory_space<vmem>>, %arg9: memref<1x120xf32, #tpu.memory_space<vmem>>, %arg10: memref<120x60xf32, #tpu.memory_space<vmem>>, %arg11: memref<1x60xf32, #tpu.memory_space<vmem>>, %arg12: memref<60x10xf32, #tpu.memory_space<vmem>>, %arg13: memref<1x10xf32, #tpu.memory_space<vmem>>, %arg14: memref<8x10xf32, #tpu.memory_space<vmem>>) attributes {dimension_semantics = [#tpu.dimension_semantics<parallel>], iteration_bounds = array<i64: 1>, scalar_prefetch = 0 : i64, scratch_operands = 0 : i64, tpu.core_type = #tpu.core_type<tc>, window_params = [{transform_indices = @transform_0, window_bounds = array<i64: 14, 8, 56>}, {pipeline_mode = #tpu.pipeline_mode<synchronous>, transform_indices = @transform_1, window_bounds = array<i64: 168, 1024>}, {pipeline_mode = #tpu.pipeline_mode<synchronous>, transform_indices = @transform_2, window_bounds = array<i64: 1, 144>}, {pipeline_mode = #tpu.pipeline_mode<synchronous>, transform_indices = @transform_3, window_bounds = array<i64: 720, 256>}, {pipeline_mode = #tpu.pipeline_mode<synchronous>, transform_indices = @transform_4, window_bounds = array<i64: 1, 96>}, {pipeline_mode = #tpu.pipeline_mode<synchronous>, transform_indices = @transform_5, window_bounds = array<i64: 4, 96, 240>}, {pipeline_mode = #tpu.pipeline_mode<synchronous>, transform_indices = @transform_6, window_bounds = array<i64: 1, 240>}, {pipeline_mode = #tpu.pipeline_mode<synchronous>, transform_indices = @transform_7, window_bounds = array<i64: 240, 120>}, {pipeline_mode = #tpu.pipeline_mode<synchronous>, transform_indices = @transform_8, window_bounds = array<i64: 1, 120>}, {pipeline_mode = #tpu.pipeline_mode<synchronous>, transform_indices = @transform_9, window_bounds = array<i64: 120, 60>}, {pipeline_mode = #tpu.pipeline_mode<synchronous>, transform_indices = @transform_10, window_bounds = array<i64: 1, 60>}, {pipeline_mode = #tpu.pipeline_mode<synchronous>, transform_indices = @transform_11, window_bounds = array<i64: 60, 10>}, {pipeline_mode = #tpu.pipeline_mode<synchronous>, transform_indices = @transform_12, window_bounds = array<i64: 1, 10>}, {transform_indices = @transform_13, window_bounds = array<i64: 8, 10>}]} {
    %c0 = arith.constant 0 : index
    %c0_0 = arith.constant 0 : index
    %c0_1 = arith.constant 0 : index
    %0 = vector.load %arg1[%c0, %c0_0, %c0_1] : memref<14x8x56xf32, #tpu.memory_space<vmem>>, vector<14x8x56xf32>
    %1 = vector.extract_strided_slice %0 {offsets = [0, 0, 0], sizes = [12, 8, 56], strides = [1, 1, 1]} : vector<14x8x56xf32> to vector<12x8x56xf32>
    %2 = vector.extract_strided_slice %0 {offsets = [1, 0, 0], sizes = [12, 8, 56], strides = [1, 1, 1]} : vector<14x8x56xf32> to vector<12x8x56xf32>
    %3 = vector.extract_strided_slice %0 {offsets = [2, 0, 0], sizes = [12, 8, 56], strides = [1, 1, 1]} : vector<14x8x56xf32> to vector<12x8x56xf32>
    %4 = tpu.concatenate %1, %2, %3 in 2 : vector<12x8x56xf32>, vector<12x8x56xf32>, vector<12x8x56xf32> -> vector<12x8x168xf32>
    %5 = vector.shape_cast %4 : vector<12x8x168xf32> to vector<96x168xf32>
    %c0_2 = arith.constant 0 : index
    %c0_3 = arith.constant 0 : index
    %6 = vector.load %arg2[%c0_2, %c0_3] : memref<168x1024xf32, #tpu.memory_space<vmem>>, vector<168x1024xf32>
    %cst = arith.constant dense<0.000000e+00> : vector<96x1024xf32>
    %7 = tpu.matmul %5, %6, %cst {dimension_numbers = #tpu.dot_dimension_numbers<[1], [0], [0], [1], [0, 0, 1, 1], [], []>} : vector<96x168xf32>, vector<168x1024xf32>, vector<96x1024xf32> -> vector<96x1024xf32>
    %8 = vector.extract_strided_slice %7 {offsets = [0, 0], sizes = [96, 144], strides = [1, 1]} : vector<96x1024xf32> to vector<96x144xf32>
    %9 = vector.extract_strided_slice %7 {offsets = [0, 256], sizes = [96, 144], strides = [1, 1]} : vector<96x1024xf32> to vector<96x144xf32>
    %10 = arith.maximumf %8, %9 : vector<96x144xf32>
    %11 = vector.extract_strided_slice %7 {offsets = [0, 512], sizes = [96, 144], strides = [1, 1]} : vector<96x1024xf32> to vector<96x144xf32>
    %12 = vector.extract_strided_slice %7 {offsets = [0, 768], sizes = [96, 144], strides = [1, 1]} : vector<96x1024xf32> to vector<96x144xf32>
    %13 = arith.maximumf %11, %12 : vector<96x144xf32>
    %14 = arith.maximumf %10, %13 : vector<96x144xf32>
    %c0_4 = arith.constant 0 : index
    %c0_5 = arith.constant 0 : index
    %15 = vector.load %arg3[%c0_4, %c0_5] : memref<1x144xf32, #tpu.memory_space<vmem>>, vector<1x144xf32>
    %16 = vector.broadcast %15 : vector<1x144xf32> to vector<96x144xf32>
    %17 = arith.addf %14, %16 : vector<96x144xf32>
    %cst_6 = arith.constant 0.000000e+00 : f32
    %18 = vector.broadcast %cst_6 : f32 to vector<96x144xf32>
    %19 = arith.maximumf %17, %18 : vector<96x144xf32>
    %20 = vector.extract_strided_slice %19 {offsets = [0, 0], sizes = [64, 144], strides = [1, 1]} : vector<96x144xf32> to vector<64x144xf32>
    %21 = vector.extract_strided_slice %19 {offsets = [8, 0], sizes = [64, 144], strides = [1, 1]} : vector<96x144xf32> to vector<64x144xf32>
    %22 = vector.extract_strided_slice %19 {offsets = [16, 0], sizes = [64, 144], strides = [1, 1]} : vector<96x144xf32> to vector<64x144xf32>
    %23 = vector.extract_strided_slice %19 {offsets = [24, 0], sizes = [64, 144], strides = [1, 1]} : vector<96x144xf32> to vector<64x144xf32>
    %24 = vector.extract_strided_slice %19 {offsets = [32, 0], sizes = [64, 144], strides = [1, 1]} : vector<96x144xf32> to vector<64x144xf32>
    %25 = tpu.concatenate %20, %21, %22, %23, %24 in 1 : vector<64x144xf32>, vector<64x144xf32>, vector<64x144xf32>, vector<64x144xf32>, vector<64x144xf32> -> vector<64x720xf32>
    %c0_7 = arith.constant 0 : index
    %c0_8 = arith.constant 0 : index
    %26 = vector.load %arg4[%c0_7, %c0_8] : memref<720x256xf32, #tpu.memory_space<vmem>>, vector<720x256xf32>
    %cst_9 = arith.constant dense<0.000000e+00> : vector<64x256xf32>
    %27 = tpu.matmul %25, %26, %cst_9 {dimension_numbers = #tpu.dot_dimension_numbers<[1], [0], [0], [1], [0, 0, 1, 1], [], []>} : vector<64x720xf32>, vector<720x256xf32>, vector<64x256xf32> -> vector<64x256xf32>
    %28 = vector.extract_strided_slice %27 {offsets = [0, 0], sizes = [64, 96], strides = [1, 1]} : vector<64x256xf32> to vector<64x96xf32>
    %29 = vector.extract_strided_slice %27 {offsets = [0, 128], sizes = [64, 96], strides = [1, 1]} : vector<64x256xf32> to vector<64x96xf32>
    %30 = arith.maximumf %28, %29 : vector<64x96xf32>
    %c0_10 = arith.constant 0 : index
    %c0_11 = arith.constant 0 : index
    %31 = vector.load %arg5[%c0_10, %c0_11] : memref<1x96xf32, #tpu.memory_space<vmem>>, vector<1x96xf32>
    %32 = vector.broadcast %31 : vector<1x96xf32> to vector<64x96xf32>
    %33 = arith.addf %30, %32 : vector<64x96xf32>
    %cst_12 = arith.constant 0.000000e+00 : f32
    %34 = vector.broadcast %cst_12 : f32 to vector<64x96xf32>
    %35 = arith.maximumf %33, %34 : vector<64x96xf32>
    %36 = vector.shape_cast %35 : vector<64x96xf32> to vector<4x2x8x96xf32>
    %37 = vector.extract_strided_slice %36 {offsets = [0, 0, 0, 0], sizes = [4, 1, 8, 96], strides = [1, 1, 1, 1]} : vector<4x2x8x96xf32> to vector<4x1x8x96xf32>
    %38 = vector.shape_cast %37 : vector<4x1x8x96xf32> to vector<4x8x96xf32>
    %39 = vector.extract_strided_slice %36 {offsets = [0, 1, 0, 0], sizes = [4, 1, 8, 96], strides = [1, 1, 1, 1]} : vector<4x2x8x96xf32> to vector<4x1x8x96xf32>
    %40 = vector.shape_cast %39 : vector<4x1x8x96xf32> to vector<4x8x96xf32>
    %41 = arith.maximumf %38, %40 : vector<4x8x96xf32>
    %42 = vector.extract_strided_slice %41 {offsets = [0, 0, 0], sizes = [1, 8, 96], strides = [1, 1, 1]} : vector<4x8x96xf32> to vector<1x8x96xf32>
    %43 = vector.shape_cast %42 : vector<1x8x96xf32> to vector<8x96xf32>
    %c0_13 = arith.constant 0 : index
    %c0_14 = arith.constant 0 : index
    %c0_15 = arith.constant 0 : index
    %44 = vector.load %arg6[%c0_13, %c0_14, %c0_15] : memref<4x96x240xf32, #tpu.memory_space<vmem>>, vector<1x96x240xf32>
    %45 = vector.shape_cast %44 : vector<1x96x240xf32> to vector<96x240xf32>
    %cst_16 = arith.constant dense<0.000000e+00> : vector<8x240xf32>
    %46 = tpu.matmul %43, %45, %cst_16 {dimension_numbers = #tpu.dot_dimension_numbers<[1], [0], [0], [1], [0, 0, 1, 1], [], []>} : vector<8x96xf32>, vector<96x240xf32>, vector<8x240xf32> -> vector<8x240xf32>
    %47 = vector.extract_strided_slice %41 {offsets = [1, 0, 0], sizes = [1, 8, 96], strides = [1, 1, 1]} : vector<4x8x96xf32> to vector<1x8x96xf32>
    %48 = vector.shape_cast %47 : vector<1x8x96xf32> to vector<8x96xf32>
    %c1 = arith.constant 1 : index
    %c0_17 = arith.constant 0 : index
    %c0_18 = arith.constant 0 : index
    %49 = vector.load %arg6[%c1, %c0_17, %c0_18] : memref<4x96x240xf32, #tpu.memory_space<vmem>>, vector<1x96x240xf32>
    %50 = vector.shape_cast %49 : vector<1x96x240xf32> to vector<96x240xf32>
    %cst_19 = arith.constant dense<0.000000e+00> : vector<8x240xf32>
    %51 = tpu.matmul %48, %50, %cst_19 {dimension_numbers = #tpu.dot_dimension_numbers<[1], [0], [0], [1], [0, 0, 1, 1], [], []>} : vector<8x96xf32>, vector<96x240xf32>, vector<8x240xf32> -> vector<8x240xf32>
    %52 = arith.addf %46, %51 : vector<8x240xf32>
    %53 = vector.extract_strided_slice %41 {offsets = [2, 0, 0], sizes = [1, 8, 96], strides = [1, 1, 1]} : vector<4x8x96xf32> to vector<1x8x96xf32>
    %54 = vector.shape_cast %53 : vector<1x8x96xf32> to vector<8x96xf32>
    %c2 = arith.constant 2 : index
    %c0_20 = arith.constant 0 : index
    %c0_21 = arith.constant 0 : index
    %55 = vector.load %arg6[%c2, %c0_20, %c0_21] : memref<4x96x240xf32, #tpu.memory_space<vmem>>, vector<1x96x240xf32>
    %56 = vector.shape_cast %55 : vector<1x96x240xf32> to vector<96x240xf32>
    %cst_22 = arith.constant dense<0.000000e+00> : vector<8x240xf32>
    %57 = tpu.matmul %54, %56, %cst_22 {dimension_numbers = #tpu.dot_dimension_numbers<[1], [0], [0], [1], [0, 0, 1, 1], [], []>} : vector<8x96xf32>, vector<96x240xf32>, vector<8x240xf32> -> vector<8x240xf32>
    %58 = arith.addf %52, %57 : vector<8x240xf32>
    %59 = vector.extract_strided_slice %41 {offsets = [3, 0, 0], sizes = [1, 8, 96], strides = [1, 1, 1]} : vector<4x8x96xf32> to vector<1x8x96xf32>
    %60 = vector.shape_cast %59 : vector<1x8x96xf32> to vector<8x96xf32>
    %c3 = arith.constant 3 : index
    %c0_23 = arith.constant 0 : index
    %c0_24 = arith.constant 0 : index
    %61 = vector.load %arg6[%c3, %c0_23, %c0_24] : memref<4x96x240xf32, #tpu.memory_space<vmem>>, vector<1x96x240xf32>
    %62 = vector.shape_cast %61 : vector<1x96x240xf32> to vector<96x240xf32>
    %cst_25 = arith.constant dense<0.000000e+00> : vector<8x240xf32>
    %63 = tpu.matmul %60, %62, %cst_25 {dimension_numbers = #tpu.dot_dimension_numbers<[1], [0], [0], [1], [0, 0, 1, 1], [], []>} : vector<8x96xf32>, vector<96x240xf32>, vector<8x240xf32> -> vector<8x240xf32>
    %64 = arith.addf %58, %63 : vector<8x240xf32>
    %c0_26 = arith.constant 0 : index
    %c0_27 = arith.constant 0 : index
    %65 = vector.load %arg7[%c0_26, %c0_27] : memref<1x240xf32, #tpu.memory_space<vmem>>, vector<1x240xf32>
    %66 = vector.broadcast %65 : vector<1x240xf32> to vector<8x240xf32>
    %67 = arith.addf %64, %66 : vector<8x240xf32>
    %cst_28 = arith.constant 0.000000e+00 : f32
    %68 = vector.broadcast %cst_28 : f32 to vector<8x240xf32>
    %69 = arith.maximumf %67, %68 : vector<8x240xf32>
    %c0_29 = arith.constant 0 : index
    %c0_30 = arith.constant 0 : index
    %70 = vector.load %arg8[%c0_29, %c0_30] : memref<240x120xf32, #tpu.memory_space<vmem>>, vector<240x120xf32>
    %cst_31 = arith.constant dense<0.000000e+00> : vector<8x120xf32>
    %71 = tpu.matmul %69, %70, %cst_31 {dimension_numbers = #tpu.dot_dimension_numbers<[1], [0], [0], [1], [0, 0, 1, 1], [], []>} : vector<8x240xf32>, vector<240x120xf32>, vector<8x120xf32> -> vector<8x120xf32>
    %c0_32 = arith.constant 0 : index
    %c0_33 = arith.constant 0 : index
    %72 = vector.load %arg9[%c0_32, %c0_33] : memref<1x120xf32, #tpu.memory_space<vmem>>, vector<1x120xf32>
    %73 = vector.broadcast %72 : vector<1x120xf32> to vector<8x120xf32>
    %74 = arith.addf %71, %73 : vector<8x120xf32>
    %cst_34 = arith.constant 0.000000e+00 : f32
    %75 = vector.broadcast %cst_34 : f32 to vector<8x120xf32>
    %76 = arith.maximumf %74, %75 : vector<8x120xf32>
    %c0_35 = arith.constant 0 : index
    %c0_36 = arith.constant 0 : index
    %77 = vector.load %arg10[%c0_35, %c0_36] : memref<120x60xf32, #tpu.memory_space<vmem>>, vector<120x60xf32>
    %cst_37 = arith.constant dense<0.000000e+00> : vector<8x60xf32>
    %78 = tpu.matmul %76, %77, %cst_37 {dimension_numbers = #tpu.dot_dimension_numbers<[1], [0], [0], [1], [0, 0, 1, 1], [], []>} : vector<8x120xf32>, vector<120x60xf32>, vector<8x60xf32> -> vector<8x60xf32>
    %c0_38 = arith.constant 0 : index
    %c0_39 = arith.constant 0 : index
    %79 = vector.load %arg11[%c0_38, %c0_39] : memref<1x60xf32, #tpu.memory_space<vmem>>, vector<1x60xf32>
    %80 = vector.broadcast %79 : vector<1x60xf32> to vector<8x60xf32>
    %81 = arith.addf %78, %80 : vector<8x60xf32>
    %cst_40 = arith.constant 0.000000e+00 : f32
    %82 = vector.broadcast %cst_40 : f32 to vector<8x60xf32>
    %83 = arith.maximumf %81, %82 : vector<8x60xf32>
    %c0_41 = arith.constant 0 : index
    %c0_42 = arith.constant 0 : index
    %84 = vector.load %arg12[%c0_41, %c0_42] : memref<60x10xf32, #tpu.memory_space<vmem>>, vector<60x10xf32>
    %cst_43 = arith.constant dense<0.000000e+00> : vector<8x10xf32>
    %85 = tpu.matmul %83, %84, %cst_43 {dimension_numbers = #tpu.dot_dimension_numbers<[1], [0], [0], [1], [0, 0, 1, 1], [], []>} : vector<8x60xf32>, vector<60x10xf32>, vector<8x10xf32> -> vector<8x10xf32>
    %c0_44 = arith.constant 0 : index
    %c0_45 = arith.constant 0 : index
    %86 = vector.load %arg13[%c0_44, %c0_45] : memref<1x10xf32, #tpu.memory_space<vmem>>, vector<1x10xf32>
    %87 = vector.broadcast %86 : vector<1x10xf32> to vector<8x10xf32>
    %88 = arith.addf %85, %87 : vector<8x10xf32>
    %c0_46 = arith.constant 0 : index
    %c0_47 = arith.constant 0 : index
    %89 = vector.load %arg14[%c0_46, %c0_47] : memref<8x10xf32, #tpu.memory_space<vmem>>, vector<8x10xf32>
    tpu.vector_store %arg14[%c0_46, %c0_47], %88 {strides = array<i32>} : memref<8x10xf32, #tpu.memory_space<vmem>>, vector<8x10xf32>,
    return
  }
  func.func @transform_0(%arg0: i32) -> (i32, i32, i32) {
    %c0_i32 = arith.constant 0 : i32
    %c0_i32_0 = arith.constant 0 : i32
    %c0_i32_1 = arith.constant 0 : i32
    return %c0_i32, %arg0, %c0_i32_0 : i32, i32, i32
  }
  func.func @transform_1(%arg0: i32) -> (i32, i32) {
    %c0_i32 = arith.constant 0 : i32
    %c0_i32_0 = arith.constant 0 : i32
    %c0_i32_1 = arith.constant 0 : i32
    return %c0_i32, %c0_i32_0 : i32, i32
  }
  func.func @transform_2(%arg0: i32) -> (i32, i32) {
    %c0_i32 = arith.constant 0 : i32
    %c0_i32_0 = arith.constant 0 : i32
    %c0_i32_1 = arith.constant 0 : i32
    return %c0_i32, %c0_i32_0 : i32, i32
  }
  func.func @transform_3(%arg0: i32) -> (i32, i32) {
    %c0_i32 = arith.constant 0 : i32
    %c0_i32_0 = arith.constant 0 : i32
    %c0_i32_1 = arith.constant 0 : i32
    return %c0_i32, %c0_i32_0 : i32, i32
  }
  func.func @transform_4(%arg0: i32) -> (i32, i32) {
    %c0_i32 = arith.constant 0 : i32
    %c0_i32_0 = arith.constant 0 : i32
    %c0_i32_1 = arith.constant 0 : i32
    return %c0_i32, %c0_i32_0 : i32, i32
  }
  func.func @transform_5(%arg0: i32) -> (i32, i32, i32) {
    %c0_i32 = arith.constant 0 : i32
    %c0_i32_0 = arith.constant 0 : i32
    %c0_i32_1 = arith.constant 0 : i32
    %c0_i32_2 = arith.constant 0 : i32
    return %c0_i32, %c0_i32_0, %c0_i32_1 : i32, i32, i32
  }
  func.func @transform_6(%arg0: i32) -> (i32, i32) {
    %c0_i32 = arith.constant 0 : i32
    %c0_i32_0 = arith.constant 0 : i32
    %c0_i32_1 = arith.constant 0 : i32
    return %c0_i32, %c0_i32_0 : i32, i32
  }
  func.func @transform_7(%arg0: i32) -> (i32, i32) {
    %c0_i32 = arith.constant 0 : i32
    %c0_i32_0 = arith.constant 0 : i32
    %c0_i32_1 = arith.constant 0 : i32
    return %c0_i32, %c0_i32_0 : i32, i32
  }
  func.func @transform_8(%arg0: i32) -> (i32, i32) {
    %c0_i32 = arith.constant 0 : i32
    %c0_i32_0 = arith.constant 0 : i32
    %c0_i32_1 = arith.constant 0 : i32
    return %c0_i32, %c0_i32_0 : i32, i32
  }
  func.func @transform_9(%arg0: i32) -> (i32, i32) {
    %c0_i32 = arith.constant 0 : i32
    %c0_i32_0 = arith.constant 0 : i32
    %c0_i32_1 = arith.constant 0 : i32
    return %c0_i32, %c0_i32_0 : i32, i32
  }
  func.func @transform_10(%arg0: i32) -> (i32, i32) {
    %c0_i32 = arith.constant 0 : i32
    %c0_i32_0 = arith.constant 0 : i32
    %c0_i32_1 = arith.constant 0 : i32
    return %c0_i32, %c0_i32_0 : i32, i32
  }
  func.func @transform_11(%arg0: i32) -> (i32, i32) {
    %c0_i32 = arith.constant 0 : i32
    %c0_i32_0 = arith.constant 0 : i32
    %c0_i32_1 = arith.constant 0 : i32
    return %c0_i32, %c0_i32_0 : i32, i32
  }
  func.func @transform_12(%arg0: i32) -> (i32, i32) {
    %c0_i32 = arith.constant 0 : i32
    %c0_i32_0 = arith.constant 0 : i32
    %c0_i32_1 = arith.constant 0 : i32
    return %c0_i32, %c0_i32_0 : i32, i32
  }
  func.func @transform_13(%arg0: i32) -> (i32, i32) {
    %c0_i32 = arith.constant 0 : i32
    %c0_i32_0 = arith.constant 0 : i32
    return %arg0, %c0_i32 : i32, i32
  }
}

</mosaic_0001>

<bundles_post_ra>
// kernel: network2_forward.1
= control target key start
LH: loop header
LB: loop body
LE: loop exit
PB: predicated region body
PF: predicated region fallthrough
CT: control target
= control target key end

     0   :  { %s3505_s29 = smov 56   ;;  %s3506_s19 = smov 112   ;;  %vm143_vm0 = vcmask 457728   ;;  %vm337_vm1 = vcmask 326656   ;;  %vm156_vm2 = vcmask 916480   ;;  %vm1090_vm3 = vcmask 130048   ;;  %s6142_s0 = inlined_call_operand.vmem [shape: f32[14,8,56], index: 0, kind: input, shape index: {}]   ;;  %s6143_s1 = inlined_call_operand.vmem [shape: f32[168,1024], index: 1, kind: input, shape index: {}]   ;;  %s6144_s3 = inlined_call_operand.vmem [shape: f32[720,256], index: 3, kind: input, shape index: {}]   ;;  %s6145_s2 = inlined_call_operand.vmem [shape: f32[1,144], index: 2, kind: input, shape index: {}]   ;;  %s6146_s5 = inlined_call_operand.vmem [shape: f32[4,96,240], index: 5, kind: input, shape index: {}]   ;;  %s6147_s4 = inlined_call_operand.vmem [shape: f32[1,96], index: 4, kind: input, shape index: {}]   ;;  %s6148_s7 = inlined_call_operand.vmem [shape: f32[240,120], index: 7, kind: input, shape index: {}]   ;;  %s6149_s6 = inlined_call_operand.vmem [shape: f32[1,240], index: 6, kind: input, shape index: {}]   ;;  %s6150_s9 = inlined_call_operand.vmem [shape: f32[120,60], index: 9, kind: input, shape index: {}]   ;;  %s6151_s11 = inlined_call_operand.vmem [shape: f32[60,10], index: 11, kind: input, shape index: {}]   ;;  %s6152_s8 = inlined_call_operand.vmem [shape: f32[1,120], index: 8, kind: input, shape index: {}]   ;;  %s6153_s10 = inlined_call_operand.vmem [shape: f32[1,60], index: 10, kind: input, shape index: {}]   ;;  %s6154_s12 = inlined_call_operand.vmem [shape: f32[1,10], index: 12, kind: input, shape index: {}]   ;;  %s6155_s13 = inlined_call_operand.vmem [shape: f32[8,10], index: 13, kind: output, shape index: {}]  }
   0x1   :  { %v3588_v0 = vld [vmem:[%s6142_s0 + $0x8] sm:$0xff]  ;;  %v3593_v1 = vld [vmem:[%s6142_s0 + $0x10] sm:$0xff]  ;;  %v3602_v2 = vld [vmem:[%s6142_s0 + $0x18] sm:$0xff]  ;;  %s3509_s15 = smov 48   ;;  %s3510_s16 = smov 64   ;;  %vm1149_vm4 = vcmask 261120  }
   0x2   :  { %70 = vrot.lane.b32.xlu0 %v3588_v0, %s3505_s29  ;;  %72 = vrot.lane.b32.xlu1 %v3593_v1, %s3505_s29  ;;  %v3607_v3 = vld [vmem:[%s6142_s0 + $0x20] sm:$0xff]  ;;  %v170_v4 = vld [vmem:[%s6143_s1 + $0x8] sm:$0xff]  ;;  %vm1208_vm5 = vcmask 392192   ;;  %vm1267_vm6 = vcmask 523264   ;;  %vm1496_vm7 = vcmask 654336   ;;  %vm1936_vm8 = vcmask 785408  }
   0x3   :  { %v178_v5 = vld [vmem:[%s6143_s1 + $0x48] sm:$0xff]  ;;  %v172_v6 = vld [vmem:[%s6143_s1 + $0x18] sm:$0xff]  ;;  %v169_v9 = vld [vmem:[%s6143_s1] sm:$0xff]  ;;  %vm3513_vm9 = vmmov 0   ;;  %vm2530_vm10 = vcmask 1043456   ;;  %vm3514_vm11 = vmmov 1  }
   0x4   :  { %v2827_v7 = vpack.c.bf16 %v178_v5, %v170_v4  ;;  %v180_v8 = vld [vmem:[%s6143_s1 + $0x58] sm:$0xff]  ;;  %v177_v10 = vld [vmem:[%s6143_s1 + $0x40] sm:$0xff]  ;;  %v171_v13 = vld [vmem:[%s6143_s1 + $0x10] sm:$0xff]  ;;  %vm2436_vm13 = vcmask 982016   ;;  %vm2526_vm14 = vcmask 490496   ;;  %vm2604_vm15 = vcmask 80896  }
   0x5   :  { %v2867_v11 = vpack.c.bf16 %v180_v8, %v172_v6  ;;  %v2829_v12 = vpack.c.bf16 %v177_v10, %v169_v9  ;;  %v179_v14 = vld [vmem:[%s6143_s1 + $0x50] sm:$0xff]  ;;  %v186_v15 = vld [vmem:[%s6143_s1 + $0x88] sm:$0xff]  ;;  %v188_v19 = vld [vmem:[%s6143_s1 + $0x98] sm:$0xff] }
   0x6   :  { %107 = vrot.lane.b32.xlu0 %v3593_v1, %s3506_s19  ;;  %109 = vrot.lane.b32.xlu1 %v3602_v2, %s3506_s19  ;;  %v3643_v16 = vld [vmem:[%s6142_s0 + $0x28] sm:$0xff]  ;;  %v2869_v17 = vpack.c.bf16 %v179_v14, %v171_v13  ;;  %v196_v20 = vld [vmem:[%s6143_s1 + $0xd8] sm:$0xff]  ;;  %vm3340_vm12 = vmpackc.low %vm2530_vm10, %vm3514_vm11 }
   0x7   :  { %2828 = vmatprep.subr.bf16.mxu0 %v2827_v7  ;;  %v194_v18 = vld [vmem:[%s6143_s1 + $0xc8] sm:$0xff]  ;;  %v2871_v22 = vpack.c.bf16 %v196_v20, %v188_v19  ;;  %v185_v23 = vld [vmem:[%s6143_s1 + $0x80] sm:$0xff]  ;;  %2868 = vmatprep.subr.bf16.mxu1 %v2867_v11  ;;  %v187_v26 = vld [vmem:[%s6143_s1 + $0x90] sm:$0xff] }
   0x8   :  { %v2831_v21 = vpack.c.bf16 %v194_v18, %v186_v15  ;;  %v193_v24 = vld [vmem:[%s6143_s1 + $0xc0] sm:$0xff]  ;;  %2830 = vmatpush1.bf16.msra.mxu0 %v2829_v12  ;;  %v195_v27 = vld [vmem:[%s6143_s1 + $0xd0] sm:$0xff]  ;;  %v202_v28 = vld [vmem:[%s6143_s1 + $0x108] sm:$0xff]  ;;  %2870 = vmatpush1.bf16.msra.mxu1 %v2869_v17 }
   0x9   :  { %v2833_v25 = vpack.c.bf16 %v193_v24, %v185_v23  ;;  %v2873_v29 = vpack.c.bf16 %v195_v27, %v187_v26  ;;  %v210_v30 = vld [vmem:[%s6143_s1 + $0x148] sm:$0xff]  ;;  %v204_v31 = vld [vmem:[%s6143_s1 + $0x118] sm:$0xff]  ;;  %v3685_v33 = vld [vmem:[%s6142_s0 + $0x30] sm:$0xff]  ;;  %2872 = vmatprep.subr.bf16.mxu1 %v2871_v22 }
   0xa   :  { %74 = vrot.lane.b32.xlu0 %v3602_v2, %s3505_s29  ;;  %111 = vrot.lane.b32.xlu1 %v3607_v3, %s3506_s19  ;;  %v212_v32 = vld [vmem:[%s6143_s1 + $0x158] sm:$0xff]  ;;  %v2835_v34 = vpack.c.bf16 %v210_v30, %v202_v28  ;;  %v201_v36 = vld [vmem:[%s6143_s1 + $0x100] sm:$0xff] }
   0xb   :  { %2832 = vmatprep.subr.bf16.mxu0 %v2831_v21  ;;  %v2875_v35 = vpack.c.bf16 %v212_v32, %v204_v31  ;;  %v209_v37 = vld [vmem:[%s6143_s1 + $0x140] sm:$0xff]  ;;  %v203_v38 = vld [vmem:[%s6143_s1 + $0x110] sm:$0xff]  ;;  %v218_v40 = vld [vmem:[%s6143_s1 + $0x188] sm:$0xff] }
   0xc   :  { %v211_v39 = vld [vmem:[%s6143_s1 + $0x150] sm:$0xff]  ;;  %2834 = vmatpush1.bf16.msra.mxu0 %v2833_v25  ;;  %v2837_v41 = vpack.c.bf16 %v209_v37, %v201_v36  ;;  %v226_v42 = vld [vmem:[%s6143_s1 + $0x1c8] sm:$0xff]  ;;  %v220_v43 = vld [vmem:[%s6143_s1 + $0x198] sm:$0xff]  ;;  %2874 = vmatpush1.bf16.msra.mxu1 %v2873_v29 }
   0xd   :  { %v228_v44 = vld [vmem:[%s6143_s1 + $0x1d8] sm:$0xff]  ;;  %2836 = vmatprep.subr.bf16.mxu0 %v2835_v34  ;;  %v2877_v45 = vpack.c.bf16 %v211_v39, %v203_v38  ;;  %v2839_v46 = vpack.c.bf16 %v226_v42, %v218_v40  ;;  %v217_v47 = vld [vmem:[%s6143_s1 + $0x180] sm:$0xff]  ;;  %v219_v49 = vld [vmem:[%s6143_s1 + $0x190] sm:$0xff]  ;;  %2876 = vmatprep.subr.bf16.mxu1 %v2875_v35 }
   0xe   :  { %76 = vrot.lane.b32.xlu0 %v3607_v3, %s3505_s29  ;;  %113 = vrot.lane.b32.xlu1 %v3643_v16, %s3506_s19  ;;  %v225_v48 = vld [vmem:[%s6143_s1 + $0x1c0] sm:$0xff]  ;;  %v2879_v50 = vpack.c.bf16 %v228_v44, %v220_v43  ;;  %v227_v51 = vld [vmem:[%s6143_s1 + $0x1d0] sm:$0xff] }
   0xf   :  { %v234_v52 = vld [vmem:[%s6143_s1 + $0x208] sm:$0xff]  ;;  %v236_v54 = vld [vmem:[%s6143_s1 + $0x218] sm:$0xff]  ;;  %v2841_v57 = vpack.c.bf16 %v225_v48, %v217_v47  ;;  %v2881_v58 = vpack.c.bf16 %v227_v51, %v219_v49  ;;  %v233_v60 = vld [vmem:[%s6143_s1 + $0x200] sm:$0xff] }
  0x10   :  { %v242_v53 = vld [vmem:[%s6143_s1 + $0x248] sm:$0xff]  ;;  %v244_v55 = vld [vmem:[%s6143_s1 + $0x258] sm:$0xff]  ;;  %2838 = vmatpush1.bf16.msra.mxu0 %v2837_v41  ;;  %2878 = vmatpush1.bf16.msra.mxu1 %v2877_v45  ;;  %v241_v61 = vld [vmem:[%s6143_s1 + $0x240] sm:$0xff] }
  0x11   :  { %v3746_v56 = vld [vmem:[%s6142_s0 + $0x38] sm:$0xff]  ;;  %2840 = vmatprep.subr.bf16.mxu0 %v2839_v46  ;;  %v2843_v59 = vpack.c.bf16 %v242_v53, %v234_v52  ;;  %v235_v62 = vld [vmem:[%s6143_s1 + $0x210] sm:$0xff]  ;;  %2880 = vmatprep.subr.bf16.mxu1 %v2879_v50  ;;  %v2883_v63 = vpack.c.bf16 %v244_v55, %v236_v54  ;;  %v250_v5 = vld [vmem:[%s6143_s1 + $0x288] sm:$0xff]  ;;  %v2845_v10 = vpack.c.bf16 %v241_v61, %v233_v60 }
  0x12   :  { %78 = vrot.lane.b32.xlu0 %v3643_v16, %s3505_s29  ;;  %115 = vrot.lane.b32.xlu1 %v3685_v33, %s3506_s19  ;;  %v243_v4 = vld [vmem:[%s6143_s1 + $0x250] sm:$0xff]  ;;  %v258_v6 = vld [vmem:[%s6143_s1 + $0x2c8] sm:$0xff] }
  0x13   :  { %v252_v7 = vld [vmem:[%s6143_s1 + $0x298] sm:$0xff]  ;;  %v3779_v9 = vld [vmem:[%s6142_s0 + $0x40] sm:$0xff]  ;;  %v2885_v11 = vpack.c.bf16 %v243_v4, %v235_v62  ;;  %v2847_v12 = vpack.c.bf16 %v258_v6, %v250_v5  ;;  %v251_v15 = vld [vmem:[%s6143_s1 + $0x290] sm:$0xff] }
  0x14   :  { %v260_v8 = vld [vmem:[%s6143_s1 + $0x2d8] sm:$0xff]  ;;  %2842 = vmatpush1.bf16.msra.mxu0 %v2841_v57  ;;  %2882 = vmatpush1.bf16.msra.mxu1 %v2881_v58  ;;  %v249_v13 = vld [vmem:[%s6143_s1 + $0x280] sm:$0xff]  ;;  %v259_v18 = vld [vmem:[%s6143_s1 + $0x2d0] sm:$0xff] }
  0x15   :  { %2844 = vmatprep.subr.bf16.mxu0 %v2843_v59  ;;  %v257_v14 = vld [vmem:[%s6143_s1 + $0x2c0] sm:$0xff]  ;;  %2884 = vmatprep.subr.bf16.mxu1 %v2883_v63  ;;  %v2887_v17 = vpack.c.bf16 %v260_v8, %v252_v7  ;;  %v266_v19 = vld [vmem:[%s6143_s1 + $0x308] sm:$0xff]  ;;  %v268_v21 = vld [vmem:[%s6143_s1 + $0x318] sm:$0xff]  ;;  %v2889_v25 = vpack.c.bf16 %v259_v18, %v251_v15 }
  0x16   :  { %80 = vrot.lane.b32.xlu0 %v3685_v33, %s3505_s29  ;;  %117 = vrot.lane.b32.xlu1 %v3746_v56, %s3506_s19  ;;  %v274_v20 = vld [vmem:[%s6143_s1 + $0x348] sm:$0xff]  ;;  %v276_v22 = vld [vmem:[%s6143_s1 + $0x358] sm:$0xff]  ;;  %v2849_v24 = vpack.c.bf16 %v257_v14, %v249_v13 }
  0x17   :  { %v3812_v23 = vld [vmem:[%s6142_s0 + $0x48] sm:$0xff]  ;;  %v2851_v26 = vpack.c.bf16 %v274_v20, %v266_v19  ;;  %v265_v27 = vld [vmem:[%s6143_s1 + $0x300] sm:$0xff]  ;;  %v267_v29 = vld [vmem:[%s6143_s1 + $0x310] sm:$0xff]  ;;  %v2891_v30 = vpack.c.bf16 %v276_v22, %v268_v21 }
  0x18   :  { %2846 = vmatpush1.bf16.msra.mxu0 %v2845_v10  ;;  %2886 = vmatpush1.bf16.msra.mxu1 %v2885_v11  ;;  %v273_v28 = vld [vmem:[%s6143_s1 + $0x340] sm:$0xff]  ;;  %v275_v31 = vld [vmem:[%s6143_s1 + $0x350] sm:$0xff]  ;;  %v282_v32 = vld [vmem:[%s6143_s1 + $0x388] sm:$0xff] }
  0x19   :  { %2848 = vmatprep.subr.bf16.mxu0 %v2847_v12  ;;  %2888 = vmatprep.subr.bf16.mxu1 %v2887_v17  ;;  %v290_v34 = vld [vmem:[%s6143_s1 + $0x3c8] sm:$0xff]  ;;  %v284_v35 = vld [vmem:[%s6143_s1 + $0x398] sm:$0xff]  ;;  %v3845_v37 = vld [vmem:[%s6142_s0 + $0x50] sm:$0xff]  ;;  %v2853_v38 = vpack.c.bf16 %v273_v28, %v265_v27  ;;  %v2893_v39 = vpack.c.bf16 %v275_v31, %v267_v29 }
  0x1a   :  { %82 = vrot.lane.b32.xlu0 %v3746_v56, %s3505_s29  ;;  %119 = vrot.lane.b32.xlu1 %v3779_v9, %s3506_s19  ;;  %v292_v36 = vld [vmem:[%s6143_s1 + $0x3d8] sm:$0xff]  ;;  %v2855_v40 = vpack.c.bf16 %v290_v34, %v282_v32  ;;  %v281_v41 = vld [vmem:[%s6143_s1 + $0x380] sm:$0xff] }
  0x1b   :  { %v289_v42 = vld [vmem:[%s6143_s1 + $0x3c0] sm:$0xff]  ;;  %v283_v43 = vld [vmem:[%s6143_s1 + $0x390] sm:$0xff]  ;;  %v2895_v44 = vpack.c.bf16 %v292_v36, %v284_v35  ;;  %v298_v46 = vld [vmem:[%s6143_s1 + $0x408] sm:$0xff] }
  0x1c   :  { %2850 = vmatpush1.bf16.msra.mxu0 %v2849_v24  ;;  %2890 = vmatpush1.bf16.msra.mxu1 %v2889_v25  ;;  %v291_v45 = vld [vmem:[%s6143_s1 + $0x3d0] sm:$0xff]  ;;  %v306_v47 = vld [vmem:[%s6143_s1 + $0x448] sm:$0xff]  ;;  %v300_v48 = vld [vmem:[%s6143_s1 + $0x418] sm:$0xff]  ;;  %v2857_v51 = vpack.c.bf16 %v289_v42, %v281_v41 }
  0x1d   :  { %2852 = vmatprep.subr.bf16.mxu0 %v2851_v26  ;;  %2892 = vmatprep.subr.bf16.mxu1 %v2891_v30  ;;  %v308_v49 = vld [vmem:[%s6143_s1 + $0x458] sm:$0xff]  ;;  %v2897_v52 = vpack.c.bf16 %v291_v45, %v283_v43  ;;  %v2859_v53 = vpack.c.bf16 %v306_v47, %v298_v46  ;;  %v297_v54 = vld [vmem:[%s6143_s1 + $0x400] sm:$0xff]  ;;  %v299_v57 = vld [vmem:[%s6143_s1 + $0x410] sm:$0xff] }
  0x1e   :  { %84 = vrot.lane.b32.xlu0 %v3779_v9, %s3505_s29  ;;  %121 = vrot.lane.b32.xlu1 %v3812_v23, %s3506_s19  ;;  %v3878_v50 = vld [vmem:[%s6142_s0 + $0x58] sm:$0xff]  ;;  %v305_v55 = vld [vmem:[%s6143_s1 + $0x440] sm:$0xff]  ;;  %v2899_v58 = vpack.c.bf16 %v308_v49, %v300_v48 }
  0x1f   :  { %v307_v59 = vld [vmem:[%s6143_s1 + $0x450] sm:$0xff]  ;;  %v314_v60 = vld [vmem:[%s6143_s1 + $0x488] sm:$0xff]  ;;  %v316_v62 = vld [vmem:[%s6143_s1 + $0x498] sm:$0xff]  ;;  %v2861_v5 = vpack.c.bf16 %v305_v55, %v297_v54 }
  0x20   :  { %2854 = vmatpush1.bf16.msra.mxu0 %v2853_v38  ;;  %2894 = vmatpush1.bf16.msra.mxu1 %v2893_v39  ;;  %v322_v61 = vld [vmem:[%s6143_s1 + $0x4c8] sm:$0xff]  ;;  %v324_v63 = vld [vmem:[%s6143_s1 + $0x4d8] sm:$0xff]  ;;  %v56_v4 = vld [vmem:[%s6142_s0 + $0x60] sm:$0xff]  ;;  %v2901_v6 = vpack.c.bf16 %v307_v59, %v299_v57 }
  0x21   :  { %2856 = vmatprep.subr.bf16.mxu0 %v2855_v40  ;;  %2896 = vmatprep.subr.bf16.mxu1 %v2895_v44  ;;  %v2863_v7 = vpack.c.bf16 %v322_v61, %v314_v60  ;;  %v313_v8 = vld [vmem:[%s6143_s1 + $0x480] sm:$0xff]  ;;  %v2903_v11 = vpack.c.bf16 %v324_v63, %v316_v62  ;;  %v315_v12 = vld [vmem:[%s6143_s1 + $0x490] sm:$0xff]  ;;  %v57_v14 = vld [vmem:[%s6142_s0 + $0x68] sm:$0xff] }
  0x22   :  { %86 = vrot.lane.b32.xlu0 %v3812_v23, %s3505_s29  ;;  %123 = vrot.lane.b32.xlu1 %v3845_v37, %s3506_s19  ;;  %v321_v10 = vld [vmem:[%s6143_s1 + $0x4c0] sm:$0xff]  ;;  %v323_v13 = vld [vmem:[%s6143_s1 + $0x4d0] sm:$0xff] }
  0x23   :  { %v2865_v15 = vpack.c.bf16 %v321_v10, %v313_v8  ;;  %v2905_v17 = vpack.c.bf16 %v323_v13, %v315_v12  ;;  %v330_v18 = vld [vmem:[%s6143_s1 + $0x508] sm:$0xff]  ;;  %v332_v19 = vld [vmem:[%s6143_s1 + $0x518] sm:$0xff]  ;;  %v329_v25 = vld [vmem:[%s6143_s1 + $0x500] sm:$0xff] }
  0x24   :  { %2858 = vmatpush1.bf16.msra.mxu0 %v2857_v51  ;;  %2898 = vmatpush1.bf16.msra.mxu1 %v2897_v52  ;;  %v174_v20 = vld [vmem:[%s6143_s1 + $0x28] sm:$0xff]  ;;  %v176_v22 = vld [vmem:[%s6143_s1 + $0x38] sm:$0xff]  ;;  %v331_v27 = vld [vmem:[%s6143_s1 + $0x510] sm:$0xff] }
  0x25   :  { %2860 = vmatprep.subr.bf16.mxu0 %v2859_v53  ;;  %2900 = vmatprep.subr.bf16.mxu1 %v2899_v58  ;;  %v182_v21 = vld [vmem:[%s6143_s1 + $0x68] sm:$0xff]  ;;  %v184_v24 = vld [vmem:[%s6143_s1 + $0x78] sm:$0xff]  ;;  %v173_v29 = vld [vmem:[%s6143_s1 + $0x20] sm:$0xff] }
  0x26   :  { %88 = vrot.lane.b32.xlu0 %v3845_v37, %s3505_s29  ;;  %125 = vrot.lane.b32.xlu1 %v3878_v50, %s3506_s19  ;;  %v2907_v26 = vpack.c.bf16 %v182_v21, %v174_v20  ;;  %v2947_v28 = vpack.c.bf16 %v184_v24, %v176_v22  ;;  %v181_v32 = vld [vmem:[%s6143_s1 + $0x60] sm:$0xff]  ;;  %v175_v34 = vld [vmem:[%s6143_s1 + $0x30] sm:$0xff] }
  0x27   :  { %v183_v35 = vld [vmem:[%s6143_s1 + $0x70] sm:$0xff]  ;;  %v44_v36 = vld [vmem:[%s6142_s0] sm:$0xff]  ;;  %v190_v38 = vld [vmem:[%s6143_s1 + $0xa8] sm:$0xff]  ;;  %v2909_v42 = vpack.c.bf16 %v181_v32, %v173_v29  ;;  %s3508_s0 = smov 32  }
  0x28   :  { %2862 = vmatpush1.bf16.msra.mxu0 %v2861_v5  ;;  %2902 = vmatpush1.bf16.msra.mxu1 %v2901_v6  ;;  %v198_v39 = vld [vmem:[%s6143_s1 + $0xe8] sm:$0xff]  ;;  %v192_v40 = vld [vmem:[%s6143_s1 + $0xb8] sm:$0xff]  ;;  %v2949_v43 = vpack.c.bf16 %v183_v35, %v175_v34  ;;  %v189_v44 = vld [vmem:[%s6143_s1 + $0xa0] sm:$0xff] }
  0x29   :  { %2864 = vmatprep.subr.bf16.mxu0 %v2863_v7  ;;  %2904 = vmatprep.subr.bf16.mxu1 %v2903_v11  ;;  %v200_v41 = vld [vmem:[%s6143_s1 + $0xf8] sm:$0xff]  ;;  %v197_v48 = vld [vmem:[%s6143_s1 + $0xe0] sm:$0xff]  ;;  %v191_v49 = vld [vmem:[%s6143_s1 + $0xb0] sm:$0xff]  ;;  %v2911_v53 = vpack.c.bf16 %v198_v39, %v190_v38 }
  0x2a   :  { %90 = vrot.lane.b32.xlu0 %v3878_v50, %s3505_s29  ;;  %127 = vrot.lane.b32.xlu1 %v56_v4, %s3506_s19  ;;  %v199_v51 = vld [vmem:[%s6143_s1 + $0xf0] sm:$0xff]  ;;  %v2951_v54 = vpack.c.bf16 %v200_v41, %v192_v40  ;;  %v206_v55 = vld [vmem:[%s6143_s1 + $0x128] sm:$0xff]  ;;  %v2913_v61 = vpack.c.bf16 %v197_v48, %v189_v44 }
  0x2b   :  { %v214_v57 = vld [vmem:[%s6143_s1 + $0x168] sm:$0xff]  ;;  %v208_v59 = vld [vmem:[%s6143_s1 + $0x138] sm:$0xff]  ;;  %v2953_v62 = vpack.c.bf16 %v199_v51, %v191_v49  ;;  %v213_v6 = vld [vmem:[%s6143_s1 + $0x160] sm:$0xff] }
  0x2c   :  { %2866 = vmatpush1.bf16.msra.mxu0 %v2865_v15  ;;  %2906 = vmatpush1.bf16.msra.mxu1 %v2905_v17  ;;  %v216_v60 = vld [vmem:[%s6143_s1 + $0x178] sm:$0xff]  ;;  %v2915_v5 = vpack.c.bf16 %v214_v57, %v206_v55  ;;  %v207_v7 = vld [vmem:[%s6143_s1 + $0x130] sm:$0xff]  ;;  %v222_v13 = vld [vmem:[%s6143_s1 + $0x1a8] sm:$0xff] }
  0x2d   :  { %402 = vmatprep.subr.mxu0 %v330_v18  ;;  %539 = vmatprep.subr.mxu1 %v332_v19  ;;  %v215_v8 = vld [vmem:[%s6143_s1 + $0x170] sm:$0xff]  ;;  %v2955_v12 = vpack.c.bf16 %v216_v60, %v208_v59  ;;  %v224_v15 = vld [vmem:[%s6143_s1 + $0x1b8] sm:$0xff]  ;;  %v221_v20 = vld [vmem:[%s6143_s1 + $0x1a0] sm:$0xff] }
  0x2e   :  { %92 = vrot.lane.b32.xlu0 %v56_v4, %s3505_s29  ;;  %129 = vrot.lane.b32.xlu1 %v57_v14, %s3506_s19  ;;  %v230_v14 = vld [vmem:[%s6143_s1 + $0x1e8] sm:$0xff]  ;;  %v2957_v19 = vpack.c.bf16 %v215_v8, %v207_v7  ;;  %v229_v24 = vld [vmem:[%s6143_s1 + $0x1e0] sm:$0xff] }
  0x2f   :  { %v240_v32 = vld [vmem:[%s6143_s1 + $0x238] sm:$0xff]  ;;  %v2921_v35 = vpack.c.bf16 %v229_v24, %v221_v20  ;;  %v237_v38 = vld [vmem:[%s6143_s1 + $0x220] sm:$0xff]  ;;  %v254_v49 = vld [vmem:[%s6143_s1 + $0x2a8] sm:$0xff] }
  0x30   :  { %403 = vmatpush1.msra.mxu0 %v329_v25  ;;  %540 = vmatpush1.msra.mxu1 %v331_v27  ;;  %v223_v25 = vld [vmem:[%s6143_s1 + $0x1b0] sm:$0xff]  ;;  %v245_v41 = vld [vmem:[%s6143_s1 + $0x260] sm:$0xff]  ;;  %v262_v51 = vld [vmem:[%s6143_s1 + $0x2e8] sm:$0xff] }
  0x31   :  { %2908 = vmatprep.subr.bf16.mxu0 %v2907_v26  ;;  %2948 = vmatprep.subr.bf16.mxu1 %v2947_v28  ;;  %v231_v26 = vld [vmem:[%s6143_s1 + $0x1f0] sm:$0xff]  ;;  %v2919_v28 = vpack.c.bf16 %v230_v14, %v222_v13  ;;  %v2925_v55 = vpack.c.bf16 %v245_v41, %v237_v38  ;;  %v270_v7 = vld [vmem:[%s6143_s1 + $0x328] sm:$0xff]  ;;  %v293_v38 = vld [vmem:[%s6143_s1 + $0x3e0] sm:$0xff] }
  0x32   :  { %v278_v8 = vld [vmem:[%s6143_s1 + $0x368] sm:$0xff] }
  0x74   :  { %v71_v30 = vpop.permute.xlu0 %70  ;;  %v73_v31 = vpop.permute.xlu1 %72 }
  0x75   :  { %v144_v45 = vsel %vm143_vm0, %v44_v36, %v71_v30  ;;  %v145_v58 = vsel %vm143_vm0, %v3588_v0, %v73_v31  ;;  %v205_v0 = vld [vmem:[%s6143_s1 + $0x120] sm:$0xff]  ;;  %v238_v30 = vld [vmem:[%s6143_s1 + $0x228] sm:$0xff]  ;;  %v2961_v36 = vpack.c.bf16 %v231_v26, %v223_v25  ;;  %v271_v25 = vld [vmem:[%s6143_s1 + $0x330] sm:$0xff] }
  0x76   :  { %v2917_v18 = vpack.c.bf16 %v213_v6, %v205_v0  ;;  %v246_v31 = vld [vmem:[%s6143_s1 + $0x268] sm:$0xff]  ;;  %v263_v0 = vld [vmem:[%s6143_s1 + $0x2f0] sm:$0xff] }
  0x77   :  { %v279_v26 = vld [vmem:[%s6143_s1 + $0x370] sm:$0xff] }
  0x78   :  { %v3986_v46 = vpop.permute.xlu0 %107  ;;  %v3988_v47 = vpop.permute.xlu1 %109 }
  0x79   :  { %2610 = vmatprep.mubr.msk.f32.mxu0 %vm337_vm1, %v3986_v46  ;;  %2622 = vmatprep.mubr.msk.f32.mxu1 %vm337_vm1, %v3986_v46  ;;  %v4005_v52 = vsel %vm156_vm2, %v144_v45, %v3986_v46  ;;  %v4043_v10 = vsel %vm156_vm2, %v145_v58, %v3988_v47  ;;  %v2923_v45 = vpack.c.bf16 %v246_v31, %v238_v30  ;;  %v253_v58 = vld [vmem:[%s6143_s1 + $0x2a0] sm:$0xff] }
  0x7a   :  { %427 = vmatmul.mubr.f32.vlgmr.msra.gmra.mrb[0].mxu0 %v4005_v52  ;;  %564 = vmatmul.mubr.f32.vlgmr.msra.gmra.mrb[0].mxu1 %v4005_v52 }
  0x7b   :  { %2910 = vmatpush1.bf16.msra.mxu0 %v2909_v42  ;;  %2950 = vmatpush1.bf16.msra.mxu1 %v2949_v43  ;;  %v239_v42 = vld [vmem:[%s6143_s1 + $0x230] sm:$0xff] }
  0x7c   :  { %2611 = vmatprep.mubr.msk.f32.mxu0 %vm337_vm1, %v3988_v47  ;;  %2623 = vmatprep.mubr.msk.f32.mxu1 %vm337_vm1, %v3988_v47  ;;  %v75_v63 = vpop.permute.xlu0 %74  ;;  %v4030_v4 = vpop.permute.xlu1 %111  ;;  %v247_v43 = vld [vmem:[%s6143_s1 + $0x270] sm:$0xff] }
  0x7d   :  { %2912 = vmatprep.subr.bf16.mxu0 %v2911_v53  ;;  %2952 = vmatprep.subr.bf16.mxu1 %v2951_v54  ;;  %v146_v11 = vsel %vm143_vm0, %v3593_v1, %v75_v63  ;;  %v232_v1 = vld [vmem:[%s6143_s1 + $0x1f8] sm:$0xff]  ;;  %v2965_v57 = vpack.c.bf16 %v247_v43, %v239_v42  ;;  %v287_v43 = vld [vmem:[%s6143_s1 + $0x3b0] sm:$0xff] }
  0x7e   :  { %433 = vmatmul.mubr.f32.gmra.mrb[2].mxu0 %v4043_v10  ;;  %570 = vmatmul.mubr.f32.gmra.mrb[2].mxu1 %v4043_v10  ;;  %v4063_v17 = vsel %vm156_vm2, %v146_v11, %v4030_v4  ;;  %v2959_v29 = vpack.c.bf16 %v232_v1, %v224_v15  ;;  %v264_v53 = vld [vmem:[%s6143_s1 + $0x2f8] sm:$0xff] }
  0x7f   :  { %2914 = vmatpush1.bf16.msra.mxu0 %v2913_v61  ;;  %2954 = vmatpush1.bf16.msra.mxu1 %v2953_v62  ;;  %v261_v61 = vld [vmem:[%s6143_s1 + $0x2e0] sm:$0xff]  ;;  %v255_v62 = vld [vmem:[%s6143_s1 + $0x2b0] sm:$0xff]  ;;  %v280_v11 = vld [vmem:[%s6143_s1 + $0x378] sm:$0xff] }
  0x80   :  { %2612 = vmatprep.mubr.msk.f32.mxu0 %vm337_vm1, %v4030_v4  ;;  %2624 = vmatprep.mubr.msk.f32.mxu1 %vm337_vm1, %v4030_v4  ;;  %v77_v21 = vpop.permute.xlu0 %76  ;;  %v4072_v22 = vpop.permute.xlu1 %113  ;;  %v2929_v13 = vpack.c.bf16 %v261_v61, %v253_v58  ;;  %v2969_v14 = vpack.c.bf16 %v263_v0, %v255_v62  ;;  %v301_v58 = vld [vmem:[%s6143_s1 + $0x420] sm:$0xff] }
  0x81   :  { %2916 = vmatprep.subr.bf16.mxu0 %v2915_v5  ;;  %2956 = vmatprep.subr.bf16.mxu1 %v2955_v12  ;;  %v147_v27 = vsel %vm143_vm0, %v3602_v2, %v77_v21  ;;  %v248_v2 = vld [vmem:[%s6143_s1 + $0x278] sm:$0xff]  ;;  %v2927_v5 = vpack.c.bf16 %v262_v51, %v254_v49  ;;  %v2931_v21 = vpack.c.bf16 %v278_v8, %v270_v7 }
  0x82   :  { %439 = vmatmul.mubr.f32.gmra.mrb[4].mxu0 %v4063_v17  ;;  %576 = vmatmul.mubr.f32.gmra.mrb[4].mxu1 %v4063_v17  ;;  %v4101_v34 = vsel %vm156_vm2, %v147_v27, %v4072_v22  ;;  %v2963_v48 = vpack.c.bf16 %v248_v2, %v240_v32  ;;  %v286_v27 = vld [vmem:[%s6143_s1 + $0x3a8] sm:$0xff]  ;;  %v312_v49 = vld [vmem:[%s6143_s1 + $0x478] sm:$0xff] }
  0x83   :  { %2918 = vmatpush1.bf16.msra.mxu0 %v2917_v18  ;;  %2958 = vmatpush1.bf16.msra.mxu1 %v2957_v19  ;;  %v269_v18 = vld [vmem:[%s6143_s1 + $0x320] sm:$0xff]  ;;  %v320_v7 = vld [vmem:[%s6143_s1 + $0x4b8] sm:$0xff] }
  0x84   :  { %2613 = vmatprep.mubr.msk.f32.mxu0 %vm337_vm1, %v4072_v22  ;;  %2625 = vmatprep.mubr.msk.f32.mxu1 %vm337_vm1, %v4072_v22  ;;  %v79_v39 = vpop.permute.xlu0 %78  ;;  %v4110_v40 = vpop.permute.xlu1 %115  ;;  %v277_v19 = vld [vmem:[%s6143_s1 + $0x360] sm:$0xff]  ;;  %v328_v8 = vld [vmem:[%s6143_s1 + $0x4f8] sm:$0xff] }
  0x85   :  { %v148_v44 = vsel %vm143_vm0, %v3607_v3, %v79_v39  ;;  %2920 = vmatprep.subr.bf16.mxu0 %v2919_v28  ;;  %2960 = vmatprep.subr.bf16.mxu1 %v2959_v29  ;;  %v256_v3 = vld [vmem:[%s6143_s1 + $0x2b8] sm:$0xff]  ;;  %v2933_v2 = vpack.c.bf16 %v277_v19, %v269_v18  ;;  %v317_v18 = vld [vmem:[%s6143_s1 + $0x4a0] sm:$0xff] }
  0x86   :  { %445 = vmatmul.mubr.f32.gmra.mrb[6].mxu0 %v4101_v34  ;;  %582 = vmatmul.mubr.f32.gmra.mrb[6].mxu1 %v4101_v34  ;;  %v4139_v54 = vsel %vm156_vm2, %v148_v44, %v4110_v40  ;;  %v2967_v6 = vpack.c.bf16 %v264_v53, %v256_v3  ;;  %v288_v28 = vld [vmem:[%s6143_s1 + $0x3b8] sm:$0xff]  ;;  %v295_v44 = vld [vmem:[%s6143_s1 + $0x3f0] sm:$0xff] }
  0x87   :  { %2922 = vmatpush1.bf16.msra.mxu0 %v2921_v35  ;;  %2962 = vmatpush1.bf16.msra.mxu1 %v2961_v36  ;;  %v296_v29 = vld [vmem:[%s6143_s1 + $0x3f8] sm:$0xff]  ;;  %v2973_v35 = vpack.c.bf16 %v279_v26, %v271_v25  ;;  %v285_v36 = vld [vmem:[%s6143_s1 + $0x3a0] sm:$0xff]  ;;  %v319_v25 = vld [vmem:[%s6143_s1 + $0x4b0] sm:$0xff] }
  0x88   :  { %2614 = vmatprep.mubr.msk.f32.mxu0 %vm337_vm1, %v4110_v40  ;;  %2626 = vmatprep.mubr.msk.f32.mxu1 %vm337_vm1, %v4110_v40  ;;  %v81_v59 = vpop.permute.xlu0 %80  ;;  %v4148_v60 = vpop.permute.xlu1 %117  ;;  %v2975_v42 = vpack.c.bf16 %v296_v29, %v288_v28  ;;  %v327_v26 = vld [vmem:[%s6143_s1 + $0x4f0] sm:$0xff] }
  0x89   :  { %v149_v63 = vsel %vm143_vm0, %v3643_v16, %v81_v59  ;;  %2924 = vmatprep.subr.bf16.mxu0 %v2923_v45  ;;  %2964 = vmatprep.subr.bf16.mxu1 %v2963_v48  ;;  %v272_v16 = vld [vmem:[%s6143_s1 + $0x338] sm:$0xff]  ;;  %v302_v45 = vld [vmem:[%s6143_s1 + $0x428] sm:$0xff]  ;;  %v309_v59 = vld [vmem:[%s6143_s1 + $0x460] sm:$0xff]  ;;  %v2985_v29 = vpack.c.bf16 %v327_v26, %v319_v25 }
  0x8a   :  { %451 = vmatmul.mubr.f32.gmra.mrb[8].mxu0 %v4139_v54  ;;  %588 = vmatmul.mubr.f32.gmra.mrb[8].mxu1 %v4139_v54  ;;  %v4177_v12 = vsel %vm156_vm2, %v149_v63, %v4148_v60  ;;  %v2971_v24 = vpack.c.bf16 %v280_v11, %v272_v16  ;;  %v304_v48 = vld [vmem:[%s6143_s1 + $0x438] sm:$0xff]  ;;  %v303_v63 = vld [vmem:[%s6143_s1 + $0x430] sm:$0xff]  ;;  %v1341_v26 = vld [vmem:[%s6144_s3 + $0xc8] sm:$0xff] }
  0x8b   :  { %2926 = vmatpush1.bf16.msra.mxu0 %v2925_v55  ;;  %2966 = vmatpush1.bf16.msra.mxu1 %v2965_v57  ;;  %v2937_v55 = vpack.c.bf16 %v293_v38, %v285_v36  ;;  %v2977_v57 = vpack.c.bf16 %v295_v44, %v287_v43  ;;  %v2979_v0 = vpack.c.bf16 %v312_v49, %v304_v48  ;;  %v1326_v44 = vld [vmem:[%s6144_s3 + $0x50] sm:$0xff]  ;;  %v1331_v48 = vld [vmem:[%s6144_s3 + $0x78] sm:$0xff] }
  0x8c   :  { %2615 = vmatprep.mubr.msk.f32.mxu0 %vm337_vm1, %v4148_v60  ;;  %2627 = vmatprep.mubr.msk.f32.mxu1 %vm337_vm1, %v4148_v60  ;;  %v83_v15 = vpop.permute.xlu0 %82  ;;  %v4183_v1 = vpop.permute.xlu1 %119 }
  0x8d   :  { %v150_v20 = vsel %vm143_vm0, %v3685_v33, %v83_v15  ;;  %2928 = vmatprep.subr.bf16.mxu0 %v2927_v5  ;;  %2968 = vmatprep.subr.bf16.mxu1 %v2967_v6  ;;  %v294_v33 = vld [vmem:[%s6143_s1 + $0x3e8] sm:$0xff]  ;;  %v311_v5 = vld [vmem:[%s6143_s1 + $0x470] sm:$0xff] }
  0x8e   :  { %457 = vmatmul.mubr.f32.gmra.mrb[10].mxu0 %v4177_v12  ;;  %594 = vmatmul.mubr.f32.gmra.mrb[10].mxu1 %v4177_v12  ;;  %v4215_v30 = vsel %vm156_vm2, %v150_v20, %v4183_v1  ;;  %v2935_v41 = vpack.c.bf16 %v294_v33, %v286_v27  ;;  %v318_v6 = vld [vmem:[%s6143_s1 + $0x4a8] sm:$0xff]  ;;  %v2981_v15 = vpack.c.bf16 %v311_v5, %v303_v63 }
  0x8f   :  { %2930 = vmatpush1.bf16.msra.mxu0 %v2929_v13  ;;  %2970 = vmatpush1.bf16.msra.mxu1 %v2969_v14  ;;  %v2941_v14 = vpack.c.bf16 %v309_v59, %v301_v58  ;;  %v1332_v59 = vld [vmem:[%s6144_s3 + $0x80] sm:$0xff] }
  0x90   :  { %2616 = vmatprep.mubr.msk.f32.mxu0 %vm337_vm1, %v4183_v1  ;;  %2628 = vmatprep.mubr.msk.f32.mxu1 %vm337_vm1, %v4183_v1  ;;  %v85_v31 = vpop.permute.xlu0 %84  ;;  %v4221_v32 = vpop.permute.xlu1 %121 }
  0x91   :  { %v151_v39 = vsel %vm143_vm0, %v3746_v56, %v85_v31  ;;  %2932 = vmatprep.subr.bf16.mxu0 %v2931_v21  ;;  %2972 = vmatprep.subr.bf16.mxu1 %v2971_v24  ;;  %v310_v56 = vld [vmem:[%s6143_s1 + $0x468] sm:$0xff]  ;;  %v2983_v21 = vpack.c.bf16 %v328_v8, %v320_v7  ;;  %v325_v24 = vld [vmem:[%s6143_s1 + $0x4e0] sm:$0xff] }
  0x92   :  { %463 = vmatmul.mubr.f32.gmra.mrb[12].mxu0 %v4215_v30  ;;  %600 = vmatmul.mubr.f32.gmra.mrb[12].mxu1 %v4215_v30  ;;  %v4257_v51 = vsel %vm156_vm2, %v151_v39, %v4221_v32  ;;  %v2939_v62 = vpack.c.bf16 %v310_v56, %v302_v45  ;;  %v2945_v28 = vpack.c.bf16 %v325_v24, %v317_v18  ;;  %v1329_v56 = vld [vmem:[%s6144_s3 + $0x68] sm:$0xff] }
  0x93   :  { %2617 = vmatprep.mubr.msk.f32.mxu0 %vm337_vm1, %v4221_v32  ;;  %2629 = vmatprep.mubr.msk.f32.mxu1 %vm337_vm1, %v4221_v32  ;;  %v2999_v49 = vpack.c.bf16 %v1331_v48, %v1329_v56  ;;  %v1337_v8 = vld [vmem:[%s6144_s3 + $0xa8] sm:$0xff] }
  0x94   :  { %2934 = vmatpush1.bf16.msra.mxu0 %v2933_v2  ;;  %2974 = vmatpush1.bf16.msra.mxu1 %v2973_v35  ;;  %v87_v3 = vpop.permute.xlu0 %86  ;;  %v4259_v53 = vpop.permute.xlu1 %123  ;;  %v334_v2 = vld [vmem:[%s6143_s1 + $0x528] sm:$0xff]  ;;  %v336_v35 = vld [vmem:[%s6143_s1 + $0x538] sm:$0xff] }
  0x95   :  { %v152_v61 = vsel %vm143_vm0, %v3779_v9, %v87_v3  ;;  %2936 = vmatprep.subr.bf16.mxu0 %v2935_v41  ;;  %2976 = vmatprep.subr.bf16.mxu1 %v2975_v42  ;;  %v326_v9 = vld [vmem:[%s6143_s1 + $0x4e8] sm:$0xff]  ;;  %v333_v41 = vld [vmem:[%s6143_s1 + $0x520] sm:$0xff]  ;;  %v335_v42 = vld [vmem:[%s6143_s1 + $0x530] sm:$0xff] }
  0x96   :  { %469 = vmatmul.mubr.f32.gmra.mrb[14].mxu0 %v4257_v51  ;;  %606 = vmatmul.mubr.f32.gmra.mrb[14].mxu1 %v4257_v51  ;;  %v4295_v16 = vsel %vm156_vm2, %v152_v61, %v4259_v53  ;;  %v2943_v20 = vpack.c.bf16 %v326_v9, %v318_v6  ;;  %v1330_v3 = vld [vmem:[%s6144_s3 + $0x70] sm:$0xff] }
  0x97   :  { %2618 = vmatprep.mubr.msk.f32.mxu0 %vm337_vm1, %v4259_v53  ;;  %2630 = vmatprep.mubr.msk.f32.mxu1 %vm337_vm1, %v4259_v53  ;;  %v1334_v61 = vld [vmem:[%s6144_s3 + $0x90] sm:$0xff] }
  0x98   :  { %2938 = vmatpush1.bf16.msra.mxu0 %v2937_v55  ;;  %2978 = vmatpush1.bf16.msra.mxu1 %v2977_v57  ;;  %v89_v11 = vpop.permute.xlu0 %88  ;;  %v4297_v13 = vpop.permute.xlu1 %125  ;;  %v1333_v55 = vld [vmem:[%s6144_s3 + $0x88] sm:$0xff]  ;;  %v1335_v57 = vld [vmem:[%s6144_s3 + $0x98] sm:$0xff]  ;;  %v3005_v63 = vpack.c.bf16 %v1334_v61, %v1332_v59 }
  0x99   :  { %v153_v19 = vsel %vm143_vm0, %v3812_v23, %v89_v11  ;;  %2940 = vmatprep.subr.bf16.mxu0 %v2939_v62  ;;  %2980 = vmatprep.subr.bf16.mxu1 %v2979_v0  ;;  %v3003_v58 = vpack.c.bf16 %v1335_v57, %v1333_v55  ;;  %v1354_v55 = vld [vmem:[%s6144_s3 + $0x130] sm:$0xff] }
  0x9a   :  { %475 = vmatmul.mubr.f32.gmra.mrb[16].mxu0 %v4295_v16  ;;  %612 = vmatmul.mubr.f32.gmra.mrb[16].mxu1 %v4295_v16  ;;  %v4321_v23 = vsel %vm156_vm2, %v153_v19, %v4297_v13 }
  0x9b   :  { %2619 = vmatprep.mubr.msk.f32.mxu0 %vm337_vm1, %v4297_v13  ;;  %2631 = vmatprep.mubr.msk.f32.mxu1 %vm337_vm1, %v4297_v13 }
  0x9c   :  { %2942 = vmatpush1.bf16.msra.mxu0 %v2941_v14  ;;  %2982 = vmatpush1.bf16.msra.mxu1 %v2981_v15  ;;  %v91_v27 = vpop.permute.xlu0 %90  ;;  %v4323_v33 = vpop.permute.xlu1 %127  ;;  %v1338_v14 = vld [vmem:[%s6144_s3 + $0xb0] sm:$0xff] }
  0x9d   :  { %v154_v31 = vsel %vm143_vm0, %v3845_v37, %v91_v27  ;;  %2944 = vmatprep.subr.bf16.mxu0 %v2943_v20  ;;  %2984 = vmatprep.subr.bf16.mxu1 %v2983_v21 }
  0x9e   :  { %481 = vmatmul.mubr.f32.gmra.mrb[18].mxu0 %v4321_v23  ;;  %618 = vmatmul.mubr.f32.gmra.mrb[18].mxu1 %v4321_v23  ;;  %v167_v37 = vsel %vm156_vm2, %v154_v31, %v4323_v33 }
  0x9f   :  { %2620 = vmatprep.mubr.msk.f32.mxu0 %vm337_vm1, %v4323_v33  ;;  %2632 = vmatprep.mubr.msk.f32.mxu1 %vm337_vm1, %v4323_v33 }
  0xa0   :  { %2946 = vmatpush1.bf16.msra.mxu0 %v2945_v28  ;;  %2986 = vmatpush1.bf16.msra.mxu1 %v2985_v29  ;;  %v93_v36 = vpop.permute.xlu0 %92  ;;  %v130_v38 = vpop.permute.xlu1 %129  ;;  %v1342_v28 = vld [vmem:[%s6144_s3 + $0xd0] sm:$0xff] }
  0xa1   :  { %v155_v39 = vsel %vm143_vm0, %v3878_v50, %v93_v36  ;;  %676 = vmatprep.subr.mxu0 %v334_v2  ;;  %813 = vmatprep.subr.mxu1 %v336_v35  ;;  %v1317_v50 = vld [vmem:[%s6144_s3 + $0x8] sm:$0xff] }
  0xa2   :  { %487 = vmatmul.mubr.f32.gmra.mrb[20].mxu0 %v167_v37  ;;  %624 = vmatmul.mubr.f32.gmra.mrb[20].mxu1 %v167_v37  ;;  %v168_v43 = vsel %vm156_vm2, %v155_v39, %v130_v38  ;;  %v1345_v39 = vld [vmem:[%s6144_s3 + $0xe8] sm:$0xff] }
  0xa3   :  { %2621 = vmatprep.mubr.msk.f32.mxu0 %vm337_vm1, %v130_v38  ;;  %2633 = vmatprep.mubr.msk.f32.mxu1 %vm337_vm1, %v130_v38 }
  0xa4   :  { %677 = vmatpush1.msra.mxu0 %v333_v41  ;;  %814 = vmatpush1.msra.mxu1 %v335_v42  ;;  %v1347_v41 = vld [vmem:[%s6144_s3 + $0xf8] sm:$0xff] }
  0xa5   :  { %v3015_v42 = vpack.c.bf16 %v1347_v41, %v1345_v39  ;;  %v1379_v41 = vld [vmem:[%s6144_s3 + $0x1f8] sm:$0xff] }
  0xa6   :  { %493 = vmatmul.mubr.f32.gmra.mrb[22].mxu0 %v168_v43  ;;  %630 = vmatmul.mubr.f32.gmra.mrb[22].mxu1 %v168_v43 }
  0xa7   :  { %2634 = vmatprep.mubr.msk.f32.mxu0 %vm337_vm1, %v3986_v46  ;;  %2646 = vmatprep.mubr.msk.f32.mxu1 %vm337_vm1, %v3986_v46  ;;  %v1319_v46 = vld [vmem:[%s6144_s3 + $0x18] sm:$0xff] }
  0xaa   :  { %701 = vmatmul.mubr.f32.vlgmr.msra.gmra.mrb[24].mxu0 %v4005_v52  ;;  %838 = vmatmul.mubr.f32.vlgmr.msra.gmra.mrb[24].mxu1 %v4005_v52  ;;  %v1316_v52 = vld [vmem:[%s6144_s3] sm:$0xff] }
  0xab   :  { %2635 = vmatprep.mubr.msk.f32.mxu0 %vm337_vm1, %v3988_v47  ;;  %2647 = vmatprep.mubr.msk.f32.mxu1 %vm337_vm1, %v3988_v47  ;;  %v2987_v47 = vpack.c.bf16 %v1319_v46, %v1317_v50  ;;  %v1346_v50 = vld [vmem:[%s6144_s3 + $0xf0] sm:$0xff] }
  0xad   :  { %2988 = vmatprep.subr.bf16.mxu0 %v2987_v47 }
  0xae   :  { %707 = vmatmul.mubr.f32.gmra.mrb[26].mxu0 %v4043_v10  ;;  %844 = vmatmul.mubr.f32.gmra.mrb[26].mxu1 %v4043_v10 }
  0xaf   :  { %2636 = vmatprep.mubr.msk.f32.mxu0 %vm337_vm1, %v4030_v4  ;;  %2648 = vmatprep.mubr.msk.f32.mxu1 %vm337_vm1, %v4030_v4  ;;  %v1318_v4 = vld [vmem:[%s6144_s3 + $0x10] sm:$0xff] }
  0xb0   :  { %v2989_v10 = vpack.c.bf16 %v1318_v4, %v1316_v52 }
  0xb2   :  { %713 = vmatmul.mubr.f32.gmra.mrb[28].mxu0 %v4063_v17  ;;  %850 = vmatmul.mubr.f32.gmra.mrb[28].mxu1 %v4063_v17  ;;  %v1321_v17 = vld [vmem:[%s6144_s3 + $0x28] sm:$0xff] }
  0xb3   :  { %2637 = vmatprep.mubr.msk.f32.mxu0 %vm337_vm1, %v4072_v22  ;;  %2649 = vmatprep.mubr.msk.f32.mxu1 %vm337_vm1, %v4072_v22  ;;  %v1323_v22 = vld [vmem:[%s6144_s3 + $0x38] sm:$0xff] }
  0xb4   :  { %2990 = vmatpush1.bf16.msra.mxu0 %v2989_v10 }
  0xb6   :  { %719 = vmatmul.mubr.f32.gmra.mrb[30].mxu0 %v4101_v34  ;;  %856 = vmatmul.mubr.f32.gmra.mrb[30].mxu1 %v4101_v34  ;;  %v2991_v34 = vpack.c.bf16 %v1323_v22, %v1321_v17 }
  0xb7   :  { %2638 = vmatprep.mubr.msk.f32.mxu0 %vm337_vm1, %v4110_v40  ;;  %2650 = vmatprep.mubr.msk.f32.mxu1 %vm337_vm1, %v4110_v40  ;;  %v1320_v40 = vld [vmem:[%s6144_s3 + $0x20] sm:$0xff] }
  0xb8   :  { %2992 = vmatprep.subr.bf16.mxu0 %v2991_v34  ;;  %v1349_v34 = vld [vmem:[%s6144_s3 + $0x108] sm:$0xff] }
  0xba   :  { %725 = vmatmul.mubr.f32.gmra.mrb[32].mxu0 %v4139_v54  ;;  %862 = vmatmul.mubr.f32.gmra.mrb[32].mxu1 %v4139_v54  ;;  %v1322_v54 = vld [vmem:[%s6144_s3 + $0x30] sm:$0xff] }
  0xbb   :  { %2639 = vmatprep.mubr.msk.f32.mxu0 %vm337_vm1, %v4148_v60  ;;  %2651 = vmatprep.mubr.msk.f32.mxu1 %vm337_vm1, %v4148_v60  ;;  %v2993_v60 = vpack.c.bf16 %v1322_v54, %v1320_v40  ;;  %v1351_v40 = vld [vmem:[%s6144_s3 + $0x118] sm:$0xff] }
  0xbc   :  { %v3019_v54 = vpack.c.bf16 %v1351_v40, %v1349_v34  ;;  %v1362_v34 = vld [vmem:[%s6144_s3 + $0x170] sm:$0xff] }
  0xbd   :  { %2994 = vmatpush1.bf16.msra.mxu0 %v2993_v60  ;;  %v1348_v60 = vld [vmem:[%s6144_s3 + $0x100] sm:$0xff] }
  0xbe   :  { %731 = vmatmul.mubr.f32.gmra.mrb[34].mxu0 %v4177_v12  ;;  %868 = vmatmul.mubr.f32.gmra.mrb[34].mxu1 %v4177_v12  ;;  %v1325_v12 = vld [vmem:[%s6144_s3 + $0x48] sm:$0xff] }
  0xbf   :  { %2640 = vmatprep.mubr.msk.f32.mxu0 %vm337_vm1, %v4183_v1  ;;  %2652 = vmatprep.mubr.msk.f32.mxu1 %vm337_vm1, %v4183_v1  ;;  %v1327_v1 = vld [vmem:[%s6144_s3 + $0x58] sm:$0xff] }
  0xc2   :  { %737 = vmatmul.mubr.f32.gmra.mrb[36].mxu0 %v4215_v30  ;;  %874 = vmatmul.mubr.f32.gmra.mrb[36].mxu1 %v4215_v30  ;;  %v2995_v30 = vpack.c.bf16 %v1327_v1, %v1325_v12  ;;  %v1350_v12 = vld [vmem:[%s6144_s3 + $0x110] sm:$0xff] }
  0xc3   :  { %2641 = vmatprep.mubr.msk.f32.mxu0 %vm337_vm1, %v4221_v32  ;;  %2653 = vmatprep.mubr.msk.f32.mxu1 %vm337_vm1, %v4221_v32  ;;  %v1324_v32 = vld [vmem:[%s6144_s3 + $0x40] sm:$0xff] }
  0xc4   :  { %v2997_v45 = vpack.c.bf16 %v1326_v44, %v1324_v32  ;;  %2996 = vmatprep.subr.bf16.mxu0 %v2995_v30  ;;  %v3021_v32 = vpack.c.bf16 %v1350_v12, %v1348_v60  ;;  %v1377_v12 = vld [vmem:[%s6144_s3 + $0x1e8] sm:$0xff] }
  0xc6   :  { %743 = vmatmul.mubr.f32.gmra.mrb[38].mxu0 %v4257_v51  ;;  %880 = vmatmul.mubr.f32.gmra.mrb[38].mxu1 %v4257_v51  ;;  %v1328_v51 = vld [vmem:[%s6144_s3 + $0x60] sm:$0xff] }
  0xc7   :  { %2642 = vmatprep.mubr.msk.f32.mxu0 %vm337_vm1, %v4259_v53  ;;  %2654 = vmatprep.mubr.msk.f32.mxu1 %vm337_vm1, %v4259_v53  ;;  %v3001_v53 = vpack.c.bf16 %v1330_v3, %v1328_v51  ;;  %v1355_v51 = vld [vmem:[%s6144_s3 + $0x138] sm:$0xff] }
  0xc8   :  { %2998 = vmatpush1.bf16.msra.mxu0 %v2997_v45 }
  0xc9   :  { %3000 = vmatprep.subr.bf16.mxu0 %v2999_v49  ;;  %v1353_v49 = vld [vmem:[%s6144_s3 + $0x128] sm:$0xff] }
  0xca   :  { %749 = vmatmul.mubr.f32.gmra.mrb[40].mxu0 %v4295_v16  ;;  %886 = vmatmul.mubr.f32.gmra.mrb[40].mxu1 %v4295_v16  ;;  %v1339_v16 = vld [vmem:[%s6144_s3 + $0xb8] sm:$0xff]  ;;  %v3023_v3 = vpack.c.bf16 %v1355_v51, %v1353_v49 }
  0xcb   :  { %2643 = vmatprep.mubr.msk.f32.mxu0 %vm337_vm1, %v4297_v13  ;;  %2655 = vmatprep.mubr.msk.f32.mxu1 %vm337_vm1, %v4297_v13  ;;  %v3007_v11 = vpack.c.bf16 %v1339_v16, %v1337_v8  ;;  %v1336_v13 = vld [vmem:[%s6144_s3 + $0xa0] sm:$0xff]  ;;  %v3047_v16 = vpack.c.bf16 %v1379_v41, %v1377_v12 }
  0xcc   :  { %3002 = vmatpush1.bf16.msra.mxu0 %v3001_v53  ;;  %v3009_v19 = vpack.c.bf16 %v1338_v14, %v1336_v13  ;;  %v1352_v53 = vld [vmem:[%s6144_s3 + $0x120] sm:$0xff]  ;;  %v1359_v13 = vld [vmem:[%s6144_s3 + $0x158] sm:$0xff] }
  0xcd   :  { %3004 = vmatprep.subr.bf16.mxu0 %v3003_v58  ;;  %v3025_v59 = vpack.c.bf16 %v1354_v55, %v1352_v53  ;;  %v1367_v53 = vld [vmem:[%s6144_s3 + $0x198] sm:$0xff] }
  0xce   :  { %755 = vmatmul.mubr.f32.gmra.mrb[42].mxu0 %v4321_v23  ;;  %892 = vmatmul.mubr.f32.gmra.mrb[42].mxu1 %v4321_v23  ;;  %v1343_v23 = vld [vmem:[%s6144_s3 + $0xd8] sm:$0xff] }
  0xcf   :  { %2644 = vmatprep.mubr.msk.f32.mxu0 %vm337_vm1, %v4323_v33  ;;  %2656 = vmatprep.mubr.msk.f32.mxu1 %vm337_vm1, %v4323_v33  ;;  %v3011_v27 = vpack.c.bf16 %v1343_v23, %v1341_v26  ;;  %v1340_v33 = vld [vmem:[%s6144_s3 + $0xc0] sm:$0xff]  ;;  %v1358_v26 = vld [vmem:[%s6144_s3 + $0x150] sm:$0xff] }
  0xd0   :  { %3006 = vmatpush1.bf16.msra.mxu0 %v3005_v63  ;;  %v3013_v2 = vpack.c.bf16 %v1342_v28, %v1340_v33 }
  0xd1   :  { %3008 = vmatprep.subr.bf16.mxu0 %v3007_v11  ;;  %v1357_v11 = vld [vmem:[%s6144_s3 + $0x148] sm:$0xff] }
  0xd2   :  { %761 = vmatmul.mubr.f32.gmra.mrb[44].mxu0 %v167_v37  ;;  %898 = vmatmul.mubr.f32.gmra.mrb[44].mxu1 %v167_v37  ;;  %v3027_v14 = vpack.c.bf16 %v1359_v13, %v1357_v11  ;;  %v1366_v11 = vld [vmem:[%s6144_s3 + $0x190] sm:$0xff] }
  0xd3   :  { %2645 = vmatprep.mubr.msk.f32.mxu0 %vm337_vm1, %v130_v38  ;;  %2657 = vmatprep.mubr.msk.f32.mxu1 %vm337_vm1, %v130_v38 }
  0xd4   :  { %3010 = vmatpush1.bf16.msra.mxu0 %v3009_v19  ;;  %v1356_v19 = vld [vmem:[%s6144_s3 + $0x140] sm:$0xff] }
  0xd5   :  { %3012 = vmatprep.subr.bf16.mxu0 %v3011_v27  ;;  %v3029_v33 = vpack.c.bf16 %v1358_v26, %v1356_v19 }
  0xd6   :  { %767 = vmatmul.mubr.f32.gmra.mrb[46].mxu0 %v168_v43  ;;  %904 = vmatmul.mubr.f32.gmra.mrb[46].mxu1 %v168_v43  ;;  %v1344_v43 = vld [vmem:[%s6144_s3 + $0xe0] sm:$0xff] }
  0xd7   :  { %v3017_v52 = vpack.c.bf16 %v1346_v50, %v1344_v43  ;;  %v1363_v43 = vld [vmem:[%s6144_s3 + $0x178] sm:$0xff] }
  0xd8   :  { %3014 = vmatpush1.bf16.msra.mxu0 %v3013_v2 }
  0xd9   :  { %3016 = vmatprep.subr.bf16.mxu0 %v3015_v42  ;;  %v1361_v42 = vld [vmem:[%s6144_s3 + $0x168] sm:$0xff] }
  0xda   :  { %v3031_v50 = vpack.c.bf16 %v1363_v43, %v1361_v42 }
  0xdc   :  { %3018 = vmatpush1.bf16.msra.mxu0 %v3017_v52  ;;  %v1360_v52 = vld [vmem:[%s6144_s3 + $0x160] sm:$0xff] }
  0xdd   :  { %3020 = vmatprep.subr.bf16.mxu0 %v3019_v54  ;;  %v3033_v60 = vpack.c.bf16 %v1362_v34, %v1360_v52  ;;  %v1371_v52 = vld [vmem:[%s6144_s3 + $0x1b8] sm:$0xff] }
  0xe0   :  { %3022 = vmatpush1.bf16.msra.mxu0 %v3021_v32 }
  0xe1   :  { %3024 = vmatprep.subr.bf16.mxu0 %v3023_v3  ;;  %v1365_v3 = vld [vmem:[%s6144_s3 + $0x188] sm:$0xff] }
  0xe2   :  { %v3035_v55 = vpack.c.bf16 %v1367_v53, %v1365_v3  ;;  %v1370_v3 = vld [vmem:[%s6144_s3 + $0x1b0] sm:$0xff]  ;;  %v1373_v53 = vld [vmem:[%s6144_s3 + $0x1c8] sm:$0xff] }
  0xe4   :  { %3026 = vmatpush1.bf16.msra.mxu0 %v3025_v59  ;;  %v1364_v59 = vld [vmem:[%s6144_s3 + $0x180] sm:$0xff] }
  0xe5   :  { %3028 = vmatprep.subr.bf16.mxu0 %v3027_v14  ;;  %v3037_v19 = vpack.c.bf16 %v1366_v11, %v1364_v59 }
  0xe8   :  { %3030 = vmatpush1.bf16.msra.mxu0 %v3029_v33 }
  0xe9   :  { %3032 = vmatprep.subr.bf16.mxu0 %v3031_v50  ;;  %v1369_v50 = vld [vmem:[%s6144_s3 + $0x1a8] sm:$0xff] }
  0xea   :  { %v3039_v34 = vpack.c.bf16 %v1371_v52, %v1369_v50  ;;  %v1372_v50 = vld [vmem:[%s6144_s3 + $0x1c0] sm:$0xff]  ;;  %v1374_v52 = vld [vmem:[%s6144_s3 + $0x1d0] sm:$0xff] }
  0xeb   :  { %v3045_v43 = vpack.c.bf16 %v1374_v52, %v1372_v50 }
  0xec   :  { %3034 = vmatpush1.bf16.msra.mxu0 %v3033_v60  ;;  %v1368_v60 = vld [vmem:[%s6144_s3 + $0x1a0] sm:$0xff] }
  0xed   :  { %3036 = vmatprep.subr.bf16.mxu0 %v3035_v55  ;;  %v3041_v11 = vpack.c.bf16 %v1370_v3, %v1368_v60  ;;  %v984_v60 = vlaneseq }
  0xef   :  { %v4740_v41 = vshrl.u32 %v984_v60, 7 }
  0xf0   :  { %3038 = vmatpush1.bf16.msra.mxu0 %v3037_v19  ;;  %v1375_v19 = vld [vmem:[%s6144_s3 + $0x1d8] sm:$0xff] }
  0xf1   :  { %3040 = vmatprep.subr.bf16.mxu0 %v3039_v34  ;;  %v3043_v3 = vpack.c.bf16 %v1375_v19, %v1373_v53  ;;  %v1376_v34 = vld [vmem:[%s6144_s3 + $0x1e0] sm:$0xff]  ;;  %v1378_v53 = vld [vmem:[%s6144_s3 + $0x1f0] sm:$0xff]  ;;  %v6157_v60 = vsub.s32 0, %v4740_v41 }
  0xf2   :  { %v3049_v50 = vpack.c.bf16 %v1378_v53, %v1376_v34  ;;  %v1381_v34 = vld [vmem:[%s6144_s3 + $0x208] sm:$0xff]  ;;  %v1383_v53 = vld [vmem:[%s6144_s3 + $0x218] sm:$0xff] }
  0xf3   :  { %v3051_v44 = vpack.c.bf16 %v1383_v53, %v1381_v34 }
  0xf4   :  { %3042 = vmatpush1.bf16.msra.mxu0 %v3041_v11 }
  0xf5   :  { %3044 = vmatprep.subr.bf16.mxu0 %v3043_v3 }
  0xf8   :  { %3046 = vmatpush1.bf16.msra.mxu0 %v3045_v43  ;;  %v990_v43 = vsub.s32 1, %v4740_v41 }
  0xf9   :  { %3048 = vmatprep.subr.bf16.mxu0 %v3047_v16  ;;  %v982_v16 = vld [vmem:[%s6145_s2] sm:$0x3]  ;;  %s3507_s2 = smov 16  }
  0xfa   :  { %v4769_v4 = vrot.slane %v982_v16, %v6157_v60  ;;  %v4773_v7 = vrot.slane %v982_v16, %v990_v43 }
  0xfc   :  { %3050 = vmatpush1.bf16.msra.mxu0 %v3049_v50 }
  0xfd   :  { %3052 = vmatprep.subr.bf16.mxu0 %v3051_v44 }
 0x14d   :  { %v4478_v62 = vpop.f32.mrb[0].mxu0  ;;  %v4480_v0 = vpop.f32.mrb[0].mxu1 }
 0x14e   :  { %v910_v5 = vmax.f32 %v4478_v62, %v4480_v0  ;;  %v4484_v6 = vpop.f32.mrb[1].mxu0  ;;  %v4486_v9 = vpop.f32.mrb[1].mxu1 }
 0x14f   :  { %v6161_v34 = vmax.f32 %v4484_v6, %v4486_v9 }
 0x151   :  { %v4502_v15 = vpop.f32.mrb[2].mxu0  ;;  %v4504_v18 = vpop.f32.mrb[2].mxu1 }
 0x152   :  { %v4508_v21 = vpop.f32.mrb[3].mxu0  ;;  %v4510_v24 = vpop.f32.mrb[3].mxu1  ;;  %v6162_v62 = vmax.f32 %v4502_v15, %v4504_v18 }
 0x155   :  { %v4526_v29 = vpop.f32.mrb[4].mxu0  ;;  %v4528_v31 = vpop.f32.mrb[4].mxu1 }
 0x156   :  { %v4532_v37 = vpop.f32.mrb[5].mxu0  ;;  %v4534_v36 = vpop.f32.mrb[5].mxu1 }
 0x157   :  { %v6165_v18 = vmax.f32 %v4532_v37, %v4534_v36 }
 0x159   :  { %v4550_v46 = vpop.f32.mrb[6].mxu0  ;;  %v4552_v47 = vpop.f32.mrb[6].mxu1 }
 0x15a   :  { %v4556_v10 = vpop.f32.mrb[7].mxu0  ;;  %v4558_v17 = vpop.f32.mrb[7].mxu1 }
 0x15b   :  { %v6167_v37 = vmax.f32 %v4556_v10, %v4558_v17 }
 0x15d   :  { %v4574_v1 = vpop.f32.mrb[8].mxu0  ;;  %v4576_v30 = vpop.f32.mrb[8].mxu1 }
 0x15e   :  { %v4580_v45 = vpop.f32.mrb[9].mxu0  ;;  %v4582_v56 = vpop.f32.mrb[9].mxu1 }
 0x15f   :  { %v6169_v10 = vmax.f32 %v4580_v45, %v4582_v56 }
 0x161   :  { %v4598_v57 = vpop.f32.mrb[10].mxu0  ;;  %v4600_v58 = vpop.f32.mrb[10].mxu1 }
 0x162   :  { %v4604_v63 = vpop.f32.mrb[11].mxu0  ;;  %v4606_v8 = vpop.f32.mrb[11].mxu1 }
 0x163   :  { %v6171_v45 = vmax.f32 %v4604_v63, %v4606_v8 }
 0x165   :  { %v4622_v23 = vpop.f32.mrb[12].mxu0  ;;  %v4624_v27 = vpop.f32.mrb[12].mxu1 }
 0x166   :  { %v4628_v2 = vpop.f32.mrb[13].mxu0  ;;  %v4630_v39 = vpop.f32.mrb[13].mxu1 }
 0x167   :  { %v6173_v63 = vmax.f32 %v4628_v2, %v4630_v39 }
 0x169   :  { %v4646_v40 = vpop.f32.mrb[14].mxu0  ;;  %v4648_v54 = vpop.f32.mrb[14].mxu1 }
 0x16a   :  { %v4652_v32 = vpop.f32.mrb[15].mxu0  ;;  %v4654_v49 = vpop.f32.mrb[15].mxu1 }
 0x16b   :  { %v6175_v2 = vmax.f32 %v4652_v32, %v4654_v49 }
 0x16d   :  { %v4670_v13 = vpop.f32.mrb[16].mxu0  ;;  %v4672_v14 = vpop.f32.mrb[16].mxu1 }
 0x16e   :  { %v4676_v33 = vpop.f32.mrb[17].mxu0  ;;  %v4678_v42 = vpop.f32.mrb[17].mxu1  ;;  %v6176_v32 = vmax.f32 %v4670_v13, %v4672_v14 }
 0x171   :  { %v4697_v55 = vpop.f32.mrb[18].mxu0  ;;  %v4699_v59 = vpop.f32.mrb[18].mxu1 }
 0x172   :  { %v4712_v26 = vpop.f32.mrb[19].mxu0  ;;  %v4714_v51 = vpop.f32.mrb[19].mxu1 }
 0x175   :  { %v4730_v19 = vpop.f32.mrb[20].mxu0  ;;  %v4732_v61 = vpop.f32.mrb[20].mxu1 }
 0x176   :  { %v4736_v28 = vpop.f32.mrb[21].mxu0  ;;  %v4738_v11 = vpop.f32.mrb[21].mxu1 }
 0x179   :  { %v4744_v52 = vpop.f32.mrb[22].mxu0  ;;  %v4746_v3 = vpop.f32.mrb[22].mxu1 }
 0x17a   :  { %v4750_v48 = vpop.f32.mrb[23].mxu0  ;;  %v4752_v22 = vpop.f32.mrb[23].mxu1 }
 0x17b   :  { %6159 = vst [vmem:[#allocation2_spill] sm:$0xff] %v4750_v48  ;;  %6160 = vst [vmem:[#allocation3_spill] sm:$0xff] %v4752_v22 }
 0x17d   :  { %v702_v12 = vpop.f32.mrb[24].mxu0  ;;  %v839_v38 = vpop.f32.mrb[24].mxu1 }
 0x17e   :  { %v934_v35 = vmax.f32 %v702_v12, %v839_v38  ;;  %v704_v25 = vpop.f32.mrb[25].mxu0  ;;  %v841_v20 = vpop.f32.mrb[25].mxu1 }
 0x17f   :  { %v935_v50 = vmax.f32 %v704_v25, %v841_v20 }
 0x180   :  { %v958_v22 = vmax.f32 %v910_v5, %v934_v35  ;;  %v6163_v5 = vmax.f32 %v4508_v21, %v4510_v24 }
 0x181   :  { %v959_v38 = vmax.f32 %v6161_v34, %v935_v50  ;;  %v708_v12 = vpop.f32.mrb[26].mxu0  ;;  %v845_v53 = vpop.f32.mrb[26].mxu1 }
 0x182   :  { %v4782_v60 = vadd.f32 %v4769_v4, %v958_v22  ;;  %v936_v48 = vmax.f32 %v708_v12, %v845_v53  ;;  %v710_v44 = vpop.f32.mrb[27].mxu0  ;;  %v847_v20 = vpop.f32.mrb[27].mxu1  ;;  %v6164_v53 = vmax.f32 %v4526_v29, %v4528_v31  ;;  %v6166_v31 = vmax.f32 %v4550_v46, %v4552_v47 }
 0x183   :  { %v4785_v25 = vadd.f32 %v4773_v7, %v959_v38  ;;  %v937_v16 = vmax.f32 %v710_v44, %v847_v20  ;;  %v6168_v46 = vmax.f32 %v4574_v1, %v4576_v30  ;;  %v6170_v1 = vmax.f32 %v4598_v57, %v4600_v58 }
 0x184   :  { %v960_v0 = vmax.f32 %v6162_v62, %v936_v48  ;;  %v6172_v57 = vmax.f32 %v4622_v23, %v4624_v27  ;;  %v6174_v23 = vmax.f32 %v4646_v40, %v4648_v54 }
 0x185   :  { %v4793_v6 = vmax.f32 %v6163_v5, %v937_v16  ;;  %v714_v9 = vpop.f32.mrb[28].mxu0  ;;  %v851_v35 = vpop.f32.mrb[28].mxu1 }
 0x186   :  { %v938_v22 = vmax.f32 %v714_v9, %v851_v35  ;;  %v716_v50 = vpop.f32.mrb[29].mxu0  ;;  %v853_v34 = vpop.f32.mrb[29].mxu1  ;;  %v4796_v12 = vadd.f32 %v4769_v4, %v960_v0 }
 0x187   :  { %v939_v38 = vmax.f32 %v716_v50, %v853_v34  ;;  %v4869_v40 = vadd.f32 %v4773_v7, %v4793_v6 }
 0x188   :  { %v962_v44 = vmax.f32 %v6164_v53, %v938_v22  ;;  %v1020_v15 = vmax.f32 %v4796_v12, 0.0 }
 0x189   :  { %v963_v21 = vmax.f32 %v6165_v18, %v939_v38  ;;  %v720_v24 = vpop.f32.mrb[30].mxu0  ;;  %v857_v48 = vpop.f32.mrb[30].mxu1 }
 0x18a   :  { %v940_v20 = vmax.f32 %v720_v24, %v857_v48  ;;  %v859_v16 = vpop.f32.mrb[31].mxu1  ;;  %1058 = vrot.lane.b32.xlu0 %v1020_v15, %s3507_s2  ;;  %v722_v62 = vpop.f32.mrb[31].mxu0  ;;  %v998_v29 = vadd.f32 %v4769_v4, %v962_v44 }
 0x18b   :  { %v941_v0 = vmax.f32 %v722_v62, %v859_v16 }
 0x18c   :  { %v964_v5 = vmax.f32 %v6166_v31, %v940_v20  ;;  %v4816_v18 = vmax.f32 %v998_v29, 0.0 }
 0x18d   :  { %v965_v36 = vmax.f32 %v6167_v37, %v941_v0  ;;  %v726_v9 = vpop.f32.mrb[32].mxu0  ;;  %v863_v35 = vpop.f32.mrb[32].mxu1 }
 0x18e   :  { %v1000_v22 = vadd.f32 %v4769_v4, %v964_v5  ;;  %v942_v50 = vmax.f32 %v726_v9, %v863_v35  ;;  %v728_v34 = vpop.f32.mrb[33].mxu0  ;;  %v865_v38 = vpop.f32.mrb[33].mxu1 }
 0x18f   :  { %v943_v53 = vmax.f32 %v728_v34, %v865_v38 }
 0x190   :  { %v4818_v24 = vmax.f32 %v1000_v22, 0.0  ;;  %v966_v47 = vmax.f32 %v6168_v46, %v942_v50 }
 0x191   :  { %v4826_v17 = vmax.f32 %v6169_v10, %v943_v53  ;;  %v732_v44 = vpop.f32.mrb[34].mxu0  ;;  %v869_v48 = vpop.f32.mrb[34].mxu1 }
 0x192   :  { %v944_v20 = vmax.f32 %v732_v44, %v869_v48  ;;  %v734_v16 = vpop.f32.mrb[35].mxu0  ;;  %v871_v62 = vpop.f32.mrb[35].mxu1  ;;  %v3390_v0 = vpack.i.bf16 %v4818_v24, %v4816_v18  ;;  %v1002_v31 = vadd.f32 %v4769_v4, %v966_v47 }
 0x193   :  { %v945_v29 = vmax.f32 %v734_v16, %v871_v62 }
 0x194   :  { %v968_v30 = vmax.f32 %v6170_v1, %v944_v20  ;;  %3391 = vrot.lane.b32.xlu1 %v3390_v0, %s3507_s2  ;;  %v4841_v38 = vmax.f32 %v1002_v31, 0.0  ;;  %v999_v31 = vadd.f32 %v4773_v7, %v963_v21  ;;  %v1001_v21 = vadd.f32 %v4773_v7, %v965_v36 }
 0x195   :  { %v4838_v56 = vmax.f32 %v6171_v45, %v945_v29  ;;  %v738_v5 = vpop.f32.mrb[36].mxu0  ;;  %v875_v37 = vpop.f32.mrb[36].mxu1  ;;  %v1021_v36 = vmax.f32 %v4869_v40, 0.0  ;;  %v1403_v40 = vld [vmem:[%s6144_s3 + $0x2b8] sm:$0xff] }
 0x196   :  { %v1004_v9 = vadd.f32 %v4769_v4, %v968_v30  ;;  %v946_v35 = vmax.f32 %v738_v5, %v875_v37  ;;  %v740_v22 = vpop.f32.mrb[37].mxu0  ;;  %v877_v50 = vpop.f32.mrb[37].mxu1 }
 0x197   :  { %v947_v34 = vmax.f32 %v740_v22, %v877_v50 }
 0x198   :  { %v4843_v53 = vmax.f32 %v1004_v9, 0.0  ;;  %v970_v58 = vmax.f32 %v6172_v57, %v946_v35  ;;  %v6177_v35 = vmax.f32 %v4676_v33, %v4678_v42  ;;  %v4882_v57 = vmax.f32 %v999_v31, 0.0 }
 0x199   :  { %v4851_v8 = vmax.f32 %v6173_v63, %v947_v34  ;;  %v744_v46 = vpop.f32.mrb[38].mxu0  ;;  %v881_v47 = vpop.f32.mrb[38].mxu1  ;;  %v6178_v33 = vmax.f32 %v4697_v55, %v4699_v59 }
 0x19a   :  { %v948_v10 = vmax.f32 %v744_v46, %v881_v47  ;;  %v746_v44 = vpop.f32.mrb[39].mxu0  ;;  %v883_v48 = vpop.f32.mrb[39].mxu1  ;;  %v3395_v20 = vpack.i.bf16 %v4843_v53, %v4841_v38  ;;  %v1006_v62 = vadd.f32 %v4769_v4, %v970_v58 }
 0x19b   :  { %v949_v16 = vmax.f32 %v746_v44, %v883_v48  ;;  %v4895_v44 = vmax.f32 %v1001_v21, 0.0  ;;  %v1003_v48 = vadd.f32 %v4773_v7, %v4826_v17 }
 0x19c   :  { %v972_v27 = vmax.f32 %v6174_v23, %v948_v10  ;;  %3396 = vrot.lane.b32.xlu0 %v3395_v20, %s3507_s2  ;;  %v4871_v54 = vmax.f32 %v1006_v62, 0.0 }
 0x19d   :  { %v4863_v39 = vmax.f32 %v6175_v2, %v949_v16  ;;  %v750_v0 = vpop.f32.mrb[40].mxu0  ;;  %v887_v29 = vpop.f32.mrb[40].mxu1  ;;  %v6179_v16 = vmax.f32 %v4712_v26, %v4714_v51 }
 0x19e   :  { %v1008_v1 = vadd.f32 %v4769_v4, %v972_v27  ;;  %v950_v30 = vmax.f32 %v750_v0, %v887_v29  ;;  %v752_v45 = vpop.f32.mrb[41].mxu0  ;;  %v889_v5 = vpop.f32.mrb[41].mxu1  ;;  %v3405_v29 = vpack.i.bf16 %v4882_v57, %v4816_v18 }
 0x19f   :  { %v951_v37 = vmax.f32 %v752_v45, %v889_v5  ;;  %v4920_v5 = vmax.f32 %v1003_v48, 0.0 }
 0x1a0   :  { %v4873_v9 = vmax.f32 %v1008_v1, 0.0  ;;  %v974_v49 = vmax.f32 %v6176_v32, %v950_v30  ;;  %v6180_v30 = vmax.f32 %v4730_v19, %v4732_v61  ;;  %v6181_v32 = vmax.f32 %v4736_v28, %v4738_v11 }
 0x1a1   :  { %v975_v22 = vmax.f32 %v6177_v35, %v951_v37  ;;  %v756_v50 = vpop.f32.mrb[42].mxu0  ;;  %v893_v34 = vpop.f32.mrb[42].mxu1  ;;  %v1005_v61 = vadd.f32 %v4773_v7, %v4838_v56  ;;  %v6182_v56 = vmax.f32 %v4744_v52, %v4746_v3  ;;  %v1007_v52 = vadd.f32 %v4773_v7, %v4851_v8 }
 0x1a2   :  { %v1010_v6 = vadd.f32 %v4769_v4, %v974_v49  ;;  %v952_v58 = vmax.f32 %v756_v50, %v893_v34  ;;  %v758_v63 = vpop.f32.mrb[43].mxu0  ;;  %v895_v46 = vpop.f32.mrb[43].mxu1  ;;  %v3400_v47 = vpack.i.bf16 %v4873_v9, %v4871_v54 }
 0x1a3   :  { %v1011_v13 = vadd.f32 %v4773_v7, %v975_v22  ;;  %v953_v14 = vmax.f32 %v758_v63, %v895_v46  ;;  %v3420_v22 = vpack.i.bf16 %v4895_v44, %v4818_v24 }
 0x1a4   :  { %v4889_v10 = vmax.f32 %v1010_v6, 0.0  ;;  %v976_v42 = vmax.f32 %v6178_v33, %v952_v58  ;;  %3401 = vrot.lane.b32.xlu1 %v3400_v47, %s3507_s2  ;;  %v3415_v58 = vpack.i.bf16 %v4841_v38, %v4818_v24  ;;  %v6184_v33 = vld [vmem:[#allocation3_spill] sm:$0xff] }
 0x1a5   :  { %v4899_v20 = vmax.f32 %v1011_v13, 0.0  ;;  %v977_v62 = vmax.f32 %v6179_v16, %v953_v14  ;;  %v762_v23 = vpop.f32.mrb[44].mxu0  ;;  %v899_v27 = vpop.f32.mrb[44].mxu1  ;;  %v6183_v14 = vld [vmem:[#allocation2_spill] sm:$0xff]  ;;  %v3430_v16 = vpack.i.bf16 %v4920_v5, %v4841_v38 }
 0x1a6   :  { %v1012_v2 = vadd.f32 %v4769_v4, %v976_v42  ;;  %v954_v0 = vmax.f32 %v762_v23, %v899_v27  ;;  %v764_v55 = vpop.f32.mrb[45].mxu0  ;;  %v901_v59 = vpop.f32.mrb[45].mxu1  ;;  %v3410_v17 = vpack.i.bf16 %v1021_v36, %v4889_v10  ;;  %v6185_v42 = vmax.f32 %v6183_v14, %v6184_v33  ;;  %v1392_v14 = vld [vmem:[%s6144_s3 + $0x260] sm:$0xff]  ;;  %v1394_v33 = vld [vmem:[%s6144_s3 + $0x270] sm:$0xff] }
 0x1a7   :  { %v1013_v31 = vadd.f32 %v4773_v7, %v977_v62  ;;  %v955_v1 = vmax.f32 %v764_v55, %v901_v59  ;;  %v3470_v51 = vpack.i.bf16 %v4899_v20, %v4889_v10  ;;  %v3425_v62 = vpack.i.bf16 %v4895_v44, %v4882_v57 }
 0x1a8   :  { %v4913_v26 = vmax.f32 %v1012_v2, 0.0  ;;  %v978_v45 = vmax.f32 %v6180_v30, %v954_v0  ;;  %3406 = vrot.lane.b32.xlu1 %v3405_v29, %s3508_s0  ;;  %3411 = vrot.lane.b32.xlu0 %v3410_v17, %s3507_s2  ;;  %v4955_v23 = vmax.f32 %v1005_v61, 0.0  ;;  %v4965_v55 = vmax.f32 %v1007_v52, 0.0 }
 0x1a9   :  { %v4922_v37 = vmax.f32 %v1013_v31, 0.0  ;;  %v979_v49 = vmax.f32 %v6181_v32, %v955_v1  ;;  %v768_v21 = vpop.f32.mrb[46].mxu0  ;;  %v905_v35 = vpop.f32.mrb[46].mxu1  ;;  %v1009_v59 = vadd.f32 %v4773_v7, %v4863_v39  ;;  %v3435_v29 = vpack.i.bf16 %v4871_v54, %v4843_v53 }
 0x1aa   :  { %v4932_v19 = vadd.f32 %v4769_v4, %v978_v45  ;;  %v956_v50 = vmax.f32 %v768_v21, %v905_v35  ;;  %v770_v34 = vpop.f32.mrb[47].mxu0  ;;  %v907_v6 = vpop.f32.mrb[47].mxu1  ;;  %v3440_v8 = vpack.i.bf16 %v4955_v23, %v4843_v53  ;;  %v3450_v17 = vpack.i.bf16 %v4965_v55, %v4871_v54  ;;  %v1380_v21 = vld [vmem:[%s6144_s3 + $0x200] sm:$0xff] }
 0x1ab   :  { %v4937_v28 = vadd.f32 %v4773_v7, %v979_v49  ;;  %v957_v11 = vmax.f32 %v770_v34, %v907_v6  ;;  %v3475_v63 = vpack.i.bf16 %v4922_v37, %v4913_v26  ;;  %v3445_v31 = vpack.i.bf16 %v4955_v23, %v4920_v5  ;;  %v1384_v34 = vld [vmem:[%s6144_s3 + $0x220] sm:$0xff]  ;;  %v1386_v6 = vld [vmem:[%s6144_s3 + $0x230] sm:$0xff] }
 0x1ac   :  { %v1038_v46 = vmax.f32 %v4932_v19, 0.0  ;;  %v980_v47 = vmax.f32 %v6182_v56, %v956_v50  ;;  %3421 = vrot.lane.b32.xlu1 %v3420_v22, %s3508_s0  ;;  %3416 = vrot.lane.b32.xlu0 %v3415_v58, %s3509_s15  ;;  %v3465_v1 = vpack.i.bf16 %v4889_v10, %v4873_v9  ;;  %v3480_v30 = vpack.i.bf16 %v4920_v5, %v4895_v44  ;;  %v1395_v56 = vld [vmem:[%s6144_s3 + $0x278] sm:$0xff] }
 0x1ad   :  { %v1039_v13 = vmax.f32 %v4937_v28, 0.0  ;;  %v981_v48 = vmax.f32 %v6185_v42, %v957_v11  ;;  %v1018_v61 = vmax.f32 %v4782_v60, 0.0  ;;  %v1391_v60 = vld [vmem:[%s6144_s3 + $0x258] sm:$0xff]  ;;  %v3057_v58 = vpack.c.bf16 %v1386_v6, %v1384_v34  ;;  %v1388_v11 = vld [vmem:[%s6144_s3 + $0x240] sm:$0xff]  ;;  %v2673_v6 = vld [vmem:[%s6146_s5 + $0xf0] sm:$0xff] }
 0x1ae   :  { %v3485_v3 = vpack.i.bf16 %v1038_v46, %v4913_v26  ;;  %v1016_v27 = vadd.f32 %v4769_v4, %v980_v47  ;;  %v4975_v4 = vmax.f32 %v1009_v59, 0.0  ;;  %v1398_v59 = vld [vmem:[%s6144_s3 + $0x290] sm:$0xff]  ;;  %v2671_v34 = vld [vmem:[%s6146_s5 + $0xe0] sm:$0xff] }
 0x1af   :  { %v3500_v2 = vpack.i.bf16 %v1039_v13, %v4922_v37  ;;  %v1017_v0 = vadd.f32 %v4773_v7, %v981_v48  ;;  %v1397_v48 = vld [vmem:[%s6144_s3 + $0x288] sm:$0xff] }
 0x1b0   :  { %3431 = vrot.lane.b32.xlu1 %v3430_v16, %s3508_s0  ;;  %3426 = vrot.lane.b32.xlu0 %v3425_v62, %s3507_s2  ;;  %v3455_v7 = vpack.i.bf16 %v4975_v4, %v4873_v9  ;;  %v3460_v39 = vpack.i.bf16 %v4975_v4, %v4965_v55  ;;  %v3495_v45 = vpack.i.bf16 %v4899_v20, %v4975_v4  ;;  %v1040_v32 = vmax.f32 %v1016_v27, 0.0  ;;  %v1399_v16 = vld [vmem:[%s6144_s3 + $0x298] sm:$0xff] }
 0x1b1   :  { %v1041_v49 = vmax.f32 %v1017_v0, 0.0  ;;  %v1396_v0 = vld [vmem:[%s6144_s3 + $0x280] sm:$0xff] }
 0x1b4   :  { %3441 = vrot.lane.b32.xlu1 %v3440_v8, %s3508_s0  ;;  %3436 = vrot.lane.b32.xlu0 %v3435_v29, %s3509_s15  ;;  %v1401_v8 = vld [vmem:[%s6144_s3 + $0x2a8] sm:$0xff]  ;;  %v3069_v29 = vpack.c.bf16 %v1398_v59, %v1396_v0 }
 0x1b8   :  { %3451 = vrot.lane.b32.xlu1 %v3450_v17, %s3508_s0  ;;  %3446 = vrot.lane.b32.xlu0 %v3445_v31, %s3507_s2  ;;  %v3071_v17 = vpack.c.bf16 %v1403_v40, %v1401_v8  ;;  %v1400_v31 = vld [vmem:[%s6144_s3 + $0x2a0] sm:$0xff]  ;;  %v1414_v8 = vld [vmem:[%s6144_s3 + $0x310] sm:$0xff] }
 0x1b9   :  { %v1417_v40 = vld [vmem:[%s6144_s3 + $0x328] sm:$0xff] }
 0x1bc   :  { %3456 = vrot.lane.b32.xlu1 %v3455_v7, %s3508_s0  ;;  %3461 = vrot.lane.b32.xlu0 %v3460_v39, %s3507_s2  ;;  %v1402_v7 = vld [vmem:[%s6144_s3 + $0x2b0] sm:$0xff] }
 0x1c0   :  { %3466 = vrot.lane.b32.xlu0 %v3465_v1, %s3509_s15  ;;  %3471 = vrot.lane.b32.xlu1 %v3470_v51, %s3508_s0  ;;  %v3490_v51 = vpack.i.bf16 %v4965_v55, %v4955_v23 }
 0x1c4   :  { %1088 = vrot.lane.b32.xlu0 %v4899_v20, %s3507_s2  ;;  %3476 = vrot.lane.b32.xlu1 %v3475_v63, %s3508_s0  ;;  %v1390_v63 = vld [vmem:[%s6144_s3 + $0x250] sm:$0xff] }
 0x1c5   :  { %v3061_v47 = vpack.c.bf16 %v1390_v63, %v1388_v11  ;;  %v1413_v63 = vld [vmem:[%s6144_s3 + $0x308] sm:$0xff] }
 0x1c8   :  { %3481 = vrot.lane.b32.xlu1 %v3480_v30, %s3509_s15  ;;  %3486 = vrot.lane.b32.xlu0 %v3485_v3, %s3509_s15  ;;  %v3065_v3 = vpack.c.bf16 %v1394_v33, %v1392_v14  ;;  %v1404_v30 = vld [vmem:[%s6144_s3 + $0x2c0] sm:$0xff]  ;;  %v2677_v33 = vld [vmem:[%s6146_s5 + $0x110] sm:$0xff] }
 0x1c9   :  { %v2675_v14 = vld [vmem:[%s6146_s5 + $0x100] sm:$0xff] }
 0x1cc   :  { %1237 = vrot.lane.b32.xlu1 %v4920_v5, %s3510_s16  ;;  %1235 = vrot.lane.b32.xlu0 %v4841_v38, %s3510_s16 }
 0x1d0   :  { %1241 = vrot.lane.b32.xlu1 %v4955_v23, %s3510_s16  ;;  %1239 = vrot.lane.b32.xlu0 %v4843_v53, %s3510_s16 }
 0x1d4   :  { %1243 = vrot.lane.b32.xlu1 %v4871_v54, %s3510_s16  ;;  %3491 = vrot.lane.b32.xlu0 %v3490_v51, %s3509_s15  ;;  %v1406_v51 = vld [vmem:[%s6144_s3 + $0x2d0] sm:$0xff] }
 0x1d8   :  { %1247 = vrot.lane.b32.xlu1 %v4873_v9, %s3510_s16  ;;  %1245 = vrot.lane.b32.xlu0 %v4965_v55, %s3510_s16 }
 0x1dc   :  { %3496 = vrot.lane.b32.xlu1 %v3495_v45, %s3509_s15  ;;  %1249 = vrot.lane.b32.xlu0 %v4975_v4, %s3510_s16  ;;  %v3073_v45 = vpack.c.bf16 %v1402_v7, %v1400_v31  ;;  %v2679_v7 = vld [vmem:[%s6146_s5 + $0x120] sm:$0xff] }
 0x1e0   :  { %1253 = vrot.lane.b32.xlu1 %v4899_v20, %s3510_s16  ;;  %1251 = vrot.lane.b32.xlu0 %v4889_v10, %s3510_s16  ;;  %v1382_v10 = vld [vmem:[%s6144_s3 + $0x210] sm:$0xff]  ;;  %v1385_v20 = vld [vmem:[%s6144_s3 + $0x228] sm:$0xff] }
 0x1e1   :  { %v3053_v22 = vpack.c.bf16 %v1382_v10, %v1380_v21  ;;  %v2667_v21 = vld [vmem:[%s6146_s5 + $0xc0] sm:$0xff] }
 0x1e4   :  { %1257 = vrot.lane.b32.xlu1 %v4922_v37, %s3510_s16  ;;  %1255 = vrot.lane.b32.xlu0 %v4913_v26, %s3510_s16  ;;  %v1387_v26 = vld [vmem:[%s6144_s3 + $0x238] sm:$0xff]  ;;  %v1019_v37 = vmax.f32 %v4785_v25, 0.0  ;;  %v1389_v25 = vld [vmem:[%s6144_s3 + $0x248] sm:$0xff] }
 0x1e5   :  { %v3055_v50 = vpack.c.bf16 %v1387_v26, %v1385_v20  ;;  %v3059_v28 = vpack.c.bf16 %v1391_v60, %v1389_v25  ;;  %v2676_v60 = vld [vmem:[%s6146_s5 + $0x108] sm:$0xff] }
 0x1e8   :  { %1259 = vrot.lane.b32.xlu1 %v1038_v46, %s3510_s16  ;;  %3501 = vrot.lane.b32.xlu0 %v3500_v2, %s3509_s15  ;;  %v1393_v46 = vld [vmem:[%s6144_s3 + $0x268] sm:$0xff]  ;;  %v3067_v2 = vpack.c.bf16 %v1399_v16, %v1397_v48 }
 0x1ec   :  { %1261 = vrot.lane.b32.xlu0 %v1039_v13, %s3510_s16  ;;  %1263 = vrot.lane.b32.xlu1 %v1040_v32, %s3510_s16  ;;  %v3063_v13 = vpack.c.bf16 %v1395_v56, %v1393_v46  ;;  %v1409_v32 = vld [vmem:[%s6144_s3 + $0x2e8] sm:$0xff]  ;;  %v3173_v46 = vpack.c.bf16 %v2673_v6, %v2671_v34 }
 0x1ed   :  { %v1425_v6 = vld [vmem:[%s6144_s3 + $0x368] sm:$0xff] }
 0x1f0   :  { %1265 = vrot.lane.b32.xlu0 %v1041_v49, %s3510_s16  ;;  %v2668_v49 = vld [vmem:[%s6146_s5 + $0xc8] sm:$0xff] }
 0x1fc   :  { %v5032_v35 = vpop.permute.xlu0 %1058 }
 0x1fd   :  { %v1284_v19 = vsel %vm1090_vm3, %v1019_v37, %v5032_v35  ;;  %v2669_v37 = vld [vmem:[%s6146_s5 + $0xd0] sm:$0xff] }
 0x1fe   :  { %1577 = vmatprep.mubr.f32.mxu0 %v1284_v19  ;;  %v3169_v19 = vpack.c.bf16 %v2669_v37, %v2667_v21  ;;  %v1423_v37 = vld [vmem:[%s6144_s3 + $0x358] sm:$0xff] }
 0x1ff   :  { %1578 = vmatmul.mubr.f32.vlgmr.msra.gmra.mrb[48].mxu0 %v1018_v61  ;;  %v2674_v61 = vld [vmem:[%s6146_s5 + $0xf8] sm:$0xff] }
 0x200   :  { %3054 = vmatpush1.bf16.msra.mxu0 %v3053_v22  ;;  %v2672_v22 = vld [vmem:[%s6146_s5 + $0xe8] sm:$0xff] }
 0x201   :  { %3056 = vmatprep.subr.bf16.mxu0 %v3055_v50  ;;  %v3171_v50 = vpack.c.bf16 %v2674_v61, %v2672_v22 }
 0x204   :  { %3058 = vmatpush1.bf16.msra.mxu0 %v3057_v58  ;;  %v2678_v58 = vld [vmem:[%s6146_s5 + $0x118] sm:$0xff] }
 0x205   :  { %3060 = vmatprep.subr.bf16.mxu0 %v3059_v28  ;;  %v3077_v28 = vpack.c.bf16 %v1406_v51, %v1404_v30 }
 0x206   :  { %v5067_v42 = vpop.permute.xlu1 %3391 }
 0x207   :  { %v3394_v62 = vunpack.i.h.bf16 %v5067_v42  ;;  %v3393_v52 = vunpack.i.l.bf16 %v5067_v42 }
 0x208   :  { %3062 = vmatpush1.bf16.msra.mxu0 %v3061_v47  ;;  %v1415_v47 = vld [vmem:[%s6144_s3 + $0x318] sm:$0xff] }
 0x209   :  { %v1285_v27 = vsel %vm1090_vm3, %v1021_v36, %v3393_v52  ;;  %3064 = vmatprep.subr.bf16.mxu0 %v3063_v13  ;;  %v1286_v36 = vsel %vm1090_vm3, %v4882_v57, %v3394_v62  ;;  %v1407_v57 = vld [vmem:[%s6144_s3 + $0x2d8] sm:$0xff]  ;;  %v3175_v13 = vpack.c.bf16 %v2678_v58, %v2676_v60  ;;  %v3083_v59 = vpack.c.bf16 %v1415_v47, %v1413_v63 }
 0x20a   :  { %1583 = vmatprep.mubr.f32.mxu0 %v1285_v27  ;;  %v2682_v27 = vld [vmem:[%s6146_s5 + $0x138] sm:$0xff] }
 0x20b   :  { %1584 = vmatmul.mubr.f32.gmra.mrb[50].mxu0 %v1020_v15  ;;  %v1405_v15 = vld [vmem:[%s6144_s3 + $0x2c8] sm:$0xff]  ;;  %v1431_v63 = vld [vmem:[%s6144_s3 + $0x398] sm:$0xff] }
 0x20c   :  { %3066 = vmatpush1.bf16.msra.mxu0 %v3065_v3  ;;  %1589 = vmatprep.mubr.f32.mxu0 %v1286_v36  ;;  %v3075_v20 = vpack.c.bf16 %v1407_v57, %v1405_v15  ;;  %v2680_v3 = vld [vmem:[%s6146_s5 + $0x128] sm:$0xff]  ;;  %v3177_v36 = vpack.c.bf16 %v2677_v33, %v2675_v14  ;;  %v2681_v15 = vld [vmem:[%s6146_s5 + $0x130] sm:$0xff]  ;;  %v1428_v14 = vld [vmem:[%s6144_s3 + $0x380] sm:$0xff] }
 0x20d   :  { %3068 = vmatprep.subr.bf16.mxu0 %v3067_v2  ;;  %v3179_v31 = vpack.c.bf16 %v2682_v27, %v2680_v3  ;;  %v3181_v21 = vpack.c.bf16 %v2681_v15, %v2679_v7  ;;  %v1430_v33 = vld [vmem:[%s6144_s3 + $0x390] sm:$0xff]  ;;  %v1433_v27 = vld [vmem:[%s6144_s3 + $0x3a8] sm:$0xff] }
 0x20e   :  { %v5106_v12 = vpop.permute.xlu0 %3396 }
 0x20f   :  { %v3399_v39 = vunpack.i.h.bf16 %v5106_v12  ;;  %v3398_v1 = vunpack.i.l.bf16 %v5106_v12  ;;  %1590 = vmatmul.mubr.f32.gmra.mrb[52].mxu0 %v4816_v18  ;;  %v2670_v18 = vld [vmem:[%s6146_s5 + $0xd8] sm:$0xff] }
 0x210   :  { %3070 = vmatpush1.bf16.msra.mxu0 %v3069_v29  ;;  %v3167_v26 = vpack.c.bf16 %v2670_v18, %v2668_v49  ;;  %v1416_v18 = vld [vmem:[%s6144_s3 + $0x320] sm:$0xff] }
 0x211   :  { %v1287_v10 = vsel %vm1090_vm3, %v4895_v44, %v3398_v1  ;;  %3072 = vmatprep.subr.bf16.mxu0 %v3071_v17  ;;  %v1411_v44 = vld [vmem:[%s6144_s3 + $0x2f8] sm:$0xff]  ;;  %v1288_v25 = vsel %vm1090_vm3, %v4920_v5, %v3399_v39  ;;  %v1410_v5 = vld [vmem:[%s6144_s3 + $0x2f0] sm:$0xff] }
 0x212   :  { %1595 = vmatprep.mubr.f32.mxu0 %v1287_v10  ;;  %3168 = vmatprep.subr.bf16.mxu1 %v3167_v26  ;;  %v3079_v11 = vpack.c.bf16 %v1411_v44, %v1409_v32  ;;  %v1421_v26 = vld [vmem:[%s6144_s3 + $0x348] sm:$0xff] }
 0x213   :  { %1596 = vmatmul.mubr.f32.gmra.mrb[54].mxu0 %v4818_v24  ;;  %v1408_v24 = vld [vmem:[%s6144_s3 + $0x2e0] sm:$0xff]  ;;  %3170 = vmatpush1.bf16.msra.mxu1 %v3169_v19  ;;  %v3091_v19 = vpack.c.bf16 %v1423_v37, %v1421_v26  ;;  %v1442_v37 = vld [vmem:[%s6144_s3 + $0x3f0] sm:$0xff] }
 0x214   :  { %3074 = vmatpush1.bf16.msra.mxu0 %v3073_v45  ;;  %1601 = vmatprep.mubr.f32.mxu0 %v1288_v25  ;;  %v3081_v2 = vpack.c.bf16 %v1410_v5, %v1408_v24  ;;  %v1427_v25 = vld [vmem:[%s6144_s3 + $0x378] sm:$0xff]  ;;  %v1426_v24 = vld [vmem:[%s6144_s3 + $0x370] sm:$0xff]  ;;  %v1440_v26 = vld [vmem:[%s6144_s3 + $0x3e0] sm:$0xff] }
 0x215   :  { %3076 = vmatprep.subr.bf16.mxu0 %v3075_v20  ;;  %3172 = vmatprep.subr.bf16.mxu1 %v3171_v50  ;;  %v1420_v50 = vld [vmem:[%s6144_s3 + $0x340] sm:$0xff] }
 0x216   :  { %v5177_v56 = vpop.permute.xlu1 %3401 }
 0x217   :  { %v3404_v48 = vunpack.i.h.bf16 %v5177_v56  ;;  %v3403_v16 = vunpack.i.l.bf16 %v5177_v56  ;;  %1602 = vmatmul.mubr.f32.gmra.mrb[56].mxu0 %v4841_v38  ;;  %v1412_v38 = vld [vmem:[%s6144_s3 + $0x300] sm:$0xff]  ;;  %3174 = vmatpush1.bf16.msra.mxu1 %v3173_v46  ;;  %v1479_v56 = vld [vmem:[%s6144_s3 + $0x518] sm:$0xff] }
 0x218   :  { %3078 = vmatpush1.bf16.msra.mxu0 %v3077_v28  ;;  %3176 = vmatprep.subr.bf16.mxu1 %v3175_v13  ;;  %v3085_v45 = vpack.c.bf16 %v1414_v8, %v1412_v38  ;;  %v3095_v28 = vpack.c.bf16 %v1427_v25, %v1425_v6  ;;  %v1432_v38 = vld [vmem:[%s6144_s3 + $0x3a0] sm:$0xff]  ;;  %v1434_v8 = vld [vmem:[%s6144_s3 + $0x3b0] sm:$0xff] }
 0x219   :  { %3080 = vmatprep.subr.bf16.mxu0 %v3079_v11  ;;  %v1289_v0 = vsel %vm1090_vm3, %v4955_v23, %v3403_v16  ;;  %v1419_v23 = vld [vmem:[%s6144_s3 + $0x338] sm:$0xff]  ;;  %v1290_v51 = vsel %vm1090_vm3, %v4965_v55, %v3404_v48  ;;  %v1424_v11 = vld [vmem:[%s6144_s3 + $0x360] sm:$0xff]  ;;  %v3105_v7 = vpack.c.bf16 %v1434_v8, %v1432_v38 }
 0x21a   :  { %v5210_v29 = vpop.permute.xlu1 %3406  ;;  %1607 = vmatprep.mubr.f32.mxu0 %v1289_v0  ;;  %v5212_v17 = vpop.permute.xlu0 %3411  ;;  %v3087_v49 = vpack.c.bf16 %v1419_v23, %v1417_v40  ;;  %v3097_v47 = vpack.c.bf16 %v1426_v24, %v1424_v11  ;;  %v3101_v0 = vpack.c.bf16 %v1430_v33, %v1428_v14  ;;  %v1437_v23 = vld [vmem:[%s6144_s3 + $0x3c8] sm:$0xff]  ;;  %v1444_v25 = vld [vmem:[%s6144_s3 + $0x400] sm:$0xff]  ;;  %v1451_v11 = vld [vmem:[%s6144_s3 + $0x438] sm:$0xff] }
 0x21b   :  { %v3414_v57 = vunpack.i.h.bf16 %v5212_v17  ;;  %v3413_v30 = vunpack.i.l.bf16 %v5212_v17  ;;  %1608 = vmatmul.mubr.f32.gmra.mrb[58].mxu0 %v4843_v53  ;;  %v1418_v53 = vld [vmem:[%s6144_s3 + $0x330] sm:$0xff]  ;;  %3178 = vmatpush1.bf16.msra.mxu1 %v3177_v36  ;;  %v3409_v55 = vunpack.i.h.bf16 %v5210_v29  ;;  %v3408_v10 = vunpack.i.l.bf16 %v5210_v29  ;;  %v1455_v8 = vld [vmem:[%s6144_s3 + $0x458] sm:$0xff]  ;;  %v1476_v17 = vld [vmem:[%s6144_s3 + $0x500] sm:$0xff] }
 0x21c   :  { %3082 = vmatpush1.bf16.msra.mxu0 %v3081_v2  ;;  %1613 = vmatprep.mubr.f32.mxu0 %v1290_v51  ;;  %v3089_v44 = vpack.c.bf16 %v1418_v53, %v1416_v18  ;;  %v1435_v2 = vld [vmem:[%s6144_s3 + $0x3b8] sm:$0xff]  ;;  %v1438_v51 = vld [vmem:[%s6144_s3 + $0x3d0] sm:$0xff] }
 0x21d   :  { %v5232_v32 = vsel %vm1090_vm3, %v5032_v35, %v3414_v57  ;;  %3084 = vmatprep.subr.bf16.mxu0 %v3083_v59  ;;  %3180 = vmatprep.subr.bf16.mxu1 %v3179_v31  ;;  %v1291_v61 = vsel %vm1090_vm3, %v4975_v4, %v3413_v30  ;;  %v1150_v4 = vsel %vm1149_vm4, %v3408_v10, %v3409_v55  ;;  %v1439_v31 = vld [vmem:[%s6144_s3 + $0x3d8] sm:$0xff]  ;;  %v1436_v57 = vld [vmem:[%s6144_s3 + $0x3c0] sm:$0xff] }
 0x21e   :  { %v5242_v20 = vpop.permute.xlu1 %3421  ;;  %v5244_v35 = vpop.permute.xlu0 %3416  ;;  %v3103_v59 = vpack.c.bf16 %v1435_v2, %v1433_v27  ;;  %v3107_v15 = vpack.c.bf16 %v1439_v31, %v1437_v23  ;;  %v1443_v18 = vld [vmem:[%s6144_s3 + $0x3f8] sm:$0xff]  ;;  %v1448_v27 = vld [vmem:[%s6144_s3 + $0x420] sm:$0xff]  ;;  %v1450_v2 = vld [vmem:[%s6144_s3 + $0x430] sm:$0xff]  ;;  %v1292_v38 = vsel %vm1149_vm4, %v5232_v32, %v3408_v10 }
 0x21f   :  { %v3418_v22 = vunpack.i.l.bf16 %v5244_v35  ;;  %1614 = vmatmul.mubr.f32.gmra.mrb[60].mxu0 %v4871_v54  ;;  %v1422_v54 = vld [vmem:[%s6144_s3 + $0x350] sm:$0xff]  ;;  %3182 = vmatpush1.bf16.msra.mxu1 %v3181_v21  ;;  %v3109_v21 = vpack.c.bf16 %v1438_v51, %v1436_v57  ;;  %v3419_v24 = vunpack.i.h.bf16 %v5244_v35  ;;  %v1452_v57 = vld [vmem:[%s6144_s3 + $0x440] sm:$0xff] }
 0x220   :  { %3086 = vmatpush1.bf16.msra.mxu0 %v3085_v45  ;;  %1619 = vmatprep.mubr.f32.mxu0 %v1291_v61  ;;  %v3093_v58 = vpack.c.bf16 %v1422_v54, %v1420_v50  ;;  %v3424_v50 = vunpack.i.h.bf16 %v5242_v20  ;;  %v3423_v54 = vunpack.i.l.bf16 %v5242_v20  ;;  %v1449_v20 = vld [vmem:[%s6144_s3 + $0x428] sm:$0xff]  ;;  %v1454_v51 = vld [vmem:[%s6144_s3 + $0x450] sm:$0xff] }
 0x221   :  { %3088 = vmatprep.subr.bf16.mxu0 %v3087_v49  ;;  %v1300_v60 = vsel %vm1208_vm5, %v1150_v4, %v3418_v22  ;;  %v1441_v49 = vld [vmem:[%s6144_s3 + $0x3e8] sm:$0xff]  ;;  %v3113_v4 = vpack.c.bf16 %v1442_v37, %v1440_v26  ;;  %v3119_v33 = vpack.c.bf16 %v1451_v11, %v1449_v20  ;;  %v1463_v20 = vld [vmem:[%s6144_s3 + $0x498] sm:$0xff] }
 0x222   :  { %v5264_v34 = vpop.permute.xlu1 %3431  ;;  %v5293_v46 = vpop.permute.xlu0 %3426  ;;  %v3111_v55 = vpack.c.bf16 %v1443_v18, %v1441_v49  ;;  %v1459_v18 = vld [vmem:[%s6144_s3 + $0x478] sm:$0xff] }
 0x223   :  { %1620 = vmatmul.mubr.f32.gmra.mrb[62].mxu0 %v4873_v9  ;;  %v1429_v9 = vld [vmem:[%s6144_s3 + $0x388] sm:$0xff]  ;;  %v3429_v23 = vunpack.i.h.bf16 %v5293_v46 }
 0x224   :  { %3090 = vmatpush1.bf16.msra.mxu0 %v3089_v44  ;;  %1690 = vmatprep.mubr.f32.mxu0 %v1300_v60  ;;  %v3099_v13 = vpack.c.bf16 %v1431_v63, %v1429_v9  ;;  %v1445_v44 = vld [vmem:[%s6144_s3 + $0x408] sm:$0xff]  ;;  %v1446_v60 = vld [vmem:[%s6144_s3 + $0x410] sm:$0xff]  ;;  %v3428_v9 = vunpack.i.l.bf16 %v5293_v46  ;;  %v3121_v46 = vpack.c.bf16 %v1450_v2, %v1448_v27 }
 0x225   :  { %3092 = vmatprep.subr.bf16.mxu0 %v3091_v19  ;;  %v1447_v19 = vld [vmem:[%s6144_s3 + $0x418] sm:$0xff]  ;;  %v1093_v37 = vsel %vm1090_vm3, %v3394_v62, %v3429_v23 }
 0x226   :  { %v5285_v5 = vpop.permute.xlu1 %3441  ;;  %v5315_v40 = vpop.permute.xlu0 %3436  ;;  %v3115_v6 = vpack.c.bf16 %v1447_v19, %v1445_v44  ;;  %v1092_v32 = vsel %vm1090_vm3, %v3393_v52, %v3428_v9  ;;  %v3125_v19 = vpack.c.bf16 %v1454_v51, %v1452_v57  ;;  %v1469_v51 = vld [vmem:[%s6144_s3 + $0x4c8] sm:$0xff] }
 0x227   :  { %v3438_v31 = vunpack.i.l.bf16 %v5315_v40  ;;  %v3444_v10 = vunpack.i.h.bf16 %v5285_v5  ;;  %v1293_v52 = vsel %vm1149_vm4, %v1092_v32, %v3423_v54 }
 0x228   :  { %3094 = vmatpush1.bf16.msra.mxu0 %v3093_v58 }
 0x229   :  { %3096 = vmatprep.subr.bf16.mxu0 %v3095_v28 }
 0x22a   :  { %v5301_v3 = vpop.permute.xlu1 %3451  ;;  %v5339_v53 = vpop.permute.xlu0 %3446 }
 0x22b   :  { %v3453_v42 = vunpack.i.l.bf16 %v5301_v3  ;;  %v3449_v11 = vunpack.i.h.bf16 %v5339_v53 }
 0x22c   :  { %3098 = vmatpush1.bf16.msra.mxu0 %v3097_v47  ;;  %v1151_v47 = vsel %vm1149_vm4, %v3423_v54, %v3424_v50  ;;  %v1456_v54 = vld [vmem:[%s6144_s3 + $0x460] sm:$0xff] }
 0x22d   :  { %3100 = vmatprep.subr.bf16.mxu0 %v3099_v13  ;;  %v3117_v13 = vpack.c.bf16 %v1446_v60, %v1444_v25  ;;  %v1301_v29 = vsel %vm1208_vm5, %v1151_v47, %v3419_v24  ;;  %v1461_v60 = vld [vmem:[%s6144_s3 + $0x488] sm:$0xff]  ;;  %v1095_v23 = vsel %vm1090_vm3, %v3399_v39, %v3449_v11  ;;  %v1472_v11 = vld [vmem:[%s6144_s3 + $0x4e0] sm:$0xff] }
 0x22e   :  { %v5317_v36 = vpop.permute.xlu1 %3456  ;;  %v5363_v58 = vpop.permute.xlu0 %3461  ;;  %v1296_v39 = vsel %vm1149_vm4, %v1095_v23, %v3453_v42  ;;  %v1480_v23 = vld [vmem:[%s6144_s3 + $0x520] sm:$0xff] }
 0x22f   :  { %v3459_v27 = vunpack.i.h.bf16 %v5317_v36  ;;  %v3458_v2 = vunpack.i.l.bf16 %v5317_v36 }
 0x230   :  { %3102 = vmatpush1.bf16.msra.mxu0 %v3101_v0  ;;  %v3434_v0 = vunpack.i.h.bf16 %v5264_v34 }
 0x231   :  { %3104 = vmatprep.subr.bf16.mxu0 %v3103_v59  ;;  %v3433_v59 = vunpack.i.l.bf16 %v5264_v34  ;;  %v3443_v34 = vunpack.i.l.bf16 %v5285_v5  ;;  %v1457_v5 = vld [vmem:[%s6144_s3 + $0x468] sm:$0xff]  ;;  %v1155_v57 = vsel %vm1149_vm4, %v3458_v2, %v3459_v27 }
 0x232   :  { %v5331_v45 = vpop.permute.xlu1 %3471  ;;  %v3127_v50 = vpack.c.bf16 %v1459_v18, %v1457_v5 }
 0x233   :  { %v1152_v49 = vsel %vm1149_vm4, %v3433_v59, %v3434_v0  ;;  %v1153_v44 = vsel %vm1149_vm4, %v3443_v34, %v3444_v10  ;;  %v1294_v25 = vsel %vm1149_vm4, %v1093_v37, %v3433_v59  ;;  %v1465_v59 = vld [vmem:[%s6144_s3 + $0x4a8] sm:$0xff]  ;;  %v3473_v12 = vunpack.i.l.bf16 %v5331_v45  ;;  %v1468_v37 = vld [vmem:[%s6144_s3 + $0x4c0] sm:$0xff] }
 0x234   :  { %3106 = vmatpush1.bf16.msra.mxu0 %v3105_v7  ;;  %v5410_v7 = vpop.permute.xlu0 %3466  ;;  %v1302_v26 = vsel %vm1208_vm5, %v1152_v49, %v3438_v31 }
 0x235   :  { %3108 = vmatprep.subr.bf16.mxu0 %v3107_v15  ;;  %v3468_v9 = vunpack.i.l.bf16 %v5410_v7 }
 0x236   :  { %v5347_v61 = vpop.permute.xlu1 %3476 }
 0x238   :  { %3110 = vmatpush1.bf16.msra.mxu0 %v3109_v21  ;;  %v3439_v21 = vunpack.i.h.bf16 %v5315_v40  ;;  %v5443_v62 = vpop.permute.xlu0 %1088 }
 0x239   :  { %3112 = vmatprep.subr.bf16.mxu0 %v3111_v55  ;;  %v3448_v55 = vunpack.i.l.bf16 %v5339_v53  ;;  %v1460_v53 = vld [vmem:[%s6144_s3 + $0x480] sm:$0xff] }
 0x23a   :  { %v5365_v28 = vpop.permute.xlu1 %3481 }
 0x23b   :  { %v3483_v63 = vunpack.i.l.bf16 %v5365_v28 }
 0x23c   :  { %3114 = vmatpush1.bf16.msra.mxu0 %v3113_v4  ;;  %v1458_v4 = vld [vmem:[%s6144_s3 + $0x470] sm:$0xff] }
 0x23d   :  { %3116 = vmatprep.subr.bf16.mxu0 %v3115_v6  ;;  %v5380_v14 = vsel %vm1208_vm5, %v3418_v22, %v3483_v63  ;;  %v1453_v22 = vld [vmem:[%s6144_s3 + $0x448] sm:$0xff]  ;;  %v3454_v6 = vunpack.i.h.bf16 %v5301_v3  ;;  %v1303_v3 = vsel %vm1208_vm5, %v1153_v44, %v3439_v21  ;;  %v1094_v63 = vsel %vm1090_vm3, %v3398_v1, %v3448_v55  ;;  %v1470_v44 = vld [vmem:[%s6144_s3 + $0x4d0] sm:$0xff] }
 0x23e   :  { %v3123_v15 = vpack.c.bf16 %v1455_v8, %v1453_v22  ;;  %v3129_v47 = vpack.c.bf16 %v1458_v4, %v1456_v54  ;;  %v1295_v0 = vsel %vm1149_vm4, %v1094_v63, %v3443_v34  ;;  %v3463_v22 = vunpack.i.l.bf16 %v5363_v58  ;;  %v1464_v34 = vld [vmem:[%s6144_s3 + $0x4a0] sm:$0xff]  ;;  %v1473_v4 = vld [vmem:[%s6144_s3 + $0x4e8] sm:$0xff] }
 0x23f   :  { %1691 = vmatmul.mubr.f32.vlgmr.msra.gmra.mrb[48].mxu0 %v1292_v38  ;;  %v1154_v1 = vsel %vm1149_vm4, %v3453_v42, %v3454_v6  ;;  %v1467_v38 = vld [vmem:[%s6144_s3 + $0x4b8] sm:$0xff]  ;;  %v3469_v8 = vunpack.i.h.bf16 %v5410_v7  ;;  %v3464_v55 = vunpack.i.h.bf16 %v5363_v58 }
 0x240   :  { %1696 = vmatprep.mubr.f32.mxu0 %v1301_v29  ;;  %3118 = vmatpush1.bf16.msra.mxu0 %v3117_v13  ;;  %v3131_v13 = vpack.c.bf16 %v1463_v20, %v1461_v60  ;;  %v1304_v36 = vsel %vm1208_vm5, %v1154_v1, %v3468_v9  ;;  %v5484_v29 = vpop.permute.xlu0 %3486  ;;  %v3135_v10 = vpack.c.bf16 %v1467_v38, %v1465_v59  ;;  %v1475_v6 = vld [vmem:[%s6144_s3 + $0x4f8] sm:$0xff]  ;;  %v1481_v1 = vld [vmem:[%s6144_s3 + $0x528] sm:$0xff] }
 0x241   :  { %3120 = vmatprep.subr.bf16.mxu0 %v3119_v33  ;;  %v1462_v33 = vld [vmem:[%s6144_s3 + $0x490] sm:$0xff]  ;;  %v3488_v49 = vunpack.i.l.bf16 %v5484_v29  ;;  %v1305_v5 = vsel %vm1208_vm5, %v1155_v57, %v3469_v8  ;;  %v3489_v42 = vunpack.i.h.bf16 %v5484_v29  ;;  %v1097_v60 = vsel %vm1090_vm3, %v3404_v48, %v3464_v55  ;;  %v1483_v59 = vld [vmem:[%s6144_s3 + $0x538] sm:$0xff]  ;;  %v1484_v57 = vld [vmem:[%s6144_s3 + $0x540] sm:$0xff] }
 0x242   :  { %v3133_v32 = vpack.c.bf16 %v1462_v33, %v1460_v53  ;;  %v3143_v20 = vpack.c.bf16 %v1475_v6, %v1473_v4  ;;  %v1298_v63 = vsel %vm1149_vm4, %v1097_v60, %v3473_v12  ;;  %v1098_v48 = vsel %vm1090_vm3, %v3413_v30, %v5443_v62  ;;  %v1238_v33 = vpop.permute.xlu1 %1237  ;;  %v1478_v30 = vld [vmem:[%s6144_s3 + $0x510] sm:$0xff]  ;;  %v1492_v4 = vld [vmem:[%s6144_s3 + $0x580] sm:$0xff] }
 0x243   :  { %1697 = vmatmul.mubr.f32.gmra.mrb[50].mxu0 %v1293_v52  ;;  %v1471_v52 = vld [vmem:[%s6144_s3 + $0x4d8] sm:$0xff]  ;;  %v1494_v6 = vld [vmem:[%s6144_s3 + $0x590] sm:$0xff]  ;;  %v2683_v29 = vld [vmem:[%s6146_s5 + $0x140] sm:$0xff] }
 0x244   :  { %1702 = vmatprep.mubr.f32.mxu0 %v1302_v26  ;;  %3122 = vmatpush1.bf16.msra.mxu0 %v3121_v46  ;;  %v1466_v46 = vld [vmem:[%s6144_s3 + $0x4b0] sm:$0xff]  ;;  %v3139_v26 = vpack.c.bf16 %v1471_v52, %v1469_v51  ;;  %v1489_v52 = vld [vmem:[%s6144_s3 + $0x568] sm:$0xff]  ;;  %v3165_v60 = vpack.c.bf16 %v1494_v6, %v1492_v4 }
 0x245   :  { %3124 = vmatprep.subr.bf16.mxu0 %v3123_v15  ;;  %v3474_v15 = vunpack.i.h.bf16 %v5331_v45  ;;  %v1096_v45 = vsel %vm1090_vm3, %v3403_v16, %v3463_v22  ;;  %v3137_v18 = vpack.c.bf16 %v1466_v46, %v1464_v34  ;;  %v5518_v16 = vpop.permute.xlu0 %1235  ;;  %v3149_v22 = vpack.c.bf16 %v1478_v30, %v1476_v17  ;;  %v1485_v34 = vld [vmem:[%s6144_s3 + $0x548] sm:$0xff]  ;;  %v1487_v46 = vld [vmem:[%s6144_s3 + $0x558] sm:$0xff]  ;;  %v1486_v51 = vld [vmem:[%s6144_s3 + $0x550] sm:$0xff] }
 0x246   :  { %v1297_v54 = vsel %vm1149_vm4, %v1096_v45, %v3458_v2  ;;  %v1268_v38 = vsel %vm1267_vm6, %v5518_v16, %v1238_v33 }
 0x247   :  { %1703 = vmatmul.mubr.f32.gmra.mrb[52].mxu0 %v1294_v25  ;;  %v1156_v58 = vsel %vm1149_vm4, %v3473_v12, %v3474_v15  ;;  %v3141_v25 = vpack.c.bf16 %v1470_v44, %v1468_v37  ;;  %v1242_v15 = vpop.permute.xlu1 %1241  ;;  %v1490_v37 = vld [vmem:[%s6144_s3 + $0x570] sm:$0xff] }
 0x248   :  { %1708 = vmatprep.mubr.f32.mxu0 %v1303_v3  ;;  %3126 = vmatpush1.bf16.msra.mxu0 %v3125_v19  ;;  %v3479_v19 = vunpack.i.h.bf16 %v5347_v61  ;;  %v1474_v3 = vld [vmem:[%s6144_s3 + $0x4f0] sm:$0xff] }
 0x249   :  { %3128 = vmatprep.subr.bf16.mxu0 %v3127_v50  ;;  %v3478_v50 = vunpack.i.l.bf16 %v5347_v61  ;;  %v1306_v61 = vsel %vm1208_vm5, %v1156_v58, %v3488_v49  ;;  %v5556_v27 = vpop.permute.xlu0 %1239  ;;  %v3145_v2 = vpack.c.bf16 %v1474_v3, %v1472_v11  ;;  %v3484_v11 = vunpack.i.h.bf16 %v5365_v28 }
 0x24a   :  { %v1308_v3 = vsel %vm1267_vm6, %v5380_v14, %v5518_v16 }
 0x24b   :  { %1709 = vmatmul.mubr.f32.gmra.mrb[54].mxu0 %v1295_v0  ;;  %v1299_v62 = vsel %vm1149_vm4, %v1098_v48, %v3478_v50  ;;  %v1244_v44 = vpop.permute.xlu1 %1243 }
 0x24c   :  { %1714 = vmatprep.mubr.f32.mxu0 %v1304_v36  ;;  %3130 = vmatpush1.bf16.msra.mxu0 %v3129_v47  ;;  %v1157_v47 = vsel %vm1149_vm4, %v3478_v50, %v3479_v19  ;;  %v3151_v36 = vpack.c.bf16 %v1483_v59, %v1481_v1  ;;  %v1493_v19 = vld [vmem:[%s6144_s3 + $0x588] sm:$0xff]  ;;  %v1495_v50 = vld [vmem:[%s6144_s3 + $0x598] sm:$0xff] }
 0x24d   :  { %3132 = vmatprep.subr.bf16.mxu0 %v3131_v13  ;;  %v1477_v13 = vld [vmem:[%s6144_s3 + $0x508] sm:$0xff]  ;;  %v1307_v53 = vsel %vm1208_vm5, %v1157_v47, %v3489_v42  ;;  %v3163_v58 = vpack.c.bf16 %v1495_v50, %v1493_v19  ;;  %v1269_v47 = vsel %vm1267_vm6, %v5556_v27, %v1242_v15  ;;  %v3511_v50 = vmov 0.0  }
 0x24e   :  { %v3147_v0 = vpack.c.bf16 %v1479_v56, %v1477_v13  ;;  %v1210_v56 = vsel %vm1208_vm5, %v3419_v24, %v3484_v11  ;;  %2004 = vmatprep.mubr.f32.mxu1 %v3511_v50 }
 0x24f   :  { %1715 = vmatmul.mubr.f32.gmra.mrb[56].mxu0 %v1296_v39  ;;  %v3155_v39 = vpack.c.bf16 %v1487_v46, %v1485_v34  ;;  %v1309_v28 = vsel %vm1267_vm6, %v1210_v56, %v5556_v27 }
 0x250   :  { %1720 = vmatprep.mubr.f32.mxu0 %v1305_v5  ;;  %3134 = vmatpush1.bf16.msra.mxu0 %v3133_v32  ;;  %v1482_v32 = vld [vmem:[%s6144_s3 + $0x530] sm:$0xff]  ;;  %v1491_v5 = vld [vmem:[%s6144_s3 + $0x578] sm:$0xff] }
 0x251   :  { %3136 = vmatprep.subr.bf16.mxu0 %v3135_v10  ;;  %v3492_v10 = vpop.permute.xlu0 %3491  ;;  %v3153_v12 = vpack.c.bf16 %v1482_v32, %v1480_v23  ;;  %v3159_v55 = vpack.c.bf16 %v1491_v5, %v1489_v52  ;;  %v2688_v52 = vld [vmem:[%s6146_s5 + $0x168] sm:$0xff]  ;;  %v2690_v5 = vld [vmem:[%s6146_s5 + $0x178] sm:$0xff] }
 0x252   :  { %v3493_v13 = vunpack.i.l.bf16 %v3492_v10 }
 0x253   :  { %1721 = vmatmul.mubr.f32.gmra.mrb[58].mxu0 %v1297_v54 }
 0x254   :  { %1726 = vmatprep.mubr.f32.mxu0 %v1306_v61  ;;  %3138 = vmatpush1.bf16.msra.mxu0 %v3137_v18  ;;  %v3157_v18 = vpack.c.bf16 %v1486_v51, %v1484_v57  ;;  %v1211_v14 = vsel %vm1208_vm5, %v3438_v31, %v3493_v13 }
 0x255   :  { %3140 = vmatprep.subr.bf16.mxu0 %v3139_v26  ;;  %v1246_v45 = vpop.permute.xlu0 %1245  ;;  %v1488_v26 = vld [vmem:[%s6144_s3 + $0x560] sm:$0xff] }
 0x256   :  { %v3161_v54 = vpack.c.bf16 %v1490_v37, %v1488_v26  ;;  %v1270_v33 = vsel %vm1267_vm6, %v1244_v44, %v1246_v45  ;;  %v3187_v45 = vpack.c.bf16 %v2690_v5, %v2688_v52  ;;  %v1888_v37 = vld [vmem:[%s6146_s5 + $0x8] sm:$0xff] }
 0x257   :  { %1727 = vmatmul.mubr.f32.gmra.mrb[60].mxu0 %v1298_v63 }
 0x258   :  { %1732 = vmatprep.mubr.f32.mxu0 %v1307_v53  ;;  %3142 = vmatpush1.bf16.msra.mxu0 %v3141_v25  ;;  %v1248_v25 = vpop.permute.xlu1 %1247  ;;  %v3494_v53 = vunpack.i.h.bf16 %v3492_v10 }
 0x259   :  { %3144 = vmatprep.subr.bf16.mxu0 %v3143_v20  ;;  %v1250_v61 = vpop.permute.xlu0 %1249 }
 0x25a   :  { %v1271_v24 = vsel %vm1267_vm6, %v1248_v25, %v1250_v61  ;;  %v1212_v27 = vsel %vm1208_vm5, %v3439_v21, %v3494_v53  ;;  %v5699_v61 = vld [vmem:[%s6147_s4] ss:$0 sm:$0xff] }
 0x25b   :  { %1733 = vmatmul.mubr.f32.gmra.mrb[62].mxu0 %v1299_v62  ;;  %v1311_v30 = vsel %vm1267_vm6, %v1212_v27, %v1248_v25  ;;  %v1889_v27 = vld [vmem:[%s6146_s5 + $0x10] sm:$0xff] }
 0x25c   :  { %3146 = vmatpush1.bf16.msra.mxu0 %v3145_v2  ;;  %2658 = vmatprep.mubr.msk.f32.mxu0 %vm1496_vm7, %v1268_v38  ;;  %v3497_v63 = vpop.permute.xlu1 %3496  ;;  %v1310_v2 = vsel %vm1267_vm6, %v1211_v14, %v1244_v44  ;;  %v1890_v44 = vld [vmem:[%s6146_s5 + $0x18] sm:$0xff] }
 0x25d   :  { %3148 = vmatprep.subr.bf16.mxu0 %v3147_v0  ;;  %v1252_v20 = vpop.permute.xlu0 %1251  ;;  %v3498_v35 = vunpack.i.l.bf16 %v3497_v63  ;;  %v3499_v1 = vunpack.i.h.bf16 %v3497_v63  ;;  %v3191_v19 = vpack.c.bf16 %v1890_v44, %v1888_v37  ;;  %v1899_v37 = vld [vmem:[%s6146_s5 + $0x60] sm:$0xff]  ;;  %v1901_v44 = vld [vmem:[%s6146_s5 + $0x70] sm:$0xff] }
 0x25f   :  { %v1213_v62 = vsel %vm1208_vm5, %v3468_v9, %v3498_v35 }
 0x260   :  { %3150 = vmatpush1.bf16.msra.mxu0 %v3149_v22  ;;  %v1254_v16 = vpop.permute.xlu1 %1253  ;;  %v1312_v40 = vsel %vm1267_vm6, %v1213_v62, %v1252_v20 }
 0x261   :  { %3152 = vmatprep.subr.bf16.mxu0 %v3151_v36  ;;  %v1256_v48 = vpop.permute.xlu0 %1255  ;;  %v1272_v31 = vsel %vm1267_vm6, %v1252_v20, %v1254_v16  ;;  %v1214_v36 = vsel %vm1208_vm5, %v3469_v8, %v3499_v1 }
 0x262   :  { %v1313_v23 = vsel %vm1267_vm6, %v1214_v36, %v1256_v48  ;;  %v1893_v36 = vld [vmem:[%s6146_s5 + $0x30] sm:$0xff] }
 0x264   :  { %3154 = vmatpush1.bf16.msra.mxu0 %v3153_v12  ;;  %v1258_v17 = vpop.permute.xlu1 %1257 }
 0x265   :  { %3156 = vmatprep.subr.bf16.mxu0 %v3155_v39  ;;  %v3502_v0 = vpop.permute.xlu0 %3501  ;;  %v1273_v21 = vsel %vm1267_vm6, %v1256_v48, %v1258_v17  ;;  %v2686_v39 = vld [vmem:[%s6146_s5 + $0x158] sm:$0xff]  ;;  %v1892_v17 = vld [vmem:[%s6146_s5 + $0x28] sm:$0xff] }
 0x266   :  { %v3503_v38 = vunpack.i.l.bf16 %v3502_v0  ;;  %v3504_v9 = vunpack.i.h.bf16 %v3502_v0 }
 0x268   :  { %3158 = vmatpush1.bf16.msra.mxu0 %v3157_v18  ;;  %v1260_v22 = vpop.permute.xlu1 %1259  ;;  %v1215_v10 = vsel %vm1208_vm5, %v3488_v49, %v3503_v38  ;;  %v1216_v8 = vsel %vm1208_vm5, %v3489_v42, %v3504_v9  ;;  %v2684_v49 = vld [vmem:[%s6146_s5 + $0x148] sm:$0xff]  ;;  %v2685_v42 = vld [vmem:[%s6146_s5 + $0x150] sm:$0xff]  ;;  %v2687_v18 = vld [vmem:[%s6146_s5 + $0x160] sm:$0xff] }
 0x269   :  { %3160 = vmatprep.subr.bf16.mxu0 %v3159_v55  ;;  %v1262_v59 = vpop.permute.xlu0 %1261  ;;  %v1314_v15 = vsel %vm1267_vm6, %v1215_v10, %v1260_v22  ;;  %v3183_v57 = vpack.c.bf16 %v2686_v39, %v2684_v49  ;;  %v3185_v51 = vpack.c.bf16 %v2685_v42, %v2683_v29  ;;  %v2689_v55 = vld [vmem:[%s6146_s5 + $0x170] sm:$0xff]  ;;  %v1896_v9 = vld [vmem:[%s6146_s5 + $0x48] sm:$0xff]  ;;  %v1902_v29 = vld [vmem:[%s6146_s5 + $0x78] sm:$0xff] }
 0x26a   :  { %v1274_v32 = vsel %vm1267_vm6, %v1260_v22, %v1262_v59  ;;  %v3189_v26 = vpack.c.bf16 %v2689_v55, %v2687_v18  ;;  %v1891_v22 = vld [vmem:[%s6146_s5 + $0x20] sm:$0xff]  ;;  %v1897_v49 = vld [vmem:[%s6146_s5 + $0x50] sm:$0xff] }
 0x26b   :  { %3184 = vmatprep.subr.bf16.mxu1 %v3183_v57  ;;  %v1900_v57 = vld [vmem:[%s6146_s5 + $0x68] sm:$0xff] }
 0x26c   :  { %3162 = vmatpush1.bf16.msra.mxu0 %v3161_v54  ;;  %v1264_v46 = vpop.permute.xlu1 %1263  ;;  %3186 = vmatpush1.bf16.msra.mxu1 %v3185_v51  ;;  %v3512_v54 = vmov 0.0|0.0  }
 0x26d   :  { %3164 = vmatprep.subr.bf16.mxu0 %v3163_v58  ;;  %v1266_v34 = vpop.permute.xlu0 %1265  ;;  %v1315_v12 = vsel %vm1267_vm6, %v1216_v8, %v1264_v46  ;;  %3188 = vmatprep.subr.bf16.mxu1 %v3187_v45 }
 0x26e   :  { %v1275_v7 = vsel %vm1267_vm6, %v1264_v46, %v1266_v34  ;;  %v3197_v46 = vpack.c.bf16 %v1893_v36, %v1891_v22  ;;  %v2701_v36 = vld [vmem:[%s6146_s5 + $0x1c0] sm:$0xff] }
 0x270   :  { %3166 = vmatpush1.bf16.msra.mxu0 %v3165_v60  ;;  %3190 = vmatpush1.bf16.msra.mxu1 %v3189_v26  ;;  %v3203_v26 = vpack.c.bf16 %v1902_v29, %v1900_v57  ;;  %v2714_v57 = vld [vmem:[%s6146_s5 + $0x228] sm:$0xff]  ;;  %v2716_v29 = vld [vmem:[%s6146_s5 + $0x238] sm:$0xff] }
 0x271   :  { %3192 = vmatprep.subr.bf16.mxu1 %v3191_v19  ;;  %3329 = vmatprep.subr.bf16.mxu0 %v3512_v54 }
 0x273   :  { %1804 = vmatmul.mubr.f32.vlgmr.msra.gmra.mrb[48].mxu0 %v1308_v3 }
 0x274   :  { %2659 = vmatprep.mubr.msk.f32.mxu0 %vm1496_vm7, %v1269_v47 }
 0x277   :  { %1810 = vmatmul.mubr.f32.gmra.mrb[50].mxu0 %v1309_v28 }
 0x278   :  { %2660 = vmatprep.mubr.msk.f32.mxu0 %vm1496_vm7, %v1270_v33 }
 0x27b   :  { %1816 = vmatmul.mubr.f32.gmra.mrb[52].mxu0 %v1310_v2 }
 0x27c   :  { %2661 = vmatprep.mubr.msk.f32.mxu0 %vm1496_vm7, %v1271_v24  ;;  %v1887_v24 = vld [vmem:[%s6146_s5] sm:$0xff] }
 0x27d   :  { %v3193_v59 = vpack.c.bf16 %v1889_v27, %v1887_v24  ;;  %v2693_v27 = vld [vmem:[%s6146_s5 + $0x180] sm:$0xff] }
 0x27f   :  { %1822 = vmatmul.mubr.f32.gmra.mrb[54].mxu0 %v1311_v30  ;;  %v1894_v30 = vld [vmem:[%s6146_s5 + $0x38] sm:$0xff] }
 0x280   :  { %2662 = vmatprep.mubr.msk.f32.mxu0 %vm1496_vm7, %v1272_v31  ;;  %v3195_v38 = vpack.c.bf16 %v1894_v30, %v1892_v17  ;;  %v2698_v17 = vld [vmem:[%s6146_s5 + $0x1a8] sm:$0xff]  ;;  %v2700_v30 = vld [vmem:[%s6146_s5 + $0x1b8] sm:$0xff] }
 0x283   :  { %1828 = vmatmul.mubr.f32.gmra.mrb[56].mxu0 %v1312_v40 }
 0x284   :  { %2663 = vmatprep.mubr.msk.f32.mxu0 %vm1496_vm7, %v1273_v21 }
 0x287   :  { %1834 = vmatmul.mubr.f32.gmra.mrb[58].mxu0 %v1313_v23 }
 0x288   :  { %2664 = vmatprep.mubr.msk.f32.mxu0 %vm1496_vm7, %v1274_v32  ;;  %v1898_v32 = vld [vmem:[%s6146_s5 + $0x58] sm:$0xff] }
 0x289   :  { %v3199_v8 = vpack.c.bf16 %v1898_v32, %v1896_v9  ;;  %v2706_v9 = vld [vmem:[%s6146_s5 + $0x1e8] sm:$0xff] }
 0x28b   :  { %1840 = vmatmul.mubr.f32.gmra.mrb[60].mxu0 %v1314_v15 }
 0x28c   :  { %2665 = vmatprep.mubr.msk.f32.mxu0 %vm1496_vm7, %v1275_v7 }
 0x28f   :  { %1846 = vmatmul.mubr.f32.gmra.mrb[62].mxu0 %v1315_v12  ;;  %v1895_v12 = vld [vmem:[%s6146_s5 + $0x40] sm:$0xff] }
 0x290   :  { %v3201_v5 = vpack.c.bf16 %v1897_v49, %v1895_v12  ;;  %v2709_v49 = vld [vmem:[%s6146_s5 + $0x200] sm:$0xff]  ;;  %2824 = vmatprep.mubr.msk.f32.mxu0 %vm3513_vm9, %v3511_v50 }
 0x346   :  { %v1805_v58 = vpop.f32.mrb[48].mxu0 }
 0x347   :  { %v1807_v4 = vpop.f32.mrb[49].mxu0 }
 0x348   :  { %v1852_v6 = vmax.f32 %v1805_v58, %v1807_v4  ;;  %v1904_v58 = vld [vmem:[%s6146_s5 + $0x88] sm:$0xff]  ;;  %v1906_v4 = vld [vmem:[%s6146_s5 + $0x98] sm:$0xff] }
 0x34a   :  { %v1811_v25 = vpop.f32.mrb[50].mxu0  ;;  %v1867_v20 = vadd.f32 %v5699_v61, %v1852_v6 }
 0x34b   :  { %v1813_v60 = vpop.f32.mrb[51].mxu0 }
 0x34c   :  { %v1853_v11 = vmax.f32 %v1811_v25, %v1813_v60  ;;  %v1875_v13 = vmax.f32 %v1867_v20, 0.0  ;;  %v3205_v25 = vpack.c.bf16 %v1901_v44, %v1899_v37  ;;  %v3207_v20 = vpack.c.bf16 %v1906_v4, %v1904_v58  ;;  %v2718_v44 = vld [vmem:[%s6146_s5 + $0x240] sm:$0xff]  ;;  %v2723_v58 = vld [vmem:[%s6146_s5 + $0x268] sm:$0xff]  ;;  %v2725_v4 = vld [vmem:[%s6146_s5 + $0x278] sm:$0xff] }
 0x34e   :  { %v1868_v3 = vadd.f32 %v5699_v61, %v1853_v11  ;;  %v1817_v63 = vpop.f32.mrb[52].mxu0  ;;  %v1903_v11 = vld [vmem:[%s6146_s5 + $0x80] sm:$0xff] }
 0x34f   :  { %v1819_v47 = vpop.f32.mrb[53].mxu0 }
 0x350   :  { %v1876_v56 = vmax.f32 %v1868_v3, 0.0  ;;  %v1854_v48 = vmax.f32 %v1817_v63, %v1819_v47  ;;  %v1905_v3 = vld [vmem:[%s6146_s5 + $0x90] sm:$0xff]  ;;  %v1908_v63 = vld [vmem:[%s6146_s5 + $0xa8] sm:$0xff]  ;;  %v1910_v47 = vld [vmem:[%s6146_s5 + $0xb8] sm:$0xff] }
 0x352   :  { %v5703_v28 = vmax.f32 %v1875_v13, %v1876_v56  ;;  %v1823_v53 = vpop.f32.mrb[54].mxu0  ;;  %v1869_v14 = vadd.f32 %v5699_v61, %v1854_v48  ;;  %v3209_v56 = vpack.c.bf16 %v1905_v3, %v1903_v11  ;;  %v2727_v11 = vld [vmem:[%s6146_s5 + $0x288] sm:$0xff]  ;;  %v2729_v3 = vld [vmem:[%s6146_s5 + $0x298] sm:$0xff] }
 0x353   :  { %v1825_v33 = vpop.f32.mrb[55].mxu0 }
 0x354   :  { %v1855_v16 = vmax.f32 %v1823_v53, %v1825_v33  ;;  %v1877_v31 = vmax.f32 %v1869_v14, 0.0  ;;  %v3211_v53 = vpack.c.bf16 %v1910_v47, %v1908_v63  ;;  %v1907_v33 = vld [vmem:[%s6146_s5 + $0xa0] sm:$0xff]  ;;  %v1909_v14 = vld [vmem:[%s6146_s5 + $0xb0] sm:$0xff]  ;;  %v3247_v47 = vpack.c.bf16 %v2729_v3, %v2727_v11 }
 0x355   :  { %v2327_v3 = vld [vmem:[%s6148_s7 + $0xc0] sm:$0xff] }
 0x356   :  { %v1870_v2 = vadd.f32 %v5699_v61, %v1855_v16  ;;  %v1829_v35 = vpop.f32.mrb[56].mxu0  ;;  %v2694_v16 = vld [vmem:[%s6146_s5 + $0x188] sm:$0xff] }
 0x357   :  { %v1831_v0 = vpop.f32.mrb[57].mxu0 }
 0x358   :  { %v1878_v62 = vmax.f32 %v1870_v2, 0.0  ;;  %v1856_v1 = vmax.f32 %v1829_v35, %v1831_v0  ;;  %v2696_v2 = vld [vmem:[%s6146_s5 + $0x198] sm:$0xff]  ;;  %v3213_v35 = vpack.c.bf16 %v1909_v14, %v1907_v33  ;;  %v2695_v0 = vld [vmem:[%s6146_s5 + $0x190] sm:$0xff]  ;;  %v2730_v14 = vld [vmem:[%s6146_s5 + $0x2a0] sm:$0xff] }
 0x359   :  { %v3215_v24 = vpack.c.bf16 %v2696_v2, %v2694_v16  ;;  %v2732_v16 = vld [vmem:[%s6146_s5 + $0x2b0] sm:$0xff]  ;;  %v2735_v2 = vld [vmem:[%s6146_s5 + $0x2c8] sm:$0xff] }
 0x35a   :  { %v1884_v40 = vmax.f32 %v1877_v31, %v1878_v62  ;;  %v1835_v21 = vpop.f32.mrb[58].mxu0  ;;  %v1871_v10 = vadd.f32 %v5699_v61, %v1856_v1  ;;  %v3217_v31 = vpack.c.bf16 %v2695_v0, %v2693_v27  ;;  %v3219_v62 = vpack.c.bf16 %v2700_v30, %v2698_v17  ;;  %v2697_v1 = vld [vmem:[%s6146_s5 + $0x1a0] sm:$0xff]  ;;  %v2736_v17 = vld [vmem:[%s6146_s5 + $0x2d0] sm:$0xff]  ;;  %v2739_v30 = vld [vmem:[%s6146_s5 + $0x2e8] sm:$0xff] }
 0x35b   :  { %v1837_v23 = vpop.f32.mrb[59].mxu0  ;;  %v2734_v0 = vld [vmem:[%s6146_s5 + $0x2c0] sm:$0xff] }
 0x35c   :  { %v1857_v34 = vmax.f32 %v1835_v21, %v1837_v23  ;;  %2691 = vmatmul.mubr.msk.f32.vlgmr.msra.gmra.mrb[48].mxu1 %vm1936_vm8, %v1884_v40  ;;  %v1879_v42 = vmax.f32 %v1871_v10, 0.0  ;;  %v2702_v40 = vld [vmem:[%s6146_s5 + $0x1c8] sm:$0xff]  ;;  %v2704_v21 = vld [vmem:[%s6146_s5 + $0x1d8] sm:$0xff]  ;;  %v2703_v23 = vld [vmem:[%s6146_s5 + $0x1d0] sm:$0xff] }
 0x35d   :  { %3194 = vmatpush1.bf16.msra.mxu1 %v3193_v59  ;;  %2078 = vmatprep.mubr.f32.mxu1 %v3511_v50  ;;  %v2699_v59 = vld [vmem:[%s6146_s5 + $0x1b0] sm:$0xff]  ;;  %v3223_v22 = vpack.c.bf16 %v2704_v21, %v2702_v40  ;;  %v3225_v32 = vpack.c.bf16 %v2703_v23, %v2701_v36 }
 0x35e   :  { %v1872_v15 = vadd.f32 %v5699_v61, %v1857_v34  ;;  %v1841_v7 = vpop.f32.mrb[60].mxu0  ;;  %3196 = vmatprep.subr.bf16.mxu1 %v3195_v38  ;;  %v3221_v38 = vpack.c.bf16 %v2699_v59, %v2697_v1  ;;  %v2705_v34 = vld [vmem:[%s6146_s5 + $0x1e0] sm:$0xff]  ;;  %v2740_v40 = vld [vmem:[%s6146_s5 + $0x2f0] sm:$0xff] }
 0x35f   :  { %v1843_v39 = vpop.f32.mrb[61].mxu0  ;;  %v2738_v59 = vld [vmem:[%s6146_s5 + $0x2e0] sm:$0xff]  ;;  %v2305_v23 = vld [vmem:[%s6148_s7 + $0x10] sm:$0xff] }
 0x360   :  { %v1880_v51 = vmax.f32 %v1872_v15, 0.0  ;;  %v1858_v52 = vmax.f32 %v1841_v7, %v1843_v39  ;;  %v2710_v15 = vld [vmem:[%s6146_s5 + $0x208] sm:$0xff]  ;;  %v2712_v7 = vld [vmem:[%s6146_s5 + $0x218] sm:$0xff]  ;;  %v2711_v39 = vld [vmem:[%s6146_s5 + $0x210] sm:$0xff]  ;;  %v3261_v21 = vpack.c.bf16 %v2740_v40, %v2738_v59 }
 0x361   :  { %3198 = vmatpush1.bf16.msra.mxu1 %v3197_v46  ;;  %v2707_v46 = vld [vmem:[%s6146_s5 + $0x1f0] sm:$0xff]  ;;  %v3231_v12 = vpack.c.bf16 %v2712_v7, %v2710_v15  ;;  %v2311_v7 = vld [vmem:[%s6148_s7 + $0x40] sm:$0xff] }
 0x362   :  { %v5747_v45 = vmax.f32 %v1879_v42, %v1880_v51  ;;  %v1873_v18 = vadd.f32 %v5699_v61, %v1858_v52  ;;  %v1847_v55 = vpop.f32.mrb[62].mxu0  ;;  %3200 = vmatprep.subr.bf16.mxu1 %v3199_v8  ;;  %v3229_v8 = vpack.c.bf16 %v2707_v46, %v2705_v34  ;;  %v3233_v42 = vpack.c.bf16 %v2711_v39, %v2709_v49  ;;  %v2713_v52 = vld [vmem:[%s6146_s5 + $0x220] sm:$0xff]  ;;  %v2310_v46 = vld [vmem:[%s6148_s7 + $0x38] sm:$0xff]  ;;  %v2313_v49 = vld [vmem:[%s6148_s7 + $0x50] sm:$0xff] }
 0x363   :  { %v1849_v19 = vpop.f32.mrb[63].mxu0  ;;  %v3235_v51 = vpack.c.bf16 %v2716_v29, %v2714_v57  ;;  %v2314_v39 = vld [vmem:[%s6148_s7 + $0x58] sm:$0xff]  ;;  %v2315_v29 = vld [vmem:[%s6148_s7 + $0x60] sm:$0xff] }
 0x364   :  { %v1859_v6 = vmax.f32 %v1847_v55, %v1849_v19  ;;  %v1881_v13 = vmax.f32 %v1873_v18, 0.0  ;;  %v2719_v18 = vld [vmem:[%s6146_s5 + $0x248] sm:$0xff]  ;;  %v2721_v55 = vld [vmem:[%s6146_s5 + $0x258] sm:$0xff]  ;;  %v2720_v19 = vld [vmem:[%s6146_s5 + $0x250] sm:$0xff]  ;;  %v3279_v57 = vpack.c.bf16 %v2314_v39, %v2313_v49 }
 0x365   :  { %3202 = vmatpush1.bf16.msra.mxu1 %v3201_v5  ;;  %v2715_v5 = vld [vmem:[%s6146_s5 + $0x230] sm:$0xff]  ;;  %v3239_v37 = vpack.c.bf16 %v2721_v55, %v2719_v18  ;;  %v2319_v55 = vld [vmem:[%s6148_s7 + $0x80] sm:$0xff]  ;;  %v2512_v39 = vld [vmem:[%s6151_s11 + $0x8] sm:$0xff] }
 0x366   :  { %v1874_v60 = vadd.f32 %v5699_v61, %v1859_v6  ;;  %3204 = vmatprep.subr.bf16.mxu1 %v3203_v26  ;;  %v3237_v26 = vpack.c.bf16 %v2715_v5, %v2713_v52  ;;  %v3241_v6 = vpack.c.bf16 %v2720_v19, %v2718_v44  ;;  %v2317_v52 = vld [vmem:[%s6148_s7 + $0x70] sm:$0xff]  ;;  %v2318_v5 = vld [vmem:[%s6148_s7 + $0x78] sm:$0xff]  ;;  %v2511_v49 = vld [vmem:[%s6151_s11] sm:$0xff] }
 0x367   :  { %v3285_v18 = vpack.c.bf16 %v2318_v5, %v2317_v52  ;;  %v2321_v44 = vld [vmem:[%s6148_s7 + $0x90] sm:$0xff]  ;;  %v2322_v19 = vld [vmem:[%s6148_s7 + $0x98] sm:$0xff]  ;;  %v2516_v52 = vld [vmem:[%s6151_s11 + $0x28] sm:$0xff] }
 0x368   :  { %v1882_v61 = vmax.f32 %v1874_v60, 0.0  ;;  %v2722_v60 = vld [vmem:[%s6146_s5 + $0x260] sm:$0xff] }
 0x369   :  { %3206 = vmatpush1.bf16.msra.mxu1 %v3205_v25  ;;  %v3243_v25 = vpack.c.bf16 %v2725_v4, %v2723_v58  ;;  %v3291_v58 = vpack.c.bf16 %v2322_v19, %v2321_v44  ;;  %v2323_v4 = vld [vmem:[%s6148_s7 + $0xa0] sm:$0xff] }
 0x36a   :  { %v5775_v48 = vmax.f32 %v1881_v13, %v1882_v61  ;;  %3208 = vmatprep.subr.bf16.mxu1 %v3207_v20  ;;  %v2724_v20 = vld [vmem:[%s6146_s5 + $0x270] sm:$0xff]  ;;  %v2726_v13 = vld [vmem:[%s6146_s5 + $0x280] sm:$0xff] }
 0x36b   :  { %v3245_v63 = vpack.c.bf16 %v2724_v20, %v2722_v60  ;;  %v2728_v61 = vld [vmem:[%s6146_s5 + $0x290] sm:$0xff]  ;;  %v2326_v20 = vld [vmem:[%s6148_s7 + $0xb8] sm:$0xff] }
 0x36c   :  { %v2325_v60 = vld [vmem:[%s6148_s7 + $0xb0] sm:$0xff] }
 0x36d   :  { %3210 = vmatpush1.bf16.msra.mxu1 %v3209_v56  ;;  %v2731_v56 = vld [vmem:[%s6146_s5 + $0x2a8] sm:$0xff]  ;;  %v3297_v11 = vpack.c.bf16 %v2326_v20, %v2325_v60 }
 0x36e   :  { %3212 = vmatprep.subr.bf16.mxu1 %v3211_v53  ;;  %v3249_v53 = vpack.c.bf16 %v2728_v61, %v2726_v13  ;;  %v2329_v13 = vld [vmem:[%s6148_s7 + $0xd0] sm:$0xff]  ;;  %v2330_v61 = vld [vmem:[%s6148_s7 + $0xd8] sm:$0xff] }
 0x371   :  { %3214 = vmatpush1.bf16.msra.mxu1 %v3213_v35  ;;  %v2737_v35 = vld [vmem:[%s6146_s5 + $0x2d8] sm:$0xff] }
 0x372   :  { %3216 = vmatprep.subr.bf16.mxu1 %v3215_v24  ;;  %v3253_v24 = vpack.c.bf16 %v2732_v16, %v2730_v14  ;;  %v3255_v27 = vpack.c.bf16 %v2737_v35, %v2735_v2  ;;  %v2287_v14 = vld [vmem:[%s6149_s6] sm:$0x3]  ;;  %v6186_v16 = vsub.s32 0, %v4740_v41  ;;  %v2416_v41 = vld [vmem:[%s6150_s9 + $0x10] sm:$0xff] }
 0x373   :  { %v2296_v35 = vrot.slane %v2287_v14, %v990_v43  ;;  %v2417_v43 = vld [vmem:[%s6150_s9 + $0x18] sm:$0xff] }
 0x374   :  { %2692 = vmatmul.mubr.msk.f32.vlgmr.msra.gmra.mrb[48].mxu1 %vm1936_vm8, %v5703_v28  ;;  %v2708_v28 = vld [vmem:[%s6146_s5 + $0x1f8] sm:$0xff]  ;;  %v2292_v2 = vrot.slane %v2287_v14, %v6186_v16  ;;  %v3312_v40 = vpack.c.bf16 %v2417_v43, %v2416_v41 }
 0x375   :  { %3218 = vmatpush1.bf16.msra.mxu1 %v3217_v31  ;;  %2177 = vmatprep.mubr.f32.mxu1 %v3511_v50  ;;  %v3227_v10 = vpack.c.bf16 %v2708_v28, %v2706_v9  ;;  %v2741_v31 = vld [vmem:[%s6146_s5 + $0x2f8] sm:$0xff] }
 0x376   :  { %3220 = vmatprep.subr.bf16.mxu1 %v3219_v62  ;;  %v3257_v62 = vpack.c.bf16 %v2736_v17, %v2734_v0  ;;  %v3259_v1 = vpack.c.bf16 %v2741_v31, %v2739_v30  ;;  %v2306_v9 = vld [vmem:[%s6148_s7 + $0x18] sm:$0xff]  ;;  %v2414_v17 = vld [vmem:[%s6150_s9] sm:$0xff]  ;;  %v2415_v30 = vld [vmem:[%s6150_s9 + $0x8] sm:$0xff] }
 0x377   :  { %v3267_v28 = vpack.c.bf16 %v2306_v9, %v2305_v23  ;;  %v2421_v23 = vld [vmem:[%s6150_s9 + $0x38] sm:$0xff] }
 0x379   :  { %3222 = vmatpush1.bf16.msra.mxu1 %v3221_v38  ;;  %v2303_v38 = vld [vmem:[%s6148_s7] sm:$0xff] }
 0x37a   :  { %3224 = vmatprep.subr.bf16.mxu1 %v3223_v22  ;;  %v2304_v22 = vld [vmem:[%s6148_s7 + $0x8] sm:$0xff] }
 0x37b   :  { %v3264_v36 = vpack.c.bf16 %v2304_v22, %v2303_v38  ;;  %v2419_v38 = vld [vmem:[%s6150_s9 + $0x28] sm:$0xff] }
 0x37d   :  { %3226 = vmatpush1.bf16.msra.mxu1 %v3225_v32  ;;  %v2307_v32 = vld [vmem:[%s6148_s7 + $0x20] sm:$0xff] }
 0x37e   :  { %3228 = vmatprep.subr.bf16.mxu1 %v3227_v10  ;;  %v2308_v10 = vld [vmem:[%s6148_s7 + $0x28] sm:$0xff] }
 0x37f   :  { %v3270_v34 = vpack.c.bf16 %v2308_v10, %v2307_v32  ;;  %v2423_v32 = vld [vmem:[%s6150_s9 + $0x48] sm:$0xff] }
 0x381   :  { %3230 = vmatpush1.bf16.msra.mxu1 %v3229_v8  ;;  %v2312_v8 = vld [vmem:[%s6148_s7 + $0x48] sm:$0xff] }
 0x382   :  { %3232 = vmatprep.subr.bf16.mxu1 %v3231_v12  ;;  %v3276_v12 = vpack.c.bf16 %v2312_v8, %v2311_v7  ;;  %v2427_v7 = vld [vmem:[%s6150_s9 + $0x68] sm:$0xff] }
 0x385   :  { %3234 = vmatpush1.bf16.msra.mxu1 %v3233_v42  ;;  %v2316_v42 = vld [vmem:[%s6148_s7 + $0x68] sm:$0xff] }
 0x386   :  { %3236 = vmatprep.subr.bf16.mxu1 %v3235_v51  ;;  %v3282_v51 = vpack.c.bf16 %v2316_v42, %v2315_v29  ;;  %v3330_v29 = vpack.c.bf16 %v2512_v39, %v2511_v49  ;;  %v2514_v42 = vld [vmem:[%s6151_s11 + $0x18] sm:$0xff] }
 0x388   :  { %3331 = vmatpush3.bf16.msra.mxu0 %v3330_v29 }
 0x389   :  { %3238 = vmatpush1.bf16.msra.mxu1 %v3237_v26  ;;  %v2320_v26 = vld [vmem:[%s6148_s7 + $0x88] sm:$0xff]  ;;  %3332 = vmatprep.subr.bf16.mxu0 %v3512_v54 }
 0x38a   :  { %3240 = vmatprep.subr.bf16.mxu1 %v3239_v37  ;;  %v3288_v37 = vpack.c.bf16 %v2320_v26, %v2319_v55  ;;  %v2518_v55 = vld [vmem:[%s6151_s11 + $0x38] sm:$0xf] }
 0x38c   :  { %2717 = vmatmul.mubr.msk.f32.vlgmr.msra.gmra.mrb[48].mxu1 %vm1936_vm8, %v5747_v45  ;;  %v2733_v45 = vld [vmem:[%s6146_s5 + $0x2b8] sm:$0xff] }
 0x38d   :  { %3242 = vmatpush1.bf16.msra.mxu1 %v3241_v6  ;;  %2278 = vmatprep.mubr.f32.mxu1 %v3511_v50  ;;  %v3251_v33 = vpack.c.bf16 %v2733_v45, %v2731_v56  ;;  %v2324_v6 = vld [vmem:[%s6148_s7 + $0xa8] sm:$0xff]  ;;  %v3303_v56 = vpack.c.bf16 %v2330_v61, %v2329_v13  ;;  %v2331_v45 = vld [vmem:[%s6148_s7 + $0xe0] sm:$0xff] }
 0x38e   :  { %3244 = vmatprep.subr.bf16.mxu1 %v3243_v25  ;;  %v3294_v25 = vpack.c.bf16 %v2324_v6, %v2323_v4  ;;  %v2745_v6 = vld [vmem:[%s6153_s10] ss:$0 sm:$0xff] }
 0x391   :  { %3246 = vmatpush1.bf16.msra.mxu1 %v3245_v63  ;;  %v2328_v63 = vld [vmem:[%s6148_s7 + $0xc8] sm:$0xff] }
 0x392   :  { %3248 = vmatprep.subr.bf16.mxu1 %v3247_v47  ;;  %v3300_v47 = vpack.c.bf16 %v2328_v63, %v2327_v3 }
 0x395   :  { %3250 = vmatpush1.bf16.msra.mxu1 %v3249_v53  ;;  %v2332_v53 = vld [vmem:[%s6148_s7 + $0xe8] sm:$0xff] }
 0x396   :  { %3252 = vmatprep.subr.bf16.mxu1 %v3251_v33  ;;  %v3306_v33 = vpack.c.bf16 %v2332_v53, %v2331_v45 }
 0x399   :  { %3254 = vmatpush1.bf16.msra.mxu1 %v3253_v24 }
 0x39a   :  { %3256 = vmatprep.subr.bf16.mxu1 %v3255_v27 }
 0x39d   :  { %3258 = vmatpush1.bf16.msra.mxu1 %v3257_v62 }
 0x39e   :  { %3260 = vmatprep.subr.bf16.mxu1 %v3259_v1  ;;  %v3309_v1 = vpack.c.bf16 %v2415_v30, %v2414_v17 }
 0x3a1   :  { %3262 = vmatpush1.bf16.msra.mxu1 %v3261_v21  ;;  %v2418_v21 = vld [vmem:[%s6150_s9 + $0x20] sm:$0xff] }
 0x3a2   :  { %3263 = vmatprep.subr.bf16.mxu1 %v3512_v54  ;;  %v3315_v22 = vpack.c.bf16 %v2419_v38, %v2418_v21 }
 0x3a4   :  { %2742 = vmatmul.mubr.msk.f32.vlgmr.msra.gmra.mrb[48].mxu1 %vm1936_vm8, %v5775_v48  ;;  %v2309_v48 = vld [vmem:[%s6148_s7 + $0x30] sm:$0xff] }
 0x3a5   :  { %3265 = vmatpush1.bf16.msra.mxu1 %v3264_v36  ;;  %v3273_v15 = vpack.c.bf16 %v2310_v46, %v2309_v48  ;;  %v2420_v36 = vld [vmem:[%s6150_s9 + $0x30] sm:$0xff]  ;;  %v2425_v48 = vld [vmem:[%s6150_s9 + $0x58] sm:$0xff] }
 0x3a6   :  { %3266 = vmatprep.subr.bf16.mxu1 %v3512_v54  ;;  %v3318_v9 = vpack.c.bf16 %v2421_v23, %v2420_v36 }
 0x3a9   :  { %3268 = vmatpush1.bf16.msra.mxu1 %v3267_v28  ;;  %v2422_v28 = vld [vmem:[%s6150_s9 + $0x40] sm:$0xff] }
 0x3aa   :  { %3269 = vmatprep.subr.bf16.mxu1 %v3512_v54  ;;  %v3321_v10 = vpack.c.bf16 %v2423_v32, %v2422_v28 }
 0x3ad   :  { %3271 = vmatpush1.bf16.msra.mxu1 %v3270_v34  ;;  %v2424_v34 = vld [vmem:[%s6150_s9 + $0x50] sm:$0xff] }
 0x3ae   :  { %3272 = vmatprep.subr.bf16.mxu1 %v3512_v54  ;;  %v3324_v46 = vpack.c.bf16 %v2425_v48, %v2424_v34 }
 0x3b1   :  { %3274 = vmatpush1.bf16.msra.mxu1 %v3273_v15  ;;  %v2426_v15 = vld [vmem:[%s6150_s9 + $0x60] sm:$0xff] }
 0x3b2   :  { %3275 = vmatprep.subr.bf16.mxu1 %v3512_v54  ;;  %v3327_v8 = vpack.c.bf16 %v2427_v7, %v2426_v15 }
 0x3b5   :  { %3277 = vmatpush1.bf16.msra.mxu1 %v3276_v12  ;;  %v2428_v12 = vld [vmem:[%s6150_s9 + $0x70] sm:$0xff] }
 0x3b6   :  { %3278 = vmatprep.subr.bf16.mxu1 %v3512_v54 }
 0x3b9   :  { %3280 = vmatpush1.bf16.msra.mxu1 %v3279_v57  ;;  %v2513_v57 = vld [vmem:[%s6151_s11 + $0x10] sm:$0xff] }
 0x3ba   :  { %3281 = vmatprep.subr.bf16.mxu1 %v3512_v54 }
 0x3bd   :  { %3283 = vmatpush1.bf16.msra.mxu1 %v3282_v51  ;;  %v3333_v51 = vpack.c.bf16 %v2514_v42, %v2513_v57 }
 0x3be   :  { %3284 = vmatprep.subr.bf16.mxu1 %v3512_v54 }
 0x3bf   :  { %3334 = vmatpush3.bf16.msra.mxu0 %v3333_v51 }
 0x3c0   :  { %3335 = vmatprep.subr.bf16.mxu0 %v3512_v54 }
 0x3c1   :  { %3286 = vmatpush1.bf16.msra.mxu1 %v3285_v18  ;;  %v2517_v18 = vld [vmem:[%s6151_s11 + $0x30] sm:$0xff] }
 0x3c2   :  { %3287 = vmatprep.subr.bf16.mxu1 %v3512_v54  ;;  %v3339_v26 = vpack.c.bf16 %v2518_v55, %v2517_v18 }
 0x3c5   :  { %3289 = vmatpush1.bf16.msra.mxu1 %v3288_v37  ;;  %v2743_v37 = vld [vmem:[%s6152_s8] ss:$0 sm:$0xff] }
 0x3c6   :  { %3290 = vmatprep.subr.bf16.mxu1 %v3512_v54 }
 0x3c9   :  { %3292 = vmatpush1.bf16.msra.mxu1 %v3291_v58 }
 0x3ca   :  { %3293 = vmatprep.subr.bf16.mxu1 %v3512_v54 }
 0x3cd   :  { %3295 = vmatpush1.bf16.msra.mxu1 %v3294_v25 }
 0x3ce   :  { %3296 = vmatprep.subr.bf16.mxu1 %v3512_v54 }
 0x3d1   :  { %3298 = vmatpush1.bf16.msra.mxu1 %v3297_v11  ;;  %v2747_v11 = vld [vmem:[%s6154_s12] ss:$0 sm:$0xff] }
 0x3d2   :  { %3299 = vmatprep.subr.bf16.mxu1 %v3512_v54 }
 0x3d5   :  { %3301 = vmatpush1.bf16.msra.mxu1 %v3300_v47 }
 0x3d6   :  { %3302 = vmatprep.subr.bf16.mxu1 %v3512_v54 }
 0x3d9   :  { %3304 = vmatpush1.bf16.msra.mxu1 %v3303_v56 }
 0x3da   :  { %3305 = vmatprep.subr.bf16.mxu1 %v3512_v54 }
 0x3dd   :  { %3307 = vmatpush1.bf16.msra.mxu1 %v3306_v33 }
 0x3de   :  { %3308 = vmatprep.subr.bf16.mxu1 %v3512_v54 }
 0x477   :  { %v2280_v24 = vpop.f32.mrb[48].mxu1 }
 0x478   :  { %v2299_v27 = vadd.f32 %v2292_v2, %v2280_v24  ;;  %v2282_v0 = vpop.f32.mrb[49].mxu1 }
 0x479   :  { %v2300_v31 = vadd.f32 %v2296_v35, %v2282_v0 }
 0x47a   :  { %v2301_v59 = vmax.f32 %v2299_v27, 0.0 }
 0x47b   :  { %v2302_v62 = vmax.f32 %v2300_v31, 0.0 }
 0x47d   :  { %2744 = vmatprep.mubr.msk.f32.mxu1 %vm156_vm2, %v2302_v62 }
 0x47e   :  { %2408 = vmatmul.mubr.f32.vlgmr.msra.gmra.mrb[50].mxu1 %v2301_v59 }
 0x47f   :  { %3310 = vmatpush3.bf16.msra.mxu1 %v3309_v1  ;;  %2805 = vmatprep.mubr.msk.f32.mxu1 %vm3513_vm9, %v3511_v50 }
 0x480   :  { %3311 = vmatprep.subr.bf16.mxu1 %v3512_v54 }
 0x483   :  { %3313 = vmatpush3.bf16.msra.mxu1 %v3312_v40 }
 0x484   :  { %3314 = vmatprep.subr.bf16.mxu1 %v3512_v54 }
 0x487   :  { %3316 = vmatpush3.bf16.msra.mxu1 %v3315_v22 }
 0x488   :  { %3317 = vmatprep.subr.bf16.mxu1 %v3512_v54 }
 0x48b   :  { %3319 = vmatpush3.bf16.msra.mxu1 %v3318_v9 }
 0x48c   :  { %3320 = vmatprep.subr.bf16.mxu1 %v3512_v54 }
 0x48f   :  { %3322 = vmatpush3.bf16.msra.mxu1 %v3321_v10 }
 0x490   :  { %3323 = vmatprep.subr.bf16.mxu1 %v3512_v54 }
 0x493   :  { %3325 = vmatpush3.bf16.msra.mxu1 %v3324_v46 }
 0x494   :  { %3326 = vmatprep.subr.bf16.mxu1 %v3512_v54 }
 0x497   :  { %3328 = vmatpush3.bf16.msra.mxu1 %v3327_v8 }
 0x498   :  { %2803 = vmatprep.subr.mxu1 %v3511_v50  ;;  %v2515_v50 = vld [vmem:[%s6151_s11 + $0x20] sm:$0xff] }
 0x499   :  { %v3336_v5 = vpack.c.bf16 %v2516_v52, %v2515_v50 }
 0x49b   :  { %2804 = vmatpush3.msra.mxu1 %v2428_v12  ;;  %3337 = vmatpush3.bf16.msra.mxu0 %v3336_v5 }
 0x49c   :  { %3338 = vmatprep.subr.bf16.mxu0 %v3512_v54 }
 0x49f   :  { %3341 = vmatpush3.bf16.msk.msra.mxu0 %vm3340_vm12, %v3339_v26 }
 0x551   :  { %v2409_v44 = vpop.f32.mrb[50].mxu1 }
 0x552   :  { %v2410_v19 = vadd.f32 %v2743_v37, %v2409_v44  ;;  %v2411_v58 = vpop.f32.mrb[51].mxu1 }
 0x554   :  { %v2413_v4 = vmax.f32 %v2410_v19, 0.0 }
 0x556   :  { %2806 = vmatmul.mubr.msk.f32.vlgmr.msra.gmra.mrb[52].mxu1 %vm2436_vm13, %v2413_v4 }
 0x629   :  { %v2506_v25 = vpop.f32.mrb[52].mxu1 }
 0x62a   :  { %v2507_v60 = vadd.f32 %v2745_v6, %v2506_v25  ;;  %v2807_v54 = vpop.f32.mrb[53].mxu1 }
 0x62c   :  { %v2510_v20 = vmax.f32 %v2507_v60, 0.0 }
 0x62e   :  { %2825 = vmatmul.mubr.msk.f32.vlgmr.msra.gmra.mrb[64].mxu0 %vm2526_vm14, %v2510_v20 }
 0x701   :  { %v2600_v3 = vpop.f32.mrb[64].mxu0 }
 0x702   :  { %v2601_v63 = vadd.f32 %v2747_v11, %v2600_v3  ;;  %v2826_v47 = vpop.f32.mrb[65].mxu0 }
 0x704   :  { %2605 = vst.msk [vmem:[%s6155_s13] sm:$0xff] %vm2604_vm15, %v2601_v63 }

</bundles_post_ra>
